<compile_context>
chip_gen: v5e
topology: v5e:2x2
jax: 0.10.0
libtpu: 0.0.40
codegen_flags: <defaults>
</compile_context>

<pallas_src>
import functools

import jax
import jax.numpy as jnp
from jax.experimental import pallas as pl
from jax.experimental.pallas import tpu as pltpu

EPS = 1e-5
LANE = 128


def _round_up(x, m):
    return (x + m - 1) // m * m


def _default_vmem_limit():
    """~half of physical VMEM on 64 MiB parts (v7x), ~3/4 on 128 MiB parts (v5e/v6e)."""
    cap = 64 * 1024 * 1024
    try:
        cap = int(getattr(pltpu.get_tpu_info(), "vmem_capacity_bytes", cap))
    except Exception:
        pass
    if cap <= 64 * 1024 * 1024:
        limit = cap // 2
    else:
        limit = min((cap * 3) // 4, 96 * 1024 * 1024)
    return max(limit, 32 * 1024 * 1024)


def _conv_relu_stats_kernel(x_ref, w_ref, b_ref, v_ref, y_ref, s_ref, ss_ref, acc_ref,
                            *, shifts, tile_p, num_sp_tiles):
    # x_ref : (HWpad, C)       bf16  whole flattened image (resident across the tile axis)
    # w_ref : (KH*KW, C, OCp)  bf16  per-tap weight slabs (single-buffered, constant index)
    # b_ref : (1, OCp)         f32
    # v_ref : (TILE_P, 1)      f32   1.0 for real (oh, ow) positions, 0.0 for junk/pad rows
    # y_ref : (TILE_P, OCp)    bf16  relu(conv + bias), stored bf16
    # s_ref / ss_ref : (8, OCp) f32  per-tile partial sum / sum-of-squares over valid rows
    # acc_ref: (TILE_P, OCp)   f32   VMEM scratch accumulator for the tap loop
    if num_sp_tiles == 1:
        base = 0                                      # fully static slicing (cheapest path)
    else:
        base = pl.multiple_of(pl.program_id(1) * tile_p, 16)

    # Tap 0 initializes the accumulator, remaining KH*KW-1 taps accumulate (static unroll).
    patch0 = x_ref[pl.ds(base + shifts[0], tile_p), :]
    acc_ref[...] = jnp.dot(patch0, w_ref[0], preferred_element_type=jnp.float32)
    for tap in range(1, len(shifts)):
        patch = x_ref[pl.ds(base + shifts[tap], tile_p), :]
        acc_ref[...] += jnp.dot(patch, w_ref[tap], preferred_element_type=jnp.float32)

    y = jnp.maximum(acc_ref[...] + b_ref[...], 0.0)    # bias + ReLU in f32 (v5e-safe)
    y_ref[...] = y.astype(y_ref.dtype)                 # bf16 intermediate store

    ym = y * v_ref[...]                                # mask junk columns / padding rows
    s = jnp.sum(ym, axis=0, keepdims=True)             # (1, OCp)
    ss = jnp.sum(ym * y, axis=0, keepdims=True)        # valid * y^2
    s_ref[...] = jnp.broadcast_to(s, s_ref.shape)      # sublane-broadcast keeps (8,128) tiling
    ss_ref[...] = jnp.broadcast_to(ss, ss_ref.shape)


def _bn_apply_kernel(y_ref, scale_ref, shift_ref, o_ref):
    # y_ref: (TILE_P, OCp) bf16   scale/shift: (1, OCp) f32   o_ref: (TILE_P, OCp) f32
    o_ref[...] = y_ref[...].astype(jnp.float32) * scale_ref[...] + shift_ref[...]


def conv_block_forward(x, weight, bias, gamma, beta, *, tile_p=512, channels_last=True,
                       vmem_limit_bytes=None):
    """
    x:      (N, C_in, H, W) f32 (NCHW, PyTorch convention)
    weight: (OC, C_in, KH, KW)    bias/gamma/beta: (OC,)
    Conv2d(stride=1, padding=0) -> ReLU -> BatchNorm2d (training-mode batch stats, eps=1e-5).
    Returns NHWC (N, OH, OW, OC) by default (lane-dense OC); channels_last=False returns the
    module's NCHW layout at the cost of one extra XLA transpose pass over the output.
    """
    n, c_in, h, w = x.shape
    oc, _, kh, kw = weight.shape
    oh, ow = h - kh + 1, w - kw + 1
    assert oh > 0 and ow > 0

    oc_pad = _round_up(oc, LANE)

    # ---- spatial tiling over the "full-W" output domain (p = oh*W + ow', ow' in [0, W)) ----
    p_need = oh * w
    tile_p_eff = min(_round_up(tile_p, 16), _round_up(p_need, 16))   # 16-row (bf16) alignment
    num_sp_tiles = pl.cdiv(p_need, tile_p_eff)
    # v7x megacore: keep the total grid-step count even so the two TensorCores stay balanced.
    if num_sp_tiles > 1 and (n * num_sp_tiles) % 2 == 1:
        num_sp_tiles += 1
    p_pad = num_sp_tiles * tile_p_eff
    s_max = (kh - 1) * w + (kw - 1)                    # largest tap shift
    hw_pad = _round_up(max(h * w, p_pad + s_max), 16)  # rows readable by any tap, zero-padded

    # ---- operand prep (one fused cast/transpose pass over x; NO im2col blow-up) ----
    x_flat = x.transpose(0, 2, 3, 1).reshape(n, h * w, c_in).astype(jnp.bfloat16)
    x_flat = jnp.pad(x_flat, ((0, 0), (0, hw_pad - h * w), (0, 0)))

    # Per-tap weight slabs: w3[i*KW + j, c, oc] = weight[oc, c, i, j]; tap shift = i*W + j.
    w3 = weight.transpose(2, 3, 1, 0).reshape(kh * kw, c_in, oc).astype(jnp.bfloat16)
    w3 = jnp.pad(w3, ((0, 0), (0, 0), (0, oc_pad - oc)))
    b2d = jnp.pad(bias.astype(jnp.float32), (0, oc_pad - oc)).reshape(1, oc_pad)
    shifts = tuple(i * w + j for i in range(kh) for j in range(kw))

    # Row-validity mask over the full-W output domain (junk columns ow' >= OW, padding rows).
    pp = jnp.arange(p_pad, dtype=jnp.int32)
    valid = (((pp % w) < ow) & (pp < oh * w)).astype(jnp.float32).reshape(p_pad, 1)

    if vmem_limit_bytes is None:
        vmem_limit_bytes = _default_vmem_limit()
    cparams = pltpu.CompilerParams(
        dimension_semantics=("parallel", "parallel"),
        vmem_limit_bytes=vmem_limit_bytes,
    )

    nt = n * num_sp_tiles

    # ---- pass 1: in-kernel tap loop (conv) + bias + ReLU + per-tile partial BN stats ----
    kernel1 = functools.partial(_conv_relu_stats_kernel, shifts=shifts,
                                tile_p=tile_p_eff, num_sp_tiles=num_sp_tiles)
    cost1 = pl.CostEstimate(
        flops=2 * n * p_pad * c_in * kh * kw * oc_pad,
        transcendentals=0,
        bytes_accessed=int(x_flat.size * 2 + w3.size * 2 + b2d.size * 4
                           + n * p_pad * oc_pad * 2 + nt * 16 * oc_pad * 4),
    )
    y, psum, psumsq = pl.pallas_call(
        kernel1,
        out_shape=(
            jax.ShapeDtypeStruct((n, p_pad, oc_pad), jnp.bfloat16),   # bf16 intermediate
            jax.ShapeDtypeStruct((nt * 8, oc_pad), jnp.float32),
            jax.ShapeDtypeStruct((nt * 8, oc_pad), jnp.float32),
        ),
        grid=(n, num_sp_tiles),
        in_specs=[
            pl.BlockSpec((None, hw_pad, c_in), lambda ni, ti: (ni, 0, 0)),
            pl.BlockSpec((kh * kw, c_in, oc_pad), lambda ni, ti: (0, 0, 0),
                         pipeline_mode=pl.Buffered(1)),
            pl.BlockSpec((1, oc_pad), lambda ni, ti: (0, 0),
                         pipeline_mode=pl.Buffered(1)),
            pl.BlockSpec((tile_p_eff, 1), lambda ni, ti: (ti, 0)),
        ],
        out_specs=(
            pl.BlockSpec((None, tile_p_eff, oc_pad), lambda ni, ti: (ni, ti, 0)),
            pl.BlockSpec((8, oc_pad), lambda ni, ti: (ni * num_sp_tiles + ti, 0)),
            pl.BlockSpec((8, oc_pad), lambda ni, ti: (ni * num_sp_tiles + ti, 0)),
        ),
        scratch_shapes=[pltpu.VMEM((tile_p_eff, oc_pad), jnp.float32)],
        compiler_params=cparams,
        cost_estimate=cost1,
    )(x_flat, w3, b2d, valid)

    # ---- tiny plain-JAX reduction of per-tile partials -> per-channel scale/shift ----
    count = float(n * oh * ow)
    psum = psum.reshape(nt, 8, oc_pad)[:, 0, :]        # dense reshape, no strided HBM slice
    psumsq = psumsq.reshape(nt, 8, oc_pad)[:, 0, :]
    mean = psum.sum(axis=0) / count
    ex2 = psumsq.sum(axis=0) / count
    # TODO(synk): E[x^2]-E[x]^2 in f32 is cancellation-prone for very large M; use a Welford
    #             merge of per-tile (count, mean, M2) partials if BN-stat precision matters.
    var = jnp.maximum(ex2 - mean * mean, 0.0)          # biased variance (PyTorch training BN)
    inv = jax.lax.rsqrt(var + EPS)
    g = jnp.pad(gamma.astype(jnp.float32), (0, oc_pad - oc), constant_values=1.0)
    be = jnp.pad(beta.astype(jnp.float32), (0, oc_pad - oc))
    scale = (g * inv).reshape(1, oc_pad)
    shift = (be - mean * g * inv).reshape(1, oc_pad)

    # ---- pass 2: tiled elementwise normalize (reads bf16 y, writes f32 output) ----
    out = pl.pallas_call(
        _bn_apply_kernel,
        out_shape=jax.ShapeDtypeStruct((n, p_pad, oc_pad), jnp.float32),
        grid=(n, num_sp_tiles),
        in_specs=[
            pl.BlockSpec((None, tile_p_eff, oc_pad), lambda ni, ti: (ni, ti, 0)),
            pl.BlockSpec((1, oc_pad), lambda ni, ti: (0, 0), pipeline_mode=pl.Buffered(1)),
            pl.BlockSpec((1, oc_pad), lambda ni, ti: (0, 0), pipeline_mode=pl.Buffered(1)),
        ],
        out_specs=pl.BlockSpec((None, tile_p_eff, oc_pad), lambda ni, ti: (ni, ti, 0)),
        compiler_params=cparams,
    )(y, scale, shift)
    # (No input_output_aliases: y is bf16 and the delivered output is f32, so they can't alias.)

    out = out[:, :oh * w, :oc].reshape(n, oh, w, oc)[:, :, :ow, :]   # drop junk/pad, -> NHWC
    if channels_last:
        return out
    # NCHW costs one extra XLA pass over the output with OC off the lane axis.
    return out.transpose(0, 3, 1, 2)


if __name__ == "__main__":
    key = jax.random.PRNGKey(0)
    k_x, k_w, k_b = jax.random.split(key, 3)

    N, C_IN, H, W = 2, 4, 16, 16
    OC, KH, KW = 8, 5, 5

    x = jax.random.normal(k_x, (N, C_IN, H, W), dtype=jnp.float32)
    weight = jax.random.normal(k_w, (OC, C_IN, KH, KW), dtype=jnp.float32) * 0.1
    bias = jax.random.normal(k_b, (OC,), dtype=jnp.float32) * 0.1
    gamma = jnp.ones((OC,), dtype=jnp.float32)      # BatchNorm2d init: weight = 1
    beta = jnp.zeros((OC,), dtype=jnp.float32)      # BatchNorm2d init: bias = 0

    y_nhwc = conv_block_forward(x, weight, bias, gamma, beta, channels_last=True)
    jax.block_until_ready(y_nhwc)

    # Pure-JAX reference (f32 math on bf16-rounded operands, PyTorch training-mode BN).
    # The kernel additionally stores the conv+ReLU intermediate in bf16, which bounds the
    # deviation at ~0.4% of the pre-BN activation -> compare with atol/rtol = 2e-2.
    xr = x.astype(jnp.bfloat16).astype(jnp.float32)
    wr = weight.astype(jnp.bfloat16).astype(jnp.float32)
    conv = jax.lax.conv_general_dilated(
        xr, wr, window_strides=(1, 1), padding="VALID",
        dimension_numbers=("NCHW", "OIHW", "NCHW"),
        precision=jax.lax.Precision.HIGHEST,
    ) + bias.reshape(1, OC, 1, 1)
    act = jnp.maximum(conv, 0.0)
    mu = act.mean(axis=(0, 2, 3), keepdims=True)
    var = ((act - mu) ** 2).mean(axis=(0, 2, 3), keepdims=True)
    ref = (act - mu) * jax.lax.rsqrt(var + EPS) * gamma.reshape(1, OC, 1, 1) \
          + beta.reshape(1, OC, 1, 1)

    OH, OW = H - KH + 1, W - KW + 1
    assert y_nhwc.shape == (N, OH, OW, OC)
    assert jnp.allclose(y_nhwc.transpose(0, 3, 1, 2), ref, atol=2e-2, rtol=2e-2)

    # NCHW path (PyTorch module layout) must match the NHWC path exactly.
    y_nchw = conv_block_forward(x, weight, bias, gamma, beta, channels_last=False)
    jax.block_until_ready(y_nchw)
    assert y_nchw.shape == (N, OC, OH, OW)
    assert jnp.allclose(y_nchw, y_nhwc.transpose(0, 3, 1, 2), atol=1e-6, rtol=1e-6)
    assert jnp.allclose(y_nchw, ref, atol=2e-2, rtol=2e-2)

    print("KERNEL_OK")
</pallas_src>

<mosaic_0001>
module attributes {stable_mosaic.version = 11 : i64} {
  func.func @_conv_relu_stats_kernel(%arg0: i32, %arg1: i32, %arg2: memref<1x272x4xbf16, #tpu.memory_space<vmem>>, %arg3: memref<25x4x128xbf16, #tpu.memory_space<vmem>>, %arg4: memref<1x128xf32, #tpu.memory_space<vmem>>, %arg5: memref<192x1xf32, #tpu.memory_space<vmem>>, %arg6: memref<1x192x128xbf16, #tpu.memory_space<vmem>>, %arg7: memref<8x128xf32, #tpu.memory_space<vmem>>, %arg8: memref<8x128xf32, #tpu.memory_space<vmem>>, %arg9: memref<192x128xf32, #tpu.memory_space<vmem>>) attributes {dimension_semantics = [#tpu.dimension_semantics<parallel>, #tpu.dimension_semantics<parallel>], iteration_bounds = array<i64: 2, 1>, scalar_prefetch = 0 : i64, scratch_operands = 1 : i64, tpu.core_type = #tpu.core_type<tc>, window_params = [{transform_indices = @transform_0, window_bounds = array<i64: 1, 272, 4>}, {pipeline_mode = #tpu.pipeline_mode<synchronous>, transform_indices = @transform_1, window_bounds = array<i64: 25, 4, 128>}, {pipeline_mode = #tpu.pipeline_mode<synchronous>, transform_indices = @transform_2, window_bounds = array<i64: 1, 128>}, {transform_indices = @transform_3, window_bounds = array<i64: 192, 1>}, {transform_indices = @transform_4, window_bounds = array<i64: 1, 192, 128>}, {transform_indices = @transform_5, window_bounds = array<i64: 8, 128>}, {transform_indices = @transform_6, window_bounds = array<i64: 8, 128>}]} {
    %c0 = arith.constant 0 : index
    %c0_0 = arith.constant 0 : index
    %c0_1 = arith.constant 0 : index
    %0 = vector.load %arg2[%c0, %c0_0, %c0_1] : memref<1x272x4xbf16, #tpu.memory_space<vmem>>, vector<1x192x4xbf16>
    %1 = vector.shape_cast %0 : vector<1x192x4xbf16> to vector<192x4xbf16>
    %c0_2 = arith.constant 0 : index
    %c0_3 = arith.constant 0 : index
    %c0_4 = arith.constant 0 : index
    %2 = vector.load %arg3[%c0_2, %c0_3, %c0_4] : memref<25x4x128xbf16, #tpu.memory_space<vmem>>, vector<1x4x128xbf16>
    %3 = vector.shape_cast %2 : vector<1x4x128xbf16> to vector<4x128xbf16>
    %cst = arith.constant dense<0.000000e+00> : vector<192x128xf32>
    %4 = tpu.matmul %1, %3, %cst {dimension_numbers = #tpu.dot_dimension_numbers<[1], [0], [0], [1], [0, 0, 1, 1], [], []>} : vector<192x4xbf16>, vector<4x128xbf16>, vector<192x128xf32> -> vector<192x128xf32>
    %c0_5 = arith.constant 0 : index
    %c0_6 = arith.constant 0 : index
    %5 = vector.load %arg9[%c0_5, %c0_6] : memref<192x128xf32, #tpu.memory_space<vmem>>, vector<192x128xf32>
    tpu.vector_store %arg9[%c0_5, %c0_6], %4 {strides = array<i32>} : memref<192x128xf32, #tpu.memory_space<vmem>>, vector<192x128xf32>,
    %c0_7 = arith.constant 0 : index
    %c1 = arith.constant 1 : index
    %c0_8 = arith.constant 0 : index
    %6 = vector.load %arg2[%c0_7, %c1, %c0_8] : memref<1x272x4xbf16, #tpu.memory_space<vmem>>, vector<1x192x4xbf16>
    %7 = vector.shape_cast %6 : vector<1x192x4xbf16> to vector<192x4xbf16>
    %c0_9 = arith.constant 0 : index
    %c0_10 = arith.constant 0 : index
    %8 = vector.load %arg9[%c0_9, %c0_10] : memref<192x128xf32, #tpu.memory_space<vmem>>, vector<192x128xf32>
    %c1_11 = arith.constant 1 : index
    %c0_12 = arith.constant 0 : index
    %c0_13 = arith.constant 0 : index
    %9 = vector.load %arg3[%c1_11, %c0_12, %c0_13] : memref<25x4x128xbf16, #tpu.memory_space<vmem>>, vector<1x4x128xbf16>
    %10 = vector.shape_cast %9 : vector<1x4x128xbf16> to vector<4x128xbf16>
    %cst_14 = arith.constant dense<0.000000e+00> : vector<192x128xf32>
    %11 = tpu.matmul %7, %10, %cst_14 {dimension_numbers = #tpu.dot_dimension_numbers<[1], [0], [0], [1], [0, 0, 1, 1], [], []>} : vector<192x4xbf16>, vector<4x128xbf16>, vector<192x128xf32> -> vector<192x128xf32>
    %12 = arith.addf %8, %11 : vector<192x128xf32>
    %c0_15 = arith.constant 0 : index
    %c0_16 = arith.constant 0 : index
    %13 = vector.load %arg9[%c0_15, %c0_16] : memref<192x128xf32, #tpu.memory_space<vmem>>, vector<192x128xf32>
    tpu.vector_store %arg9[%c0_15, %c0_16], %12 {strides = array<i32>} : memref<192x128xf32, #tpu.memory_space<vmem>>, vector<192x128xf32>,
    %c0_17 = arith.constant 0 : index
    %c2 = arith.constant 2 : index
    %c0_18 = arith.constant 0 : index
    %14 = vector.load %arg2[%c0_17, %c2, %c0_18] : memref<1x272x4xbf16, #tpu.memory_space<vmem>>, vector<1x192x4xbf16>
    %15 = vector.shape_cast %14 : vector<1x192x4xbf16> to vector<192x4xbf16>
    %c0_19 = arith.constant 0 : index
    %c0_20 = arith.constant 0 : index
    %16 = vector.load %arg9[%c0_19, %c0_20] : memref<192x128xf32, #tpu.memory_space<vmem>>, vector<192x128xf32>
    %c2_21 = arith.constant 2 : index
    %c0_22 = arith.constant 0 : index
    %c0_23 = arith.constant 0 : index
    %17 = vector.load %arg3[%c2_21, %c0_22, %c0_23] : memref<25x4x128xbf16, #tpu.memory_space<vmem>>, vector<1x4x128xbf16>
    %18 = vector.shape_cast %17 : vector<1x4x128xbf16> to vector<4x128xbf16>
    %cst_24 = arith.constant dense<0.000000e+00> : vector<192x128xf32>
    %19 = tpu.matmul %15, %18, %cst_24 {dimension_numbers = #tpu.dot_dimension_numbers<[1], [0], [0], [1], [0, 0, 1, 1], [], []>} : vector<192x4xbf16>, vector<4x128xbf16>, vector<192x128xf32> -> vector<192x128xf32>
    %20 = arith.addf %16, %19 : vector<192x128xf32>
    %c0_25 = arith.constant 0 : index
    %c0_26 = arith.constant 0 : index
    %21 = vector.load %arg9[%c0_25, %c0_26] : memref<192x128xf32, #tpu.memory_space<vmem>>, vector<192x128xf32>
    tpu.vector_store %arg9[%c0_25, %c0_26], %20 {strides = array<i32>} : memref<192x128xf32, #tpu.memory_space<vmem>>, vector<192x128xf32>,
    %c0_27 = arith.constant 0 : index
    %c3 = arith.constant 3 : index
    %c0_28 = arith.constant 0 : index
    %22 = vector.load %arg2[%c0_27, %c3, %c0_28] : memref<1x272x4xbf16, #tpu.memory_space<vmem>>, vector<1x192x4xbf16>
    %23 = vector.shape_cast %22 : vector<1x192x4xbf16> to vector<192x4xbf16>
    %c0_29 = arith.constant 0 : index
    %c0_30 = arith.constant 0 : index
    %24 = vector.load %arg9[%c0_29, %c0_30] : memref<192x128xf32, #tpu.memory_space<vmem>>, vector<192x128xf32>
    %c3_31 = arith.constant 3 : index
    %c0_32 = arith.constant 0 : index
    %c0_33 = arith.constant 0 : index
    %25 = vector.load %arg3[%c3_31, %c0_32, %c0_33] : memref<25x4x128xbf16, #tpu.memory_space<vmem>>, vector<1x4x128xbf16>
    %26 = vector.shape_cast %25 : vector<1x4x128xbf16> to vector<4x128xbf16>
    %cst_34 = arith.constant dense<0.000000e+00> : vector<192x128xf32>
    %27 = tpu.matmul %23, %26, %cst_34 {dimension_numbers = #tpu.dot_dimension_numbers<[1], [0], [0], [1], [0, 0, 1, 1], [], []>} : vector<192x4xbf16>, vector<4x128xbf16>, vector<192x128xf32> -> vector<192x128xf32>
    %28 = arith.addf %24, %27 : vector<192x128xf32>
    %c0_35 = arith.constant 0 : index
    %c0_36 = arith.constant 0 : index
    %29 = vector.load %arg9[%c0_35, %c0_36] : memref<192x128xf32, #tpu.memory_space<vmem>>, vector<192x128xf32>
    tpu.vector_store %arg9[%c0_35, %c0_36], %28 {strides = array<i32>} : memref<192x128xf32, #tpu.memory_space<vmem>>, vector<192x128xf32>,
    %c0_37 = arith.constant 0 : index
    %c4 = arith.constant 4 : index
    %c0_38 = arith.constant 0 : index
    %30 = vector.load %arg2[%c0_37, %c4, %c0_38] : memref<1x272x4xbf16, #tpu.memory_space<vmem>>, vector<1x192x4xbf16>
    %31 = vector.shape_cast %30 : vector<1x192x4xbf16> to vector<192x4xbf16>
    %c0_39 = arith.constant 0 : index
    %c0_40 = arith.constant 0 : index
    %32 = vector.load %arg9[%c0_39, %c0_40] : memref<192x128xf32, #tpu.memory_space<vmem>>, vector<192x128xf32>
    %c4_41 = arith.constant 4 : index
    %c0_42 = arith.constant 0 : index
    %c0_43 = arith.constant 0 : index
    %33 = vector.load %arg3[%c4_41, %c0_42, %c0_43] : memref<25x4x128xbf16, #tpu.memory_space<vmem>>, vector<1x4x128xbf16>
    %34 = vector.shape_cast %33 : vector<1x4x128xbf16> to vector<4x128xbf16>
    %cst_44 = arith.constant dense<0.000000e+00> : vector<192x128xf32>
    %35 = tpu.matmul %31, %34, %cst_44 {dimension_numbers = #tpu.dot_dimension_numbers<[1], [0], [0], [1], [0, 0, 1, 1], [], []>} : vector<192x4xbf16>, vector<4x128xbf16>, vector<192x128xf32> -> vector<192x128xf32>
    %36 = arith.addf %32, %35 : vector<192x128xf32>
    %c0_45 = arith.constant 0 : index
    %c0_46 = arith.constant 0 : index
    %37 = vector.load %arg9[%c0_45, %c0_46] : memref<192x128xf32, #tpu.memory_space<vmem>>, vector<192x128xf32>
    tpu.vector_store %arg9[%c0_45, %c0_46], %36 {strides = array<i32>} : memref<192x128xf32, #tpu.memory_space<vmem>>, vector<192x128xf32>,
    %c0_47 = arith.constant 0 : index
    %c16 = arith.constant 16 : index
    %c0_48 = arith.constant 0 : index
    %38 = vector.load %arg2[%c0_47, %c16, %c0_48] : memref<1x272x4xbf16, #tpu.memory_space<vmem>>, vector<1x192x4xbf16>
    %39 = vector.shape_cast %38 : vector<1x192x4xbf16> to vector<192x4xbf16>
    %c0_49 = arith.constant 0 : index
    %c0_50 = arith.constant 0 : index
    %40 = vector.load %arg9[%c0_49, %c0_50] : memref<192x128xf32, #tpu.memory_space<vmem>>, vector<192x128xf32>
    %c5 = arith.constant 5 : index
    %c0_51 = arith.constant 0 : index
    %c0_52 = arith.constant 0 : index
    %41 = vector.load %arg3[%c5, %c0_51, %c0_52] : memref<25x4x128xbf16, #tpu.memory_space<vmem>>, vector<1x4x128xbf16>
    %42 = vector.shape_cast %41 : vector<1x4x128xbf16> to vector<4x128xbf16>
    %cst_53 = arith.constant dense<0.000000e+00> : vector<192x128xf32>
    %43 = tpu.matmul %39, %42, %cst_53 {dimension_numbers = #tpu.dot_dimension_numbers<[1], [0], [0], [1], [0, 0, 1, 1], [], []>} : vector<192x4xbf16>, vector<4x128xbf16>, vector<192x128xf32> -> vector<192x128xf32>
    %44 = arith.addf %40, %43 : vector<192x128xf32>
    %c0_54 = arith.constant 0 : index
    %c0_55 = arith.constant 0 : index
    %45 = vector.load %arg9[%c0_54, %c0_55] : memref<192x128xf32, #tpu.memory_space<vmem>>, vector<192x128xf32>
    tpu.vector_store %arg9[%c0_54, %c0_55], %44 {strides = array<i32>} : memref<192x128xf32, #tpu.memory_space<vmem>>, vector<192x128xf32>,
    %c0_56 = arith.constant 0 : index
    %c17 = arith.constant 17 : index
    %c0_57 = arith.constant 0 : index
    %46 = vector.load %arg2[%c0_56, %c17, %c0_57] : memref<1x272x4xbf16, #tpu.memory_space<vmem>>, vector<1x192x4xbf16>
    %47 = vector.shape_cast %46 : vector<1x192x4xbf16> to vector<192x4xbf16>
    %c0_58 = arith.constant 0 : index
    %c0_59 = arith.constant 0 : index
    %48 = vector.load %arg9[%c0_58, %c0_59] : memref<192x128xf32, #tpu.memory_space<vmem>>, vector<192x128xf32>
    %c6 = arith.constant 6 : index
    %c0_60 = arith.constant 0 : index
    %c0_61 = arith.constant 0 : index
    %49 = vector.load %arg3[%c6, %c0_60, %c0_61] : memref<25x4x128xbf16, #tpu.memory_space<vmem>>, vector<1x4x128xbf16>
    %50 = vector.shape_cast %49 : vector<1x4x128xbf16> to vector<4x128xbf16>
    %cst_62 = arith.constant dense<0.000000e+00> : vector<192x128xf32>
    %51 = tpu.matmul %47, %50, %cst_62 {dimension_numbers = #tpu.dot_dimension_numbers<[1], [0], [0], [1], [0, 0, 1, 1], [], []>} : vector<192x4xbf16>, vector<4x128xbf16>, vector<192x128xf32> -> vector<192x128xf32>
    %52 = arith.addf %48, %51 : vector<192x128xf32>
    %c0_63 = arith.constant 0 : index
    %c0_64 = arith.constant 0 : index
    %53 = vector.load %arg9[%c0_63, %c0_64] : memref<192x128xf32, #tpu.memory_space<vmem>>, vector<192x128xf32>
    tpu.vector_store %arg9[%c0_63, %c0_64], %52 {strides = array<i32>} : memref<192x128xf32, #tpu.memory_space<vmem>>, vector<192x128xf32>,
    %c0_65 = arith.constant 0 : index
    %c18 = arith.constant 18 : index
    %c0_66 = arith.constant 0 : index
    %54 = vector.load %arg2[%c0_65, %c18, %c0_66] : memref<1x272x4xbf16, #tpu.memory_space<vmem>>, vector<1x192x4xbf16>
    %55 = vector.shape_cast %54 : vector<1x192x4xbf16> to vector<192x4xbf16>
    %c0_67 = arith.constant 0 : index
    %c0_68 = arith.constant 0 : index
    %56 = vector.load %arg9[%c0_67, %c0_68] : memref<192x128xf32, #tpu.memory_space<vmem>>, vector<192x128xf32>
    %c7 = arith.constant 7 : index
    %c0_69 = arith.constant 0 : index
    %c0_70 = arith.constant 0 : index
    %57 = vector.load %arg3[%c7, %c0_69, %c0_70] : memref<25x4x128xbf16, #tpu.memory_space<vmem>>, vector<1x4x128xbf16>
    %58 = vector.shape_cast %57 : vector<1x4x128xbf16> to vector<4x128xbf16>
    %cst_71 = arith.constant dense<0.000000e+00> : vector<192x128xf32>
    %59 = tpu.matmul %55, %58, %cst_71 {dimension_numbers = #tpu.dot_dimension_numbers<[1], [0], [0], [1], [0, 0, 1, 1], [], []>} : vector<192x4xbf16>, vector<4x128xbf16>, vector<192x128xf32> -> vector<192x128xf32>
    %60 = arith.addf %56, %59 : vector<192x128xf32>
    %c0_72 = arith.constant 0 : index
    %c0_73 = arith.constant 0 : index
    %61 = vector.load %arg9[%c0_72, %c0_73] : memref<192x128xf32, #tpu.memory_space<vmem>>, vector<192x128xf32>
    tpu.vector_store %arg9[%c0_72, %c0_73], %60 {strides = array<i32>} : memref<192x128xf32, #tpu.memory_space<vmem>>, vector<192x128xf32>,
    %c0_74 = arith.constant 0 : index
    %c19 = arith.constant 19 : index
    %c0_75 = arith.constant 0 : index
    %62 = vector.load %arg2[%c0_74, %c19, %c0_75] : memref<1x272x4xbf16, #tpu.memory_space<vmem>>, vector<1x192x4xbf16>
    %63 = vector.shape_cast %62 : vector<1x192x4xbf16> to vector<192x4xbf16>
    %c0_76 = arith.constant 0 : index
    %c0_77 = arith.constant 0 : index
    %64 = vector.load %arg9[%c0_76, %c0_77] : memref<192x128xf32, #tpu.memory_space<vmem>>, vector<192x128xf32>
    %c8 = arith.constant 8 : index
    %c0_78 = arith.constant 0 : index
    %c0_79 = arith.constant 0 : index
    %65 = vector.load %arg3[%c8, %c0_78, %c0_79] : memref<25x4x128xbf16, #tpu.memory_space<vmem>>, vector<1x4x128xbf16>
    %66 = vector.shape_cast %65 : vector<1x4x128xbf16> to vector<4x128xbf16>
    %cst_80 = arith.constant dense<0.000000e+00> : vector<192x128xf32>
    %67 = tpu.matmul %63, %66, %cst_80 {dimension_numbers = #tpu.dot_dimension_numbers<[1], [0], [0], [1], [0, 0, 1, 1], [], []>} : vector<192x4xbf16>, vector<4x128xbf16>, vector<192x128xf32> -> vector<192x128xf32>
    %68 = arith.addf %64, %67 : vector<192x128xf32>
    %c0_81 = arith.constant 0 : index
    %c0_82 = arith.constant 0 : index
    %69 = vector.load %arg9[%c0_81, %c0_82] : memref<192x128xf32, #tpu.memory_space<vmem>>, vector<192x128xf32>
    tpu.vector_store %arg9[%c0_81, %c0_82], %68 {strides = array<i32>} : memref<192x128xf32, #tpu.memory_space<vmem>>, vector<192x128xf32>,
    %c0_83 = arith.constant 0 : index
    %c20 = arith.constant 20 : index
    %c0_84 = arith.constant 0 : index
    %70 = vector.load %arg2[%c0_83, %c20, %c0_84] : memref<1x272x4xbf16, #tpu.memory_space<vmem>>, vector<1x192x4xbf16>
    %71 = vector.shape_cast %70 : vector<1x192x4xbf16> to vector<192x4xbf16>
    %c0_85 = arith.constant 0 : index
    %c0_86 = arith.constant 0 : index
    %72 = vector.load %arg9[%c0_85, %c0_86] : memref<192x128xf32, #tpu.memory_space<vmem>>, vector<192x128xf32>
    %c9 = arith.constant 9 : index
    %c0_87 = arith.constant 0 : index
    %c0_88 = arith.constant 0 : index
    %73 = vector.load %arg3[%c9, %c0_87, %c0_88] : memref<25x4x128xbf16, #tpu.memory_space<vmem>>, vector<1x4x128xbf16>
    %74 = vector.shape_cast %73 : vector<1x4x128xbf16> to vector<4x128xbf16>
    %cst_89 = arith.constant dense<0.000000e+00> : vector<192x128xf32>
    %75 = tpu.matmul %71, %74, %cst_89 {dimension_numbers = #tpu.dot_dimension_numbers<[1], [0], [0], [1], [0, 0, 1, 1], [], []>} : vector<192x4xbf16>, vector<4x128xbf16>, vector<192x128xf32> -> vector<192x128xf32>
    %76 = arith.addf %72, %75 : vector<192x128xf32>
    %c0_90 = arith.constant 0 : index
    %c0_91 = arith.constant 0 : index
    %77 = vector.load %arg9[%c0_90, %c0_91] : memref<192x128xf32, #tpu.memory_space<vmem>>, vector<192x128xf32>
    tpu.vector_store %arg9[%c0_90, %c0_91], %76 {strides = array<i32>} : memref<192x128xf32, #tpu.memory_space<vmem>>, vector<192x128xf32>,
    %c0_92 = arith.constant 0 : index
    %c32 = arith.constant 32 : index
    %c0_93 = arith.constant 0 : index
    %78 = vector.load %arg2[%c0_92, %c32, %c0_93] : memref<1x272x4xbf16, #tpu.memory_space<vmem>>, vector<1x192x4xbf16>
    %79 = vector.shape_cast %78 : vector<1x192x4xbf16> to vector<192x4xbf16>
    %c0_94 = arith.constant 0 : index
    %c0_95 = arith.constant 0 : index
    %80 = vector.load %arg9[%c0_94, %c0_95] : memref<192x128xf32, #tpu.memory_space<vmem>>, vector<192x128xf32>
    %c10 = arith.constant 10 : index
    %c0_96 = arith.constant 0 : index
    %c0_97 = arith.constant 0 : index
    %81 = vector.load %arg3[%c10, %c0_96, %c0_97] : memref<25x4x128xbf16, #tpu.memory_space<vmem>>, vector<1x4x128xbf16>
    %82 = vector.shape_cast %81 : vector<1x4x128xbf16> to vector<4x128xbf16>
    %cst_98 = arith.constant dense<0.000000e+00> : vector<192x128xf32>
    %83 = tpu.matmul %79, %82, %cst_98 {dimension_numbers = #tpu.dot_dimension_numbers<[1], [0], [0], [1], [0, 0, 1, 1], [], []>} : vector<192x4xbf16>, vector<4x128xbf16>, vector<192x128xf32> -> vector<192x128xf32>
    %84 = arith.addf %80, %83 : vector<192x128xf32>
    %c0_99 = arith.constant 0 : index
    %c0_100 = arith.constant 0 : index
    %85 = vector.load %arg9[%c0_99, %c0_100] : memref<192x128xf32, #tpu.memory_space<vmem>>, vector<192x128xf32>
    tpu.vector_store %arg9[%c0_99, %c0_100], %84 {strides = array<i32>} : memref<192x128xf32, #tpu.memory_space<vmem>>, vector<192x128xf32>,
    %c0_101 = arith.constant 0 : index
    %c33 = arith.constant 33 : index
    %c0_102 = arith.constant 0 : index
    %86 = vector.load %arg2[%c0_101, %c33, %c0_102] : memref<1x272x4xbf16, #tpu.memory_space<vmem>>, vector<1x192x4xbf16>
    %87 = vector.shape_cast %86 : vector<1x192x4xbf16> to vector<192x4xbf16>
    %c0_103 = arith.constant 0 : index
    %c0_104 = arith.constant 0 : index
    %88 = vector.load %arg9[%c0_103, %c0_104] : memref<192x128xf32, #tpu.memory_space<vmem>>, vector<192x128xf32>
    %c11 = arith.constant 11 : index
    %c0_105 = arith.constant 0 : index
    %c0_106 = arith.constant 0 : index
    %89 = vector.load %arg3[%c11, %c0_105, %c0_106] : memref<25x4x128xbf16, #tpu.memory_space<vmem>>, vector<1x4x128xbf16>
    %90 = vector.shape_cast %89 : vector<1x4x128xbf16> to vector<4x128xbf16>
    %cst_107 = arith.constant dense<0.000000e+00> : vector<192x128xf32>
    %91 = tpu.matmul %87, %90, %cst_107 {dimension_numbers = #tpu.dot_dimension_numbers<[1], [0], [0], [1], [0, 0, 1, 1], [], []>} : vector<192x4xbf16>, vector<4x128xbf16>, vector<192x128xf32> -> vector<192x128xf32>
    %92 = arith.addf %88, %91 : vector<192x128xf32>
    %c0_108 = arith.constant 0 : index
    %c0_109 = arith.constant 0 : index
    %93 = vector.load %arg9[%c0_108, %c0_109] : memref<192x128xf32, #tpu.memory_space<vmem>>, vector<192x128xf32>
    tpu.vector_store %arg9[%c0_108, %c0_109], %92 {strides = array<i32>} : memref<192x128xf32, #tpu.memory_space<vmem>>, vector<192x128xf32>,
    %c0_110 = arith.constant 0 : index
    %c34 = arith.constant 34 : index
    %c0_111 = arith.constant 0 : index
    %94 = vector.load %arg2[%c0_110, %c34, %c0_111] : memref<1x272x4xbf16, #tpu.memory_space<vmem>>, vector<1x192x4xbf16>
    %95 = vector.shape_cast %94 : vector<1x192x4xbf16> to vector<192x4xbf16>
    %c0_112 = arith.constant 0 : index
    %c0_113 = arith.constant 0 : index
    %96 = vector.load %arg9[%c0_112, %c0_113] : memref<192x128xf32, #tpu.memory_space<vmem>>, vector<192x128xf32>
    %c12 = arith.constant 12 : index
    %c0_114 = arith.constant 0 : index
    %c0_115 = arith.constant 0 : index
    %97 = vector.load %arg3[%c12, %c0_114, %c0_115] : memref<25x4x128xbf16, #tpu.memory_space<vmem>>, vector<1x4x128xbf16>
    %98 = vector.shape_cast %97 : vector<1x4x128xbf16> to vector<4x128xbf16>
    %cst_116 = arith.constant dense<0.000000e+00> : vector<192x128xf32>
    %99 = tpu.matmul %95, %98, %cst_116 {dimension_numbers = #tpu.dot_dimension_numbers<[1], [0], [0], [1], [0, 0, 1, 1], [], []>} : vector<192x4xbf16>, vector<4x128xbf16>, vector<192x128xf32> -> vector<192x128xf32>
    %100 = arith.addf %96, %99 : vector<192x128xf32>
    %c0_117 = arith.constant 0 : index
    %c0_118 = arith.constant 0 : index
    %101 = vector.load %arg9[%c0_117, %c0_118] : memref<192x128xf32, #tpu.memory_space<vmem>>, vector<192x128xf32>
    tpu.vector_store %arg9[%c0_117, %c0_118], %100 {strides = array<i32>} : memref<192x128xf32, #tpu.memory_space<vmem>>, vector<192x128xf32>,
    %c0_119 = arith.constant 0 : index
    %c35 = arith.constant 35 : index
    %c0_120 = arith.constant 0 : index
    %102 = vector.load %arg2[%c0_119, %c35, %c0_120] : memref<1x272x4xbf16, #tpu.memory_space<vmem>>, vector<1x192x4xbf16>
    %103 = vector.shape_cast %102 : vector<1x192x4xbf16> to vector<192x4xbf16>
    %c0_121 = arith.constant 0 : index
    %c0_122 = arith.constant 0 : index
    %104 = vector.load %arg9[%c0_121, %c0_122] : memref<192x128xf32, #tpu.memory_space<vmem>>, vector<192x128xf32>
    %c13 = arith.constant 13 : index
    %c0_123 = arith.constant 0 : index
    %c0_124 = arith.constant 0 : index
    %105 = vector.load %arg3[%c13, %c0_123, %c0_124] : memref<25x4x128xbf16, #tpu.memory_space<vmem>>, vector<1x4x128xbf16>
    %106 = vector.shape_cast %105 : vector<1x4x128xbf16> to vector<4x128xbf16>
    %cst_125 = arith.constant dense<0.000000e+00> : vector<192x128xf32>
    %107 = tpu.matmul %103, %106, %cst_125 {dimension_numbers = #tpu.dot_dimension_numbers<[1], [0], [0], [1], [0, 0, 1, 1], [], []>} : vector<192x4xbf16>, vector<4x128xbf16>, vector<192x128xf32> -> vector<192x128xf32>
    %108 = arith.addf %104, %107 : vector<192x128xf32>
    %c0_126 = arith.constant 0 : index
    %c0_127 = arith.constant 0 : index
    %109 = vector.load %arg9[%c0_126, %c0_127] : memref<192x128xf32, #tpu.memory_space<vmem>>, vector<192x128xf32>
    tpu.vector_store %arg9[%c0_126, %c0_127], %108 {strides = array<i32>} : memref<192x128xf32, #tpu.memory_space<vmem>>, vector<192x128xf32>,
    %c0_128 = arith.constant 0 : index
    %c36 = arith.constant 36 : index
    %c0_129 = arith.constant 0 : index
    %110 = vector.load %arg2[%c0_128, %c36, %c0_129] : memref<1x272x4xbf16, #tpu.memory_space<vmem>>, vector<1x192x4xbf16>
    %111 = vector.shape_cast %110 : vector<1x192x4xbf16> to vector<192x4xbf16>
    %c0_130 = arith.constant 0 : index
    %c0_131 = arith.constant 0 : index
    %112 = vector.load %arg9[%c0_130, %c0_131] : memref<192x128xf32, #tpu.memory_space<vmem>>, vector<192x128xf32>
    %c14 = arith.constant 14 : index
    %c0_132 = arith.constant 0 : index
    %c0_133 = arith.constant 0 : index
    %113 = vector.load %arg3[%c14, %c0_132, %c0_133] : memref<25x4x128xbf16, #tpu.memory_space<vmem>>, vector<1x4x128xbf16>
    %114 = vector.shape_cast %113 : vector<1x4x128xbf16> to vector<4x128xbf16>
    %cst_134 = arith.constant dense<0.000000e+00> : vector<192x128xf32>
    %115 = tpu.matmul %111, %114, %cst_134 {dimension_numbers = #tpu.dot_dimension_numbers<[1], [0], [0], [1], [0, 0, 1, 1], [], []>} : vector<192x4xbf16>, vector<4x128xbf16>, vector<192x128xf32> -> vector<192x128xf32>
    %116 = arith.addf %112, %115 : vector<192x128xf32>
    %c0_135 = arith.constant 0 : index
    %c0_136 = arith.constant 0 : index
    %117 = vector.load %arg9[%c0_135, %c0_136] : memref<192x128xf32, #tpu.memory_space<vmem>>, vector<192x128xf32>
    tpu.vector_store %arg9[%c0_135, %c0_136], %116 {strides = array<i32>} : memref<192x128xf32, #tpu.memory_space<vmem>>, vector<192x128xf32>,
    %c0_137 = arith.constant 0 : index
    %c48 = arith.constant 48 : index
    %c0_138 = arith.constant 0 : index
    %118 = vector.load %arg2[%c0_137, %c48, %c0_138] : memref<1x272x4xbf16, #tpu.memory_space<vmem>>, vector<1x192x4xbf16>
    %119 = vector.shape_cast %118 : vector<1x192x4xbf16> to vector<192x4xbf16>
    %c0_139 = arith.constant 0 : index
    %c0_140 = arith.constant 0 : index
    %120 = vector.load %arg9[%c0_139, %c0_140] : memref<192x128xf32, #tpu.memory_space<vmem>>, vector<192x128xf32>
    %c15 = arith.constant 15 : index
    %c0_141 = arith.constant 0 : index
    %c0_142 = arith.constant 0 : index
    %121 = vector.load %arg3[%c15, %c0_141, %c0_142] : memref<25x4x128xbf16, #tpu.memory_space<vmem>>, vector<1x4x128xbf16>
    %122 = vector.shape_cast %121 : vector<1x4x128xbf16> to vector<4x128xbf16>
    %cst_143 = arith.constant dense<0.000000e+00> : vector<192x128xf32>
    %123 = tpu.matmul %119, %122, %cst_143 {dimension_numbers = #tpu.dot_dimension_numbers<[1], [0], [0], [1], [0, 0, 1, 1], [], []>} : vector<192x4xbf16>, vector<4x128xbf16>, vector<192x128xf32> -> vector<192x128xf32>
    %124 = arith.addf %120, %123 : vector<192x128xf32>
    %c0_144 = arith.constant 0 : index
    %c0_145 = arith.constant 0 : index
    %125 = vector.load %arg9[%c0_144, %c0_145] : memref<192x128xf32, #tpu.memory_space<vmem>>, vector<192x128xf32>
    tpu.vector_store %arg9[%c0_144, %c0_145], %124 {strides = array<i32>} : memref<192x128xf32, #tpu.memory_space<vmem>>, vector<192x128xf32>,
    %c0_146 = arith.constant 0 : index
    %c49 = arith.constant 49 : index
    %c0_147 = arith.constant 0 : index
    %126 = vector.load %arg2[%c0_146, %c49, %c0_147] : memref<1x272x4xbf16, #tpu.memory_space<vmem>>, vector<1x192x4xbf16>
    %127 = vector.shape_cast %126 : vector<1x192x4xbf16> to vector<192x4xbf16>
    %c0_148 = arith.constant 0 : index
    %c0_149 = arith.constant 0 : index
    %128 = vector.load %arg9[%c0_148, %c0_149] : memref<192x128xf32, #tpu.memory_space<vmem>>, vector<192x128xf32>
    %c16_150 = arith.constant 16 : index
    %c0_151 = arith.constant 0 : index
    %c0_152 = arith.constant 0 : index
    %129 = vector.load %arg3[%c16_150, %c0_151, %c0_152] : memref<25x4x128xbf16, #tpu.memory_space<vmem>>, vector<1x4x128xbf16>
    %130 = vector.shape_cast %129 : vector<1x4x128xbf16> to vector<4x128xbf16>
    %cst_153 = arith.constant dense<0.000000e+00> : vector<192x128xf32>
    %131 = tpu.matmul %127, %130, %cst_153 {dimension_numbers = #tpu.dot_dimension_numbers<[1], [0], [0], [1], [0, 0, 1, 1], [], []>} : vector<192x4xbf16>, vector<4x128xbf16>, vector<192x128xf32> -> vector<192x128xf32>
    %132 = arith.addf %128, %131 : vector<192x128xf32>
    %c0_154 = arith.constant 0 : index
    %c0_155 = arith.constant 0 : index
    %133 = vector.load %arg9[%c0_154, %c0_155] : memref<192x128xf32, #tpu.memory_space<vmem>>, vector<192x128xf32>
    tpu.vector_store %arg9[%c0_154, %c0_155], %132 {strides = array<i32>} : memref<192x128xf32, #tpu.memory_space<vmem>>, vector<192x128xf32>,
    %c0_156 = arith.constant 0 : index
    %c50 = arith.constant 50 : index
    %c0_157 = arith.constant 0 : index
    %134 = vector.load %arg2[%c0_156, %c50, %c0_157] : memref<1x272x4xbf16, #tpu.memory_space<vmem>>, vector<1x192x4xbf16>
    %135 = vector.shape_cast %134 : vector<1x192x4xbf16> to vector<192x4xbf16>
    %c0_158 = arith.constant 0 : index
    %c0_159 = arith.constant 0 : index
    %136 = vector.load %arg9[%c0_158, %c0_159] : memref<192x128xf32, #tpu.memory_space<vmem>>, vector<192x128xf32>
    %c17_160 = arith.constant 17 : index
    %c0_161 = arith.constant 0 : index
    %c0_162 = arith.constant 0 : index
    %137 = vector.load %arg3[%c17_160, %c0_161, %c0_162] : memref<25x4x128xbf16, #tpu.memory_space<vmem>>, vector<1x4x128xbf16>
    %138 = vector.shape_cast %137 : vector<1x4x128xbf16> to vector<4x128xbf16>
    %cst_163 = arith.constant dense<0.000000e+00> : vector<192x128xf32>
    %139 = tpu.matmul %135, %138, %cst_163 {dimension_numbers = #tpu.dot_dimension_numbers<[1], [0], [0], [1], [0, 0, 1, 1], [], []>} : vector<192x4xbf16>, vector<4x128xbf16>, vector<192x128xf32> -> vector<192x128xf32>
    %140 = arith.addf %136, %139 : vector<192x128xf32>
    %c0_164 = arith.constant 0 : index
    %c0_165 = arith.constant 0 : index
    %141 = vector.load %arg9[%c0_164, %c0_165] : memref<192x128xf32, #tpu.memory_space<vmem>>, vector<192x128xf32>
    tpu.vector_store %arg9[%c0_164, %c0_165], %140 {strides = array<i32>} : memref<192x128xf32, #tpu.memory_space<vmem>>, vector<192x128xf32>,
    %c0_166 = arith.constant 0 : index
    %c51 = arith.constant 51 : index
    %c0_167 = arith.constant 0 : index
    %142 = vector.load %arg2[%c0_166, %c51, %c0_167] : memref<1x272x4xbf16, #tpu.memory_space<vmem>>, vector<1x192x4xbf16>
    %143 = vector.shape_cast %142 : vector<1x192x4xbf16> to vector<192x4xbf16>
    %c0_168 = arith.constant 0 : index
    %c0_169 = arith.constant 0 : index
    %144 = vector.load %arg9[%c0_168, %c0_169] : memref<192x128xf32, #tpu.memory_space<vmem>>, vector<192x128xf32>
    %c18_170 = arith.constant 18 : index
    %c0_171 = arith.constant 0 : index
    %c0_172 = arith.constant 0 : index
    %145 = vector.load %arg3[%c18_170, %c0_171, %c0_172] : memref<25x4x128xbf16, #tpu.memory_space<vmem>>, vector<1x4x128xbf16>
    %146 = vector.shape_cast %145 : vector<1x4x128xbf16> to vector<4x128xbf16>
    %cst_173 = arith.constant dense<0.000000e+00> : vector<192x128xf32>
    %147 = tpu.matmul %143, %146, %cst_173 {dimension_numbers = #tpu.dot_dimension_numbers<[1], [0], [0], [1], [0, 0, 1, 1], [], []>} : vector<192x4xbf16>, vector<4x128xbf16>, vector<192x128xf32> -> vector<192x128xf32>
    %148 = arith.addf %144, %147 : vector<192x128xf32>
    %c0_174 = arith.constant 0 : index
    %c0_175 = arith.constant 0 : index
    %149 = vector.load %arg9[%c0_174, %c0_175] : memref<192x128xf32, #tpu.memory_space<vmem>>, vector<192x128xf32>
    tpu.vector_store %arg9[%c0_174, %c0_175], %148 {strides = array<i32>} : memref<192x128xf32, #tpu.memory_space<vmem>>, vector<192x128xf32>,
    %c0_176 = arith.constant 0 : index
    %c52 = arith.constant 52 : index
    %c0_177 = arith.constant 0 : index
    %150 = vector.load %arg2[%c0_176, %c52, %c0_177] : memref<1x272x4xbf16, #tpu.memory_space<vmem>>, vector<1x192x4xbf16>
    %151 = vector.shape_cast %150 : vector<1x192x4xbf16> to vector<192x4xbf16>
    %c0_178 = arith.constant 0 : index
    %c0_179 = arith.constant 0 : index
    %152 = vector.load %arg9[%c0_178, %c0_179] : memref<192x128xf32, #tpu.memory_space<vmem>>, vector<192x128xf32>
    %c19_180 = arith.constant 19 : index
    %c0_181 = arith.constant 0 : index
    %c0_182 = arith.constant 0 : index
    %153 = vector.load %arg3[%c19_180, %c0_181, %c0_182] : memref<25x4x128xbf16, #tpu.memory_space<vmem>>, vector<1x4x128xbf16>
    %154 = vector.shape_cast %153 : vector<1x4x128xbf16> to vector<4x128xbf16>
    %cst_183 = arith.constant dense<0.000000e+00> : vector<192x128xf32>
    %155 = tpu.matmul %151, %154, %cst_183 {dimension_numbers = #tpu.dot_dimension_numbers<[1], [0], [0], [1], [0, 0, 1, 1], [], []>} : vector<192x4xbf16>, vector<4x128xbf16>, vector<192x128xf32> -> vector<192x128xf32>
    %156 = arith.addf %152, %155 : vector<192x128xf32>
    %c0_184 = arith.constant 0 : index
    %c0_185 = arith.constant 0 : index
    %157 = vector.load %arg9[%c0_184, %c0_185] : memref<192x128xf32, #tpu.memory_space<vmem>>, vector<192x128xf32>
    tpu.vector_store %arg9[%c0_184, %c0_185], %156 {strides = array<i32>} : memref<192x128xf32, #tpu.memory_space<vmem>>, vector<192x128xf32>,
    %c0_186 = arith.constant 0 : index
    %c64 = arith.constant 64 : index
    %c0_187 = arith.constant 0 : index
    %158 = vector.load %arg2[%c0_186, %c64, %c0_187] : memref<1x272x4xbf16, #tpu.memory_space<vmem>>, vector<1x192x4xbf16>
    %159 = vector.shape_cast %158 : vector<1x192x4xbf16> to vector<192x4xbf16>
    %c0_188 = arith.constant 0 : index
    %c0_189 = arith.constant 0 : index
    %160 = vector.load %arg9[%c0_188, %c0_189] : memref<192x128xf32, #tpu.memory_space<vmem>>, vector<192x128xf32>
    %c20_190 = arith.constant 20 : index
    %c0_191 = arith.constant 0 : index
    %c0_192 = arith.constant 0 : index
    %161 = vector.load %arg3[%c20_190, %c0_191, %c0_192] : memref<25x4x128xbf16, #tpu.memory_space<vmem>>, vector<1x4x128xbf16>
    %162 = vector.shape_cast %161 : vector<1x4x128xbf16> to vector<4x128xbf16>
    %cst_193 = arith.constant dense<0.000000e+00> : vector<192x128xf32>
    %163 = tpu.matmul %159, %162, %cst_193 {dimension_numbers = #tpu.dot_dimension_numbers<[1], [0], [0], [1], [0, 0, 1, 1], [], []>} : vector<192x4xbf16>, vector<4x128xbf16>, vector<192x128xf32> -> vector<192x128xf32>
    %164 = arith.addf %160, %163 : vector<192x128xf32>
    %c0_194 = arith.constant 0 : index
    %c0_195 = arith.constant 0 : index
    %165 = vector.load %arg9[%c0_194, %c0_195] : memref<192x128xf32, #tpu.memory_space<vmem>>, vector<192x128xf32>
    tpu.vector_store %arg9[%c0_194, %c0_195], %164 {strides = array<i32>} : memref<192x128xf32, #tpu.memory_space<vmem>>, vector<192x128xf32>,
    %c0_196 = arith.constant 0 : index
    %c65 = arith.constant 65 : index
    %c0_197 = arith.constant 0 : index
    %166 = vector.load %arg2[%c0_196, %c65, %c0_197] : memref<1x272x4xbf16, #tpu.memory_space<vmem>>, vector<1x192x4xbf16>
    %167 = vector.shape_cast %166 : vector<1x192x4xbf16> to vector<192x4xbf16>
    %c0_198 = arith.constant 0 : index
    %c0_199 = arith.constant 0 : index
    %168 = vector.load %arg9[%c0_198, %c0_199] : memref<192x128xf32, #tpu.memory_space<vmem>>, vector<192x128xf32>
    %c21 = arith.constant 21 : index
    %c0_200 = arith.constant 0 : index
    %c0_201 = arith.constant 0 : index
    %169 = vector.load %arg3[%c21, %c0_200, %c0_201] : memref<25x4x128xbf16, #tpu.memory_space<vmem>>, vector<1x4x128xbf16>
    %170 = vector.shape_cast %169 : vector<1x4x128xbf16> to vector<4x128xbf16>
    %cst_202 = arith.constant dense<0.000000e+00> : vector<192x128xf32>
    %171 = tpu.matmul %167, %170, %cst_202 {dimension_numbers = #tpu.dot_dimension_numbers<[1], [0], [0], [1], [0, 0, 1, 1], [], []>} : vector<192x4xbf16>, vector<4x128xbf16>, vector<192x128xf32> -> vector<192x128xf32>
    %172 = arith.addf %168, %171 : vector<192x128xf32>
    %c0_203 = arith.constant 0 : index
    %c0_204 = arith.constant 0 : index
    %173 = vector.load %arg9[%c0_203, %c0_204] : memref<192x128xf32, #tpu.memory_space<vmem>>, vector<192x128xf32>
    tpu.vector_store %arg9[%c0_203, %c0_204], %172 {strides = array<i32>} : memref<192x128xf32, #tpu.memory_space<vmem>>, vector<192x128xf32>,
    %c0_205 = arith.constant 0 : index
    %c66 = arith.constant 66 : index
    %c0_206 = arith.constant 0 : index
    %174 = vector.load %arg2[%c0_205, %c66, %c0_206] : memref<1x272x4xbf16, #tpu.memory_space<vmem>>, vector<1x192x4xbf16>
    %175 = vector.shape_cast %174 : vector<1x192x4xbf16> to vector<192x4xbf16>
    %c0_207 = arith.constant 0 : index
    %c0_208 = arith.constant 0 : index
    %176 = vector.load %arg9[%c0_207, %c0_208] : memref<192x128xf32, #tpu.memory_space<vmem>>, vector<192x128xf32>
    %c22 = arith.constant 22 : index
    %c0_209 = arith.constant 0 : index
    %c0_210 = arith.constant 0 : index
    %177 = vector.load %arg3[%c22, %c0_209, %c0_210] : memref<25x4x128xbf16, #tpu.memory_space<vmem>>, vector<1x4x128xbf16>
    %178 = vector.shape_cast %177 : vector<1x4x128xbf16> to vector<4x128xbf16>
    %cst_211 = arith.constant dense<0.000000e+00> : vector<192x128xf32>
    %179 = tpu.matmul %175, %178, %cst_211 {dimension_numbers = #tpu.dot_dimension_numbers<[1], [0], [0], [1], [0, 0, 1, 1], [], []>} : vector<192x4xbf16>, vector<4x128xbf16>, vector<192x128xf32> -> vector<192x128xf32>
    %180 = arith.addf %176, %179 : vector<192x128xf32>
    %c0_212 = arith.constant 0 : index
    %c0_213 = arith.constant 0 : index
    %181 = vector.load %arg9[%c0_212, %c0_213] : memref<192x128xf32, #tpu.memory_space<vmem>>, vector<192x128xf32>
    tpu.vector_store %arg9[%c0_212, %c0_213], %180 {strides = array<i32>} : memref<192x128xf32, #tpu.memory_space<vmem>>, vector<192x128xf32>,
    %c0_214 = arith.constant 0 : index
    %c67 = arith.constant 67 : index
    %c0_215 = arith.constant 0 : index
    %182 = vector.load %arg2[%c0_214, %c67, %c0_215] : memref<1x272x4xbf16, #tpu.memory_space<vmem>>, vector<1x192x4xbf16>
    %183 = vector.shape_cast %182 : vector<1x192x4xbf16> to vector<192x4xbf16>
    %c0_216 = arith.constant 0 : index
    %c0_217 = arith.constant 0 : index
    %184 = vector.load %arg9[%c0_216, %c0_217] : memref<192x128xf32, #tpu.memory_space<vmem>>, vector<192x128xf32>
    %c23 = arith.constant 23 : index
    %c0_218 = arith.constant 0 : index
    %c0_219 = arith.constant 0 : index
    %185 = vector.load %arg3[%c23, %c0_218, %c0_219] : memref<25x4x128xbf16, #tpu.memory_space<vmem>>, vector<1x4x128xbf16>
    %186 = vector.shape_cast %185 : vector<1x4x128xbf16> to vector<4x128xbf16>
    %cst_220 = arith.constant dense<0.000000e+00> : vector<192x128xf32>
    %187 = tpu.matmul %183, %186, %cst_220 {dimension_numbers = #tpu.dot_dimension_numbers<[1], [0], [0], [1], [0, 0, 1, 1], [], []>} : vector<192x4xbf16>, vector<4x128xbf16>, vector<192x128xf32> -> vector<192x128xf32>
    %188 = arith.addf %184, %187 : vector<192x128xf32>
    %c0_221 = arith.constant 0 : index
    %c0_222 = arith.constant 0 : index
    %189 = vector.load %arg9[%c0_221, %c0_222] : memref<192x128xf32, #tpu.memory_space<vmem>>, vector<192x128xf32>
    tpu.vector_store %arg9[%c0_221, %c0_222], %188 {strides = array<i32>} : memref<192x128xf32, #tpu.memory_space<vmem>>, vector<192x128xf32>,
    %c0_223 = arith.constant 0 : index
    %c68 = arith.constant 68 : index
    %c0_224 = arith.constant 0 : index
    %190 = vector.load %arg2[%c0_223, %c68, %c0_224] : memref<1x272x4xbf16, #tpu.memory_space<vmem>>, vector<1x192x4xbf16>
    %191 = vector.shape_cast %190 : vector<1x192x4xbf16> to vector<192x4xbf16>
    %c0_225 = arith.constant 0 : index
    %c0_226 = arith.constant 0 : index
    %192 = vector.load %arg9[%c0_225, %c0_226] : memref<192x128xf32, #tpu.memory_space<vmem>>, vector<192x128xf32>
    %c24 = arith.constant 24 : index
    %c0_227 = arith.constant 0 : index
    %c0_228 = arith.constant 0 : index
    %193 = vector.load %arg3[%c24, %c0_227, %c0_228] : memref<25x4x128xbf16, #tpu.memory_space<vmem>>, vector<1x4x128xbf16>
    %194 = vector.shape_cast %193 : vector<1x4x128xbf16> to vector<4x128xbf16>
    %cst_229 = arith.constant dense<0.000000e+00> : vector<192x128xf32>
    %195 = tpu.matmul %191, %194, %cst_229 {dimension_numbers = #tpu.dot_dimension_numbers<[1], [0], [0], [1], [0, 0, 1, 1], [], []>} : vector<192x4xbf16>, vector<4x128xbf16>, vector<192x128xf32> -> vector<192x128xf32>
    %196 = arith.addf %192, %195 : vector<192x128xf32>
    %c0_230 = arith.constant 0 : index
    %c0_231 = arith.constant 0 : index
    %197 = vector.load %arg9[%c0_230, %c0_231] : memref<192x128xf32, #tpu.memory_space<vmem>>, vector<192x128xf32>
    tpu.vector_store %arg9[%c0_230, %c0_231], %196 {strides = array<i32>} : memref<192x128xf32, #tpu.memory_space<vmem>>, vector<192x128xf32>,
    %c0_232 = arith.constant 0 : index
    %c0_233 = arith.constant 0 : index
    %198 = vector.load %arg9[%c0_232, %c0_233] : memref<192x128xf32, #tpu.memory_space<vmem>>, vector<192x128xf32>
    %c0_234 = arith.constant 0 : index
    %c0_235 = arith.constant 0 : index
    %199 = vector.load %arg4[%c0_234, %c0_235] : memref<1x128xf32, #tpu.memory_space<vmem>>, vector<1x128xf32>
    %200 = vector.broadcast %199 : vector<1x128xf32> to vector<192x128xf32>
    %201 = arith.addf %198, %200 : vector<192x128xf32>
    %cst_236 = arith.constant 0.000000e+00 : f32
    %202 = vector.broadcast %cst_236 : f32 to vector<192x128xf32>
    %203 = arith.maximumf %201, %202 : vector<192x128xf32>
    %204 = arith.truncf %203 : vector<192x128xf32> to vector<192x128xbf16>
    %c0_237 = arith.constant 0 : index
    %c0_238 = arith.constant 0 : index
    %c0_239 = arith.constant 0 : index
    %205 = vector.load %arg6[%c0_237, %c0_238, %c0_239] : memref<1x192x128xbf16, #tpu.memory_space<vmem>>, vector<1x192x128xbf16>
    %206 = vector.shape_cast %205 : vector<1x192x128xbf16> to vector<192x128xbf16>
    %207 = vector.shape_cast %204 : vector<192x128xbf16> to vector<1x192x128xbf16>
    tpu.vector_store %arg6[%c0_237, %c0_238, %c0_239], %207 {strides = array<i32>} : memref<1x192x128xbf16, #tpu.memory_space<vmem>>, vector<1x192x128xbf16>,
    %c0_240 = arith.constant 0 : index
    %c0_241 = arith.constant 0 : index
    %208 = vector.load %arg5[%c0_240, %c0_241] : memref<192x1xf32, #tpu.memory_space<vmem>>, vector<192x1xf32>
    %209 = vector.broadcast %208 : vector<192x1xf32> to vector<192x128xf32>
    %210 = arith.mulf %203, %209 : vector<192x128xf32>
    %cst_242 = arith.constant dense<0.000000e+00> : vector<128xf32>
    %211 = vector.multi_reduction <add>, %210, %cst_242 [0] : vector<192x128xf32> to vector<128xf32>
    %212 = vector.shape_cast %211 : vector<128xf32> to vector<1x128xf32>
    %213 = arith.mulf %210, %203 : vector<192x128xf32>
    %cst_243 = arith.constant dense<0.000000e+00> : vector<128xf32>
    %214 = vector.multi_reduction <add>, %213, %cst_243 [0] : vector<192x128xf32> to vector<128xf32>
    %215 = vector.shape_cast %214 : vector<128xf32> to vector<1x128xf32>
    %216 = vector.shape_cast %212 : vector<1x128xf32> to vector<1x128xf32>
    %217 = vector.broadcast %216 : vector<1x128xf32> to vector<8x128xf32>
    %c0_244 = arith.constant 0 : index
    %c0_245 = arith.constant 0 : index
    %218 = vector.load %arg7[%c0_244, %c0_245] : memref<8x128xf32, #tpu.memory_space<vmem>>, vector<8x128xf32>
    tpu.vector_store %arg7[%c0_244, %c0_245], %217 {strides = array<i32>} : memref<8x128xf32, #tpu.memory_space<vmem>>, vector<8x128xf32>,
    %219 = vector.shape_cast %215 : vector<1x128xf32> to vector<1x128xf32>
    %220 = vector.broadcast %219 : vector<1x128xf32> to vector<8x128xf32>
    %c0_246 = arith.constant 0 : index
    %c0_247 = arith.constant 0 : index
    %221 = vector.load %arg8[%c0_246, %c0_247] : memref<8x128xf32, #tpu.memory_space<vmem>>, vector<8x128xf32>
    tpu.vector_store %arg8[%c0_246, %c0_247], %220 {strides = array<i32>} : memref<8x128xf32, #tpu.memory_space<vmem>>, vector<8x128xf32>,
    return
  }
  func.func @transform_0(%arg0: i32, %arg1: i32) -> (i32, i32, i32) {
    %c0_i32 = arith.constant 0 : i32
    %c0_i32_0 = arith.constant 0 : i32
    %c0_i32_1 = arith.constant 0 : i32
    return %arg0, %c0_i32, %c0_i32_0 : i32, i32, i32
  }
  func.func @transform_1(%arg0: i32, %arg1: i32) -> (i32, i32, i32) {
    %c0_i32 = arith.constant 0 : i32
    %c0_i32_0 = arith.constant 0 : i32
    %c0_i32_1 = arith.constant 0 : i32
    %c0_i32_2 = arith.constant 0 : i32
    return %c0_i32, %c0_i32_0, %c0_i32_1 : i32, i32, i32
  }
  func.func @transform_2(%arg0: i32, %arg1: i32) -> (i32, i32) {
    %c0_i32 = arith.constant 0 : i32
    %c0_i32_0 = arith.constant 0 : i32
    %c0_i32_1 = arith.constant 0 : i32
    return %c0_i32, %c0_i32_0 : i32, i32
  }
  func.func @transform_3(%arg0: i32, %arg1: i32) -> (i32, i32) {
    %c0_i32 = arith.constant 0 : i32
    %c0_i32_0 = arith.constant 0 : i32
    return %arg1, %c0_i32 : i32, i32
  }
  func.func @transform_4(%arg0: i32, %arg1: i32) -> (i32, i32, i32) {
    %c0_i32 = arith.constant 0 : i32
    %c0_i32_0 = arith.constant 0 : i32
    return %arg0, %arg1, %c0_i32 : i32, i32, i32
  }
  func.func @transform_5(%arg0: i32, %arg1: i32) -> (i32, i32) {
    %c1_i32 = arith.constant 1 : i32
    %0 = arith.muli %arg0, %c1_i32 : i32
    %1 = arith.addi %0, %arg1 : i32
    %c0_i32 = arith.constant 0 : i32
    %c0_i32_0 = arith.constant 0 : i32
    return %1, %c0_i32 : i32, i32
  }
  func.func @transform_6(%arg0: i32, %arg1: i32) -> (i32, i32) {
    %c1_i32 = arith.constant 1 : i32
    %0 = arith.muli %arg0, %c1_i32 : i32
    %1 = arith.addi %0, %arg1 : i32
    %c0_i32 = arith.constant 0 : i32
    %c0_i32_0 = arith.constant 0 : i32
    return %1, %c0_i32 : i32, i32
  }
}

</mosaic_0001>

<bundles_post_ra>
// kernel: tpu_custom_call.1
= control target key start
LH: loop header
LB: loop body
LE: loop exit
PB: predicated region body
PF: predicated region fallthrough
CT: control target
= control target key end

     0   :  { %s12961_s0 = inlined_call_operand.vmem [shape: bf16[2,272,4], index: 0, kind: input, shape index: {}]   ;;  %s12962_s1 = inlined_call_operand.vmem [shape: bf16[25,4,128], index: 1, kind: input, shape index: {}]   ;;  %s12963_s2 = inlined_call_operand.vmem [shape: f32[1,128], index: 2, kind: input, shape index: {}]   ;;  %s12964_s3 = inlined_call_operand.vmem [shape: f32[192,1], index: 3, kind: input, shape index: {}]   ;;  %s12965_s4 = inlined_call_operand.hbm [shape: bf16[2,192,128], index: 4, kind: output, shape index: {0}]   ;;  %s12966_s5 = inlined_call_operand.hbm [shape: f32[16,128], index: 5, kind: output, shape index: {1}]   ;;  %s12967_s6 = inlined_call_operand.hbm [shape: f32[16,128], index: 6, kind: output, shape index: {2}]  }
   0x1   :  { %12969 = sst [smem:[#allocation10_spill]] %s12961_s0 }
   0x2   :  { %12 = vsyncpa [#allocation4], 0 }
   0x3   :  { %14 = vsyncpa [#allocation4 + $0x1], 0 }
   0x4   :  { %15 = vsyncpa [#allocation6], 0 }
   0x5   :  { %17 = vsyncpa [#allocation6 + $0x1], 0  ;;  %s11083_s21 = smov 0   ;;  %s11085_s22 = smov 0  }
   0x6   :  { %s11087_s23 = smov 0   ;;  %s11089_s24 = smov 0  }
   0x7   :  { %s11091_s25 = smov 0   ;;  %s11093_s26 = smov 0  }
   0x8 LB: > { %s8916_s27 = sadd.s32 4294967295, %s11043_s26   ;;  %s12968_s28 = sadd.s32 4294967294, %s11043_s26   ;;  %s11043_s26 = sphi %s11093_s26, %s23_s26   ;;  %s11039_s25 = sphi %s11091_s25, %s12978_s25   ;;  %s11035_s24 = sphi %s11089_s24, %s12977_s24   ;;  %s11031_s23 = sphi %s11087_s23, %s12976_s23   ;;  %s11027_s22 = sphi %s11085_s22, %s12975_s22   ;;  %s11023_s21 = sphi %s11083_s21, %s12974_s21  }
   0x9   : > { %s35_s29 = sadd.s32 1, %s11039_s25  ;;  %s138_s30 = sadd.s32 1, %s11031_s23 }
   0xa   : > { %p37_p0 = scmp.ge.s32.totalorder %s35_s29, 2  ;;  %p148_p1 = scmp.ne.s32.totalorder %s11031_s23, %s11027_s22 }
   0xb   : > { %p149_p2 = scmp.eq.s32.totalorder %s8916_s27, 1  ;;  %p154_p3 = scmp.ne.s32.totalorder %s11027_s22, %s11023_s21 }
   0xc   : > { %s12980_s29 = smov (%p37_p0, %s35_s29), 0  ;;  %p155_p5 = scmp.eq.s32.totalorder %s12968_s28, 1 }
   0xd   : > { %p11125_p4 = por %p149_p2, %p148_p1  ;;  %s133_s8 = ssub.s32 %s11039_s25, %s12980_s29 }
   0xe   : > { %p8921_p6 = scmp.ge.s32.totalorder %s11043_s26, 1  ;;  %p136_p7 = scmp.eq.s32.totalorder %s133_s8, 0 }
   0xf   : > { %p11134_p8 = por %p155_p5, %p154_p3  ;;  %p252_p9 = scmp.lt.s32.totalorder %s11043_s26, 3 }
  0x10   : > { %s11140_s10 = scalar_select %p136_p7, %s11031_s23, %s138_s30  }
  0x11   : > { %p253_p10 = pnand %p8921_p6, %p252_p9 }
  0x12   : > { %p297_p11 = scmp.lt.s32.totalorder (!%p253_p10), %s11035_s24, 1  ;;  %s12972_s0 = sld [smem:[#allocation10_spill]] (!%p253_p10) }
  0x13   : > { %256 = sbr.rel (%p253_p10) target bundleno = 1402 (0x57a), region = 36  ;;  %s12761_s14 = sand.u32 (!%p253_p10), 1, %s11027_s22  }
  0x14   : > { %s10830_s15 = smul.u32 (!%p253_p10), 96, %s12761_s14  ;;  %s8706_s12 = scalar_lea.sflag (!%p253_p10), [#allocation4], %s12761_s14 }
  0x15   : > { %s10925_s19 = scalar_lea.hbm (!%p253_p10), %s12965_s4, 192 }
  0x16   : > { %s12785_s18 = scalar_lea.vmem (!%p253_p10), [#allocation3], %s10830_s15 }
  0x18   : > { %v336_v0 = vld [vmem:[%s12962_s1] sm:$0x3]  ;;  %vm434_vm0 = vcmask 1041408   ;;  %v9046_v2 = vld [vmem:[%s12962_s1 + $0x4] sm:$0x3]  ;;  %s298_s17 = scalar_select %p297_p11, %s11035_s24, 1 }
  0x19   : > { %v436_v1 = vsel %vm434_vm0, %v336_v0, 0  ;;  %v9107_v3 = vld [vmem:[%s12962_s1 + $0x6] sm:$0x3]  ;;  %v1079_v4 = vsel %vm434_vm0, %v9046_v2, 0  ;;  %v8985_v6 = vld [vmem:[%s12962_s1 + $0x2] sm:$0x3] }
  0x1a   : > { %10827 = vmatpush.bf16.msra.mxu1 %v436_v1  ;;  %10828 = vmatpush.bf16.msra.mxu2 %v436_v1  ;;  %v1466_v5 = vsel %vm434_vm0, %v9107_v3, 0  ;;  %v783_v7 = vsel %vm434_vm0, %v8985_v6, 0  ;;  %v9168_v8 = vld [vmem:[%s12962_s1 + $0x8] sm:$0x3]  ;;  %s10831_s8 = smul.u32 136, %s298_s17  ;;  %vm397_vm1 = vcmask 31744  }
  0x1b   : > { %10829 = vmatpush.bf16.msra.mxu3 %v436_v1  ;;  %445 = vmatpush.bf16.msra.mxu0 %v436_v1  ;;  %v1762_v9 = vsel %vm434_vm0, %v9168_v8, 0  ;;  %v9290_v18 = vld [vmem:[%s12962_s1 + $0xc] sm:$0x3]  ;;  %v9351_v19 = vld [vmem:[%s12962_s1 + $0xe] sm:$0x3]  ;;  %vm1016_vm3 = vcmask 1046528  }
  0x1c   : > { %s11167_s13 = scalar_lea.vmem %s12972_s0, %s10831_s8  ;;  %v2398_v20 = vsel %vm434_vm0, %v9290_v18, 0  ;;  %v2693_v21 = vsel %vm434_vm0, %v9351_v19, 0  ;;  %v9229_v22 = vld [vmem:[%s12962_s1 + $0xa] sm:$0x3]  ;;  %v9412_v23 = vld [vmem:[%s12962_s1 + $0x10] sm:$0x3] }
  0x1d   : > { %v10459_v10 = vld [vmem:[%s11167_s13 + $0x18] sm:$0xff]  ;;  %v10462_v11 = vld [vmem:[%s11167_s13 + $0x30] sm:$0xff]  ;;  %v10465_v12 = vld [vmem:[%s11167_s13 + $0x48] sm:$0xff]  ;;  %v2028_v24 = vsel %vm434_vm0, %v9229_v22, 0  ;;  %v3079_v25 = vsel %vm434_vm0, %v9412_v23, 0  ;;  %vm1699_vm5 = vcmask 1045504  }
  0x1e   : > { %1088 = vmatpush.bf16.msrb.mxu2 %v1079_v4  ;;  %792 = vmatpush.bf16.msrb.mxu1 %v783_v7  ;;  %v10456_v13 = vld [vmem:[%s11167_s13] sm:$0xff]  ;;  %v10463_v15 = vld [vmem:[%s11167_s13 + $0x38] sm:$0xff]  ;;  %v10466_v16 = vld [vmem:[%s11167_s13 + $0x50] sm:$0xff]  ;;  %vm645_vm2 = vsmask.f32 7424  ;;  %s8730_s8 = sshll.u32 %s12785_s18, 4  ;;  %s8731_s8 = int_to_ptr.vmem [resolvable:$true] %s8730_s8 }
  0x1f   : > { %1475 = vmatpush.bf16.msrb.mxu3 %v1466_v5  ;;  %1771 = vmatpush.bf16.msrb.mxu0 %v1762_v9  ;;  %v10460_v14 = vld [vmem:[%s11167_s13 + $0x20] sm:$0xff]  ;;  %v10457_v17 = vld [vmem:[%s11167_s13 + $0x8] sm:$0xff]  ;;  %v10467_v30 = vld [vmem:[%s11167_s13 + $0x58] sm:$0xff]  ;;  %vm1312_vm4 = vsmask.f32 6400 }
  0x20   : > { %8976 = vmatmul.msk.bf16.vlgmr.msra.gmra.mxu1 %vm397_vm1, %v10459_v10  ;;  %8979 = vmatmul.msk.bf16.vlgmr.msra.gmra.mxu2 %vm397_vm1, %v10462_v11  ;;  %v9110_v26 = vld [vmem:[%s11167_s13] sm:$0xe]  ;;  %v10492_v27 = vld [vmem:[%s11167_s13] sm:$0xf0]  ;;  %v10461_v28 = vld [vmem:[%s11167_s13 + $0x28] sm:$0xff] }
  0x21   : > { %8982 = vmatmul.msk.bf16.vlgmr.msra.gmra.mxu3 %vm397_vm1, %v10465_v12  ;;  %8973 = vmatmul.msk.bf16.vlgmr.msra.gmra.mxu0 %vm397_vm1, %v10456_v13  ;;  %v10464_v29 = vld [vmem:[%s11167_s13 + $0x40] sm:$0xff]  ;;  %v10458_v31 = vld [vmem:[%s11167_s13 + $0x10] sm:$0xff]  ;;  %v9111_v33 = vor.u32 %v10492_v27, %v9110_v26  ;;  %v10493_v34 = vld [vmem:[%s11167_s13 + $0x8] sm:$0xff] }
  0x22   : > { %2407 = vmatpush.bf16.msra.mxu2 %v2398_v20  ;;  %2037 = vmatpush.bf16.msra.mxu1 %v2028_v24  ;;  %v10468_v32 = vld [vmem:[%s11167_s13] sm:$0xff]  ;;  %v10469_v35 = vld [vmem:[%s11167_s13 + $0x8] sm:$0xff]  ;;  %v1322_v41 = vshrl.u32 %v10493_v34, 16  ;;  %v1325_v42 = vshll.u32 %v10493_v34, 16  ;;  %v10494_v4 = vld [vmem:[%s11167_s13 + $0x10] sm:$0xff] }
  0x23   : > { %2702 = vmatpush.bf16.msra.mxu3 %v2693_v21  ;;  %3088 = vmatpush.bf16.msra.mxu0 %v3079_v25  ;;  %v649_v36 = vshll.u32 %v10468_v32, 16  ;;  %v1314_v37 = vshrl.u32 %v9111_v33, 16  ;;  %v1317_v38 = vshll.u32 %v9111_v33, 16  ;;  %v9049_v39 = vld [vmem:[%s11167_s13] sm:$0xe]  ;;  %v647_v45 = vshrl.u32 %v10468_v32, 16 }
  0x24   : > { %v10480_v40 = vld [vmem:[%s11167_s13] sm:$0xf0]  ;;  %v9171_v43 = vld [vmem:[%s11167_s13] sm:$0xc]  ;;  %v654_v46 = vshll.u32 %v10469_v35, 16  ;;  %v10481_v48 = vld [vmem:[%s11167_s13 + $0x8] sm:$0xff] }
  0x25   : > { %v10504_v44 = vld [vmem:[%s11167_s13] sm:$0xf0]  ;;  %v651_v47 = vrot.slane %v649_v36, 1  ;;  %v9050_v49 = vor.u32 %v10480_v40, %v9049_v39  ;;  %v1316_v50 = vrot.slane %v1314_v37, 1  ;;  %v1319_v51 = vrot.slane %v1317_v38, 2  ;;  %v10505_v54 = vld [vmem:[%s11167_s13 + $0x8] sm:$0xff] }
  0x26   : > { %v1324_v52 = vrot.slane %v1322_v41, 1  ;;  %v1327_v53 = vrot.slane %v1325_v42, 2  ;;  %v9172_v55 = vor.u32 %v10504_v44, %v9171_v43  ;;  %v656_v56 = vrot.slane %v654_v46, 1  ;;  %v10470_v5 = vld [vmem:[%s11167_s13 + $0x10] sm:$0xff]  ;;  %v10495_v23 = vld [vmem:[%s11167_s13 + $0x18] sm:$0xff]  ;;  %v10496_v42 = vld [vmem:[%s11167_s13 + $0x20] sm:$0xff] }
  0x27   : > { %v652_v57 = vor.u32 %v651_v47, %v647_v45  ;;  %v1017_v58 = vrot.slane %v9050_v49, 1  ;;  %v1018_v59 = vrot.slane %v10481_v48, 1  ;;  %v1320_v60 = vor.u32 %v1319_v51, %v1316_v50  ;;  %v10482_v10 = vld [vmem:[%s11167_s13 + $0x10] sm:$0xff]  ;;  %v10471_v24 = vld [vmem:[%s11167_s13 + $0x18] sm:$0xff]  ;;  %v10472_v43 = vld [vmem:[%s11167_s13 + $0x20] sm:$0xff] }
  0x28   : > { %v1328_v61 = vor.u32 %v1327_v53, %v1324_v52  ;;  %v1700_v62 = vrot.slane %v9172_v55, 2  ;;  %v1701_v63 = vrot.slane %v10505_v54, 2  ;;  %v1331_v6 = vshrl.u32 %v10494_v4, 16  ;;  %v10506_v13 = vld [vmem:[%s11167_s13 + $0x10] sm:$0xff]  ;;  %v10507_v32 = vld [vmem:[%s11167_s13 + $0x18] sm:$0xff]  ;;  %v10484_v48 = vld [vmem:[%s11167_s13 + $0x20] sm:$0xff] }
  0x29   : > { %v657_v0 = vsel %vm645_vm2, %v652_v57, %v656_v56  ;;  %v1019_v1 = vsel %vm1016_vm3, %v1017_v58, %v1018_v59  ;;  %v1334_v7 = vshll.u32 %v10494_v4, 16  ;;  %v658_v8 = vshrl.u32 %v10469_v35, 16  ;;  %v10508_v51 = vld [vmem:[%s11167_s13 + $0x20] sm:$0xff] }
  0x2a   : > { %v1329_v2 = vsel %vm1312_vm4, %v1320_v60, %v1328_v61  ;;  %v1702_v3 = vsel %vm1699_vm5, %v1700_v62, %v1701_v63  ;;  %v662_v9 = vshll.u32 %v10470_v5, 16  ;;  %v1333_v11 = vrot.slane %v1331_v6, 1  ;;  %v10473_v62 = vld [vmem:[%s11167_s13 + $0x28] sm:$0xff] }
  0x2b   : > { %v1336_v12 = vrot.slane %v1334_v7, 2  ;;  %v1703_v18 = vrot.slane %v10506_v13, 2  ;;  %v1340_v25 = vshrl.u32 %v10495_v23, 16  ;;  %v1343_v26 = vshll.u32 %v10495_v23, 16  ;;  %v10509_v6 = vld [vmem:[%s11167_s13 + $0x28] sm:$0xff] }
  0x2c   : > { %v666_v27 = vshrl.u32 %v10470_v5, 16  ;;  %v1705_v37 = vrot.slane %v10507_v32, 2  ;;  %v1349_v44 = vshrl.u32 %v10496_v42, 16  ;;  %v1352_v45 = vshll.u32 %v10496_v42, 16 }
  0x2d   : > { %v1704_v22 = vsel %vm1699_vm5, %v1701_v63, %v1703_v18  ;;  %v674_v46 = vshrl.u32 %v10471_v24, 16  ;;  %v678_v47 = vshll.u32 %v10472_v43, 16  ;;  %v1024_v54 = vrot.slane %v10484_v48, 1 }
  0x2e   : > { %v1706_v41 = vsel %vm1699_vm5, %v1703_v18, %v1705_v37  ;;  %v1351_v49 = vrot.slane %v1349_v44, 1  ;;  %v1354_v50 = vrot.slane %v1352_v45, 2 }
  0x2f   : > { %v680_v53 = vrot.slane %v678_v47, 1 }
  0x30   : > { %8977 = vmatmul.msk.bf16.gmra.mxu1 %vm397_vm1, %v10460_v14  ;;  %8980 = vmatmul.msk.bf16.gmra.mxu2 %vm397_vm1, %v10463_v15  ;;  %v660_v14 = vor.u32 %v658_v8, %v656_v56  ;;  %v664_v15 = vrot.slane %v662_v9, 1  ;;  %v1355_v55 = vor.u32 %v1354_v50, %v1351_v49  ;;  %v1707_v56 = vrot.slane %v10508_v51, 2  ;;  %v10511_v50 = vld [vmem:[%s11167_s13 + $0x38] sm:$0xff] }
  0x31   : > { %8983 = vmatmul.msk.bf16.gmra.mxu3 %vm397_vm1, %v10466_v16  ;;  %8974 = vmatmul.msk.bf16.gmra.mxu0 %vm397_vm1, %v10457_v17  ;;  %v1020_v16 = vrot.slane %v10482_v10, 1  ;;  %v1337_v17 = vor.u32 %v1336_v12, %v1333_v11  ;;  %v1709_v11 = vrot.slane %v10509_v6, 2 }
  0x32   : > { %v665_v19 = vsel %vm645_vm2, %v660_v14, %v664_v15  ;;  %v668_v33 = vor.u32 %v666_v27, %v664_v15  ;;  %v1708_v60 = vsel %vm1699_vm5, %v1705_v37, %v1707_v56  ;;  %v10499_v37 = vld [vmem:[%s11167_s13 + $0x38] sm:$0xff] }
  0x33   : > { %v1021_v20 = vsel %vm1016_vm3, %v1018_v59, %v1020_v16  ;;  %v1338_v21 = vsel %vm1312_vm4, %v1328_v61, %v1337_v17  ;;  %v10497_v61 = vld [vmem:[%s11167_s13 + $0x28] sm:$0xff]  ;;  %v1710_v15 = vsel %vm1699_vm5, %v1707_v56, %v1709_v11 }
  0x34   : > { %v1358_v63 = vshrl.u32 %v10497_v61, 16 }
  0x36   : > { %v1360_v4 = vrot.slane %v1358_v63, 1 }
  0x40   : > { %8978 = vmatmul.msk.bf16.gmra.mxu1 %vm397_vm1, %v10461_v28  ;;  %8981 = vmatmul.msk.bf16.gmra.mxu2 %vm397_vm1, %v10464_v29  ;;  %v670_v28 = vshll.u32 %v10471_v24, 16  ;;  %v10483_v29 = vld [vmem:[%s11167_s13 + $0x18] sm:$0xff] }
  0x41   : > { %8984 = vmatmul.msk.bf16.gmra.mxu3 %vm397_vm1, %v10467_v30  ;;  %8975 = vmatmul.msk.bf16.gmra.mxu0 %vm397_vm1, %v10458_v31  ;;  %v1342_v30 = vrot.slane %v1340_v25, 1  ;;  %v1345_v31 = vrot.slane %v1343_v26, 2  ;;  %v1022_v35 = vrot.slane %v10483_v29, 1  ;;  %v10510_v25 = vld [vmem:[%s11167_s13 + $0x30] sm:$0xff] }
  0x42   : > { %v672_v34 = vrot.slane %v670_v28, 1 }
  0x43   : > { %v1346_v36 = vor.u32 %v1345_v31, %v1342_v30  ;;  %v1023_v39 = vsel %vm1016_vm3, %v1020_v16, %v1022_v35  ;;  %v1025_v58 = vsel %vm1016_vm3, %v1022_v35, %v1024_v54  ;;  %v10498_v16 = vld [vmem:[%s11167_s13 + $0x30] sm:$0xff]  ;;  %v1711_v30 = vrot.slane %v10510_v25, 2 }
  0x44   : > { %v673_v38 = vsel %vm645_vm2, %v668_v33, %v672_v34  ;;  %v676_v52 = vor.u32 %v674_v46, %v672_v34  ;;  %v1367_v18 = vshrl.u32 %v10498_v16, 16  ;;  %v10487_v46 = vld [vmem:[%s11167_s13 + $0x38] sm:$0xff] }
  0x45   : > { %v1347_v40 = vsel %vm1312_vm4, %v1337_v17, %v1346_v36  ;;  %v1356_v59 = vsel %vm1312_vm4, %v1346_v36, %v1355_v55  ;;  %v10474_v17 = vld [vmem:[%s11167_s13 + $0x30] sm:$0xff]  ;;  %v1712_v36 = vsel %vm1699_vm5, %v1709_v11, %v1711_v30 }
  0x46   : > { %v681_v57 = vsel %vm645_vm2, %v676_v52, %v680_v53  ;;  %v1369_v23 = vrot.slane %v1367_v18, 1  ;;  %v698_v44 = vshrl.u32 %v10474_v17, 16 }
  0x50   : > { %9034 = vmatmul.msk.bf16.vlgmr.msrb.gmra.mxu1 %vm397_vm1, %v657_v0  ;;  %9095 = vmatmul.msk.bf16.vlgmr.msrb.gmra.mxu2 %vm397_vm1, %v1019_v1  ;;  %v1361_v0 = vshll.u32 %v10497_v61, 16  ;;  %v682_v1 = vshrl.u32 %v10472_v43, 16 }
  0x51   : > { %9156 = vmatmul.msk.bf16.vlgmr.msrb.gmra.mxu3 %vm397_vm1, %v1329_v2  ;;  %9217 = vmatmul.msk.bf16.vlgmr.msrb.gmra.mxu0 %vm397_vm1, %v1702_v3  ;;  %v686_v2 = vshll.u32 %v10473_v62, 16  ;;  %v10485_v3 = vld [vmem:[%s11167_s13 + $0x28] sm:$0xff] }
  0x52   : > { %v1363_v5 = vrot.slane %v1361_v0, 2  ;;  %v684_v7 = vor.u32 %v682_v1, %v680_v53  ;;  %v1026_v9 = vrot.slane %v10485_v3, 1  ;;  %v1030_v53 = vrot.slane %v10487_v46, 1  ;;  %v10500_v0 = vld [vmem:[%s11167_s13 + $0x40] sm:$0xff] }
  0x53   : > { %v688_v8 = vrot.slane %v686_v2, 1  ;;  %v10476_v1 = vld [vmem:[%s11167_s13 + $0x40] sm:$0xff]  ;;  %v1385_v2 = vshrl.u32 %v10500_v0, 16  ;;  %v1388_v3 = vshll.u32 %v10500_v0, 16 }
  0x54   : > { %v1364_v10 = vor.u32 %v1363_v5, %v1360_v4  ;;  %v1027_v13 = vsel %vm1016_vm3, %v1024_v54, %v1026_v9 }
  0x55   : > { %v689_v12 = vsel %vm645_vm2, %v684_v7, %v688_v8  ;;  %v1387_v11 = vrot.slane %v1385_v2, 1  ;;  %v10478_v2 = vld [vmem:[%s11167_s13 + $0x50] sm:$0xff] }
  0x56   : > { %v1365_v14 = vsel %vm1312_vm4, %v1355_v55, %v1364_v10  ;;  %v1713_v55 = vrot.slane %v10511_v50, 2 }
  0x58   : > { %v1714_v63 = vsel %vm1699_vm5, %v1711_v30, %v1713_v55 }
  0x60   : > { %9035 = vmatmul.msk.bf16.gmra.mxu1 %vm397_vm1, %v665_v19  ;;  %9096 = vmatmul.msk.bf16.gmra.mxu2 %vm397_vm1, %v1021_v20  ;;  %v1370_v19 = vshll.u32 %v10498_v16, 16  ;;  %v690_v20 = vshrl.u32 %v10473_v62, 16 }
  0x61   : > { %9157 = vmatmul.msk.bf16.gmra.mxu3 %vm397_vm1, %v1338_v21  ;;  %9218 = vmatmul.msk.bf16.gmra.mxu0 %vm397_vm1, %v1704_v22  ;;  %v694_v21 = vshll.u32 %v10474_v17, 16  ;;  %v10486_v22 = vld [vmem:[%s11167_s13 + $0x30] sm:$0xff] }
  0x62   : > { %v1372_v24 = vrot.slane %v1370_v19, 2  ;;  %v692_v26 = vor.u32 %v690_v20, %v688_v8  ;;  %v1028_v28 = vrot.slane %v10486_v22, 1  ;;  %v710_v8 = vshll.u32 %v10476_v1, 16 }
  0x63   : > { %v696_v27 = vrot.slane %v694_v21, 1 }
  0x64   : > { %v1373_v29 = vor.u32 %v1372_v24, %v1369_v23  ;;  %v1029_v33 = vsel %vm1016_vm3, %v1026_v9, %v1028_v28  ;;  %v10488_v9 = vld [vmem:[%s11167_s13 + $0x40] sm:$0xff] }
  0x65   : > { %v697_v32 = vsel %vm645_vm2, %v692_v26, %v696_v27  ;;  %v700_v51 = vor.u32 %v698_v44, %v696_v27  ;;  %v1032_v16 = vrot.slane %v10488_v9, 1  ;;  %v10501_v27 = vld [vmem:[%s11167_s13 + $0x48] sm:$0xff] }
  0x66   : > { %v1374_v35 = vsel %vm1312_vm4, %v1364_v10, %v1373_v29  ;;  %v1397_v30 = vshll.u32 %v10501_v27, 16 }
  0x67   : > { %v1033_v23 = vsel %vm1016_vm3, %v1030_v53, %v1032_v16 }
  0x68   : > { %v1399_v44 = vrot.slane %v1397_v30, 2 }
  0x70   : > { %9036 = vmatmul.msk.bf16.gmra.mxu1 %vm397_vm1, %v673_v38  ;;  %9097 = vmatmul.msk.bf16.gmra.mxu2 %vm397_vm1, %v1023_v39  ;;  %v10475_v38 = vld [vmem:[%s11167_s13 + $0x38] sm:$0xff]  ;;  %v1376_v39 = vshrl.u32 %v10499_v37, 16 }
  0x71   : > { %9158 = vmatmul.msk.bf16.gmra.mxu3 %vm397_vm1, %v1347_v40  ;;  %9219 = vmatmul.msk.bf16.gmra.mxu0 %vm397_vm1, %v1706_v41  ;;  %v1379_v40 = vshll.u32 %v10499_v37, 16  ;;  %v702_v45 = vshll.u32 %v10475_v38, 16  ;;  %v706_v7 = vshrl.u32 %v10475_v38, 16  ;;  %v10489_v38 = vld [vmem:[%s11167_s13 + $0x48] sm:$0xff] }
  0x72   : > { %v1378_v48 = vrot.slane %v1376_v39, 1 }
  0x73   : > { %v1381_v49 = vrot.slane %v1379_v40, 2  ;;  %v704_v52 = vrot.slane %v702_v45, 1  ;;  %v10513_v45 = vld [vmem:[%s11167_s13 + $0x48] sm:$0xff] }
  0x75   : > { %v1382_v54 = vor.u32 %v1381_v49, %v1378_v48  ;;  %v1034_v49 = vrot.slane %v10489_v38, 1 }
  0x77   : > { %v1383_v62 = vsel %vm1312_vm4, %v1373_v29, %v1382_v54  ;;  %v1394_v29 = vshrl.u32 %v10501_v27, 16 }
  0x79   : > { %v1396_v40 = vrot.slane %v1394_v29, 1 }
  0x7b   : > { %v1400_v50 = vor.u32 %v1399_v44, %v1396_v40 }
  0x80   : > { %9037 = vmatmul.msk.bf16.gmra.mxu1 %vm397_vm1, %v681_v57  ;;  %9098 = vmatmul.msk.bf16.gmra.mxu2 %vm397_vm1, %v1025_v58 }
  0x81   : > { %9159 = vmatmul.msk.bf16.gmra.mxu3 %vm397_vm1, %v1356_v59  ;;  %9220 = vmatmul.msk.bf16.gmra.mxu0 %vm397_vm1, %v1708_v60  ;;  %v705_v59 = vsel %vm645_vm2, %v700_v51, %v704_v52  ;;  %v1031_v60 = vsel %vm1016_vm3, %v1028_v28, %v1030_v53  ;;  %v10477_v28 = vld [vmem:[%s11167_s13 + $0x48] sm:$0xff]  ;;  %v1717_v51 = vrot.slane %v10513_v45, 2 }
  0x82   : > { %v718_v37 = vshll.u32 %v10477_v28, 16 }
  0x84   : > { %v720_v48 = vrot.slane %v718_v37, 1 }
  0x90   : > { %9038 = vmatmul.msk.bf16.gmra.mxu1 %vm397_vm1, %v689_v12  ;;  %9099 = vmatmul.msk.bf16.gmra.mxu2 %vm397_vm1, %v1027_v13  ;;  %v1390_v12 = vrot.slane %v1388_v3, 2  ;;  %v10512_v13 = vld [vmem:[%s11167_s13 + $0x40] sm:$0xff] }
  0x91   : > { %9160 = vmatmul.msk.bf16.gmra.mxu3 %vm397_vm1, %v1365_v14  ;;  %9221 = vmatmul.msk.bf16.gmra.mxu0 %vm397_vm1, %v1710_v15  ;;  %v708_v14 = vor.u32 %v706_v7, %v704_v52  ;;  %v712_v15 = vrot.slane %v710_v8, 1  ;;  %v1715_v18 = vrot.slane %v10512_v13, 2  ;;  %v726_v13 = vshll.u32 %v10478_v2, 16 }
  0x92   : > { %v1391_v17 = vor.u32 %v1390_v12, %v1387_v11  ;;  %v722_v12 = vshrl.u32 %v10477_v28, 16 }
  0x93   : > { %v713_v22 = vsel %vm645_vm2, %v708_v14, %v712_v15  ;;  %v1716_v26 = vsel %vm1699_vm5, %v1713_v55, %v1715_v18  ;;  %v1718_v0 = vsel %vm1699_vm5, %v1715_v18, %v1717_v51  ;;  %v10490_v14 = vld [vmem:[%s11167_s13 + $0x50] sm:$0xff]  ;;  %v728_v27 = vrot.slane %v726_v13, 1  ;;  %v11404_v13 = vld [vmem:[%s11167_s13 + $0x58] sm:$0xff] }
  0x94   : > { %v1392_v25 = vsel %vm1312_vm4, %v1382_v54, %v1391_v17  ;;  %v1036_v29 = vrot.slane %v10490_v14, 1  ;;  %v1222_v14 = vld [vmem:[%s11167_s13 + $0x60] sm:$0x3] }
  0x96   : > { %v1037_v44 = vsel %vm1016_vm3, %v1034_v49, %v1036_v29 }
  0x9d   : > { %v11280_v31 = vpop.f32.mrf.mxu1 }
  0x9e   : > { %v11284_v34 = vpop.f32.mrf.mxu0 }
  0xa0   : > { %9039 = vmatmul.msk.bf16.gmra.mxu1 %vm397_vm1, %v697_v32  ;;  %9100 = vmatmul.msk.bf16.gmra.mxu2 %vm397_vm1, %v1029_v33 }
  0xa1   : > { %9161 = vmatmul.msk.bf16.gmra.mxu3 %vm397_vm1, %v1374_v35  ;;  %9222 = vmatmul.msk.bf16.gmra.mxu0 %vm397_vm1, %v1712_v36  ;;  %v714_v36 = vshrl.u32 %v10476_v1, 16  ;;  %v10502_v1 = vld [vmem:[%s11167_s13 + $0x50] sm:$0xff] }
  0xa2   : > { %v1403_v3 = vshrl.u32 %v10502_v1, 16  ;;  %v1406_v7 = vshll.u32 %v10502_v1, 16  ;;  %v730_v1 = vshrl.u32 %v10478_v2, 16 }
  0xa3   : > { %v11294_v41 = vpop.f32.mrf.mxu2  ;;  %v716_v46 = vor.u32 %v714_v36, %v712_v15 }
  0xa4   : > { %v11296_v42 = vpop.f32.mrf.mxu3  ;;  %v1405_v18 = vrot.slane %v1403_v3, 1 }
  0xa5   : > { %v11298_v43 = vpop.f32.mrf.mxu1  ;;  %v721_v55 = vsel %vm645_vm2, %v716_v46, %v720_v48 }
  0xa6   : > { %v11301_v47 = vpop.f32.mrf.mxu0 }
  0xab   : > { %v11304_v56 = vpop.f32.mrf.mxu2 }
  0xac   : > { %v11306_v57 = vpop.f32.mrf.mxu3 }
  0xad   : > { %v11308_v58 = vpop.f32.mrf.mxu1 }
  0xae   : > { %v11312_v61 = vpop.f32.mrf.mxu0 }
  0xb0   : > { %9040 = vmatmul.msk.bf16.gmra.mxu1 %vm397_vm1, %v705_v59  ;;  %9101 = vmatmul.msk.bf16.gmra.mxu2 %vm397_vm1, %v1031_v60  ;;  %v1035_v59 = vsel %vm1016_vm3, %v1032_v16, %v1034_v49  ;;  %v11396_v49 = vld [vmem:[%s11167_s13 + $0x58] sm:$0xff] }
  0xb1   : > { %9162 = vmatmul.msk.bf16.gmra.mxu3 %vm397_vm1, %v1383_v62  ;;  %9223 = vmatmul.msk.bf16.gmra.mxu0 %vm397_vm1, %v1714_v63  ;;  %v1401_v63 = vsel %vm1312_vm4, %v1391_v17, %v1400_v50  ;;  %v734_v3 = vshll.u32 %v11396_v49, 16 }
  0xb3   : > { %v11322_v4 = vpop.f32.mrf.mxu2 }
  0xb4   : > { %v11324_v5 = vpop.f32.mrf.mxu3 }
  0xb5   : > { %v11326_v6 = vpop.f32.mrf.mxu1 }
  0xb6   : > { %v11329_v10 = vpop.f32.mrf.mxu0 }
  0xbb   : > { %v11332_v19 = vpop.f32.mrf.mxu2 }
  0xbc   : > { %v11334_v20 = vpop.f32.mrf.mxu3 }
  0xbd   : > { %v11336_v21 = vpop.f32.mrf.mxu1 }
  0xbe   : > { %v11340_v24 = vpop.f32.mrf.mxu0 }
  0xc0   : > { %9041 = vmatmul.msk.bf16.gmra.mxu1 %vm397_vm1, %v713_v22  ;;  %9102 = vmatmul.msk.bf16.gmra.mxu2 %vm397_vm1, %v1033_v23  ;;  %v1408_v22 = vrot.slane %v1406_v7, 2  ;;  %v11378_v23 = vld [vmem:[%s11167_s13 + $0x50] sm:$0xff]  ;;  %v11400_v7 = vld [vmem:[%s11167_s13 + $0x58] sm:$0xff] }
  0xc1   : > { %9163 = vmatmul.msk.bf16.gmra.mxu3 %vm397_vm1, %v1392_v25  ;;  %9224 = vmatmul.msk.bf16.gmra.mxu0 %vm397_vm1, %v1716_v26  ;;  %v724_v26 = vor.u32 %v722_v12, %v720_v48  ;;  %v1719_v36 = vrot.slane %v11378_v23, 2  ;;  %v1038_v2 = vrot.slane %v11400_v7, 1  ;;  %v1721_v23 = vrot.slane %v11404_v13, 2 }
  0xc2   : > { %v1409_v30 = vor.u32 %v1408_v22, %v1405_v18  ;;  %v1298_v18 = vunpack.c.l.b16 %v1222_v14 }
  0xc3   : > { %v11350_v32 = vpop.f32.mrf.mxu2 }
  0xc4   : > { %v11352_v33 = vpop.f32.mrf.mxu3  ;;  %v1410_v48 = vsel %vm1312_vm4, %v1400_v50, %v1409_v30 }
  0xc5   : > { %v11354_v35 = vpop.f32.mrf.mxu1 }
  0xc6   : > { %v11357_v39 = vpop.f32.mrf.mxu0 }
  0xcb   : > { %v11360_v52 = vpop.f32.mrf.mxu2 }
  0xcc   : > { %v11362_v53 = vpop.f32.mrf.mxu3 }
  0xcd   : > { %v794_v54 = vpop.f32.mrf.mxu1 }
  0xce   : > { %v854_v60 = vadd.f32 %v794_v54, %v11284_v34  ;;  %v1773_v62 = vpop.f32.mrf.mxu0 }
  0xd0   : > { %9042 = vmatmul.msk.bf16.gmra.mxu1 %vm397_vm1, %v721_v55  ;;  %9103 = vmatmul.msk.bf16.gmra.mxu2 %vm397_vm1, %v1035_v59  ;;  %v1720_v55 = vsel %vm1699_vm5, %v1717_v51, %v1719_v36  ;;  %v10503_v59 = vld [vmem:[%s11167_s13 + $0x58] sm:$0xff] }
  0xd1   : > { %9164 = vmatmul.msk.bf16.gmra.mxu3 %vm397_vm1, %v1401_v63  ;;  %9225 = vmatmul.msk.bf16.gmra.mxu0 %vm397_vm1, %v1718_v0  ;;  %v1415_v50 = vshll.u32 %v10503_v59, 16 }
  0xd3   : > { %v1090_v34 = vpop.f32.mrf.mxu2  ;;  %v1417_v12 = vrot.slane %v1415_v50, 2 }
  0xd4   : > { %v1150_v8 = vadd.f32 %v1090_v34, %v854_v60  ;;  %v1477_v9 = vpop.f32.mrf.mxu3 }
  0xd5   : > { %v796_v11 = vpop.f32.mrf.mxu1 }
  0xd6   : > { %v1537_v15 = vadd.f32 %v1477_v9, %v1150_v8  ;;  %v855_v16 = vadd.f32 %v796_v11, %v11301_v47  ;;  %v1775_v17 = vpop.f32.mrf.mxu0  ;;  %v729_v47 = vsel %vm645_vm2, %v724_v26, %v728_v27 }
  0xd8   : > { %v11380_v25 = vadd.f32 %v1773_v62, %v1537_v15 }
  0xdb   : > { %v1092_v28 = vpop.f32.mrf.mxu2 }
  0xdc   : > { %v1151_v37 = vadd.f32 %v1092_v28, %v855_v16  ;;  %v1479_v38 = vpop.f32.mrf.mxu3  ;;  %v732_v16 = vor.u32 %v730_v1, %v728_v27  ;;  %v1039_v27 = vsel %vm1016_vm3, %v1036_v29, %v1038_v2 }
  0xdd   : > { %v799_v40 = vpop.f32.mrf.mxu1 }
  0xde   : > { %v1538_v45 = vadd.f32 %v1479_v38, %v1151_v37  ;;  %v856_v46 = vadd.f32 %v799_v40, %v11312_v61  ;;  %v1778_v54 = vpop.f32.mrf.mxu0  ;;  %v1412_v61 = vshrl.u32 %v10503_v59, 16  ;;  %v926_v59 = vld [vmem:[%s11167_s13 + $0x60] sm:$0x1] }
  0xdf   : > { %v1002_v50 = vunpack.c.l.b16 %v926_v59  ;;  %v10552_v59 = vld [vmem:[%s11167_s13 + $0x8] sm:$0xf0] }
  0xe0   : > { %9043 = vmatmul.msk.bf16.gmra.mxu1 %vm397_vm1, %v729_v47  ;;  %9104 = vmatmul.msk.bf16.gmra.mxu2 %vm397_vm1, %v1037_v44  ;;  %v11391_v60 = vadd.f32 %v1775_v17, %v1538_v45  ;;  %v1414_v11 = vrot.slane %v1412_v61, 1  ;;  %v736_v17 = vrot.slane %v734_v3, 1  ;;  %v1311_v44 = vpack.c.b16 %v1298_v18, %v1298_v18  ;;  %v1609_v61 = vld [vmem:[%s11167_s13 + $0x60] sm:$0x3] }
  0xe1   : > { %9165 = vmatmul.msk.bf16.gmra.mxu3 %vm397_vm1, %v1410_v48  ;;  %9226 = vmatmul.msk.bf16.gmra.mxu0 %vm397_vm1, %v1720_v55  ;;  %v1722_v55 = vsel %vm1699_vm5, %v1719_v36, %v1721_v23  ;;  %v9595_v36 = vld [vmem:[%s12962_s1 + $0x16] sm:$0x3]  ;;  %v1015_v14 = vpack.c.b16 %v1002_v50, %v1002_v50 }
  0xe2   : > { %v11410_v22 = vor.u32 %v1417_v12, %v1414_v11  ;;  %v737_v40 = vsel %vm645_vm2, %v732_v16, %v736_v17  ;;  %v4010_v1 = vsel %vm434_vm0, %v9595_v36, 0  ;;  %v738_v11 = vshrl.u32 %v11396_v49, 16 }
  0xe3   : > { %v1095_v62 = vpop.f32.mrf.mxu2  ;;  %4019 = vmatpush.bf16.msrb.mxu3 %v4010_v1 }
  0xe4   : > { %v1152_v51 = vadd.f32 %v1095_v62, %v856_v46  ;;  %v1482_v63 = vpop.f32.mrf.mxu3  ;;  %v1419_v48 = vsel %vm1312_vm4, %v1409_v30, %v11410_v22  ;;  %v1421_v62 = vshrl.u32 %v1311_v44, 16  ;;  %v9534_v30 = vld [vmem:[%s12962_s1 + $0x14] sm:$0x3] }
  0xe5   : > { %v801_v0 = vpop.f32.mrf.mxu1 }
  0xe6   : > { %v1539_v34 = vadd.f32 %v1482_v63, %v1152_v51  ;;  %v857_v8 = vadd.f32 %v801_v0, %v11329_v10  ;;  %v1780_v9 = vpop.f32.mrf.mxu0  ;;  %v555_v10 = vld [vmem:[%s11167_s13 + $0x60] sm:$0x1]  ;;  %v1424_v51 = vshll.u32 %v1311_v44, 16  ;;  %v1685_v63 = vunpack.c.l.b16 %v1609_v61 }
  0xe7   : > { %v631_v47 = vunpack.c.l.b16 %v555_v10  ;;  %v3640_v0 = vsel %vm434_vm0, %v9534_v30, 0  ;;  %v1423_v16 = vrot.slane %v1421_v62, 1 }
  0xe8   : > { %v11407_v15 = vadd.f32 %v1778_v54, %v1539_v34  ;;  %3649 = vmatpush.bf16.msrb.mxu2 %v3640_v0 }
  0xeb   : > { %v1097_v26 = vpop.f32.mrf.mxu2 }
  0xec   : > { %v1153_v28 = vadd.f32 %v1097_v26, %v857_v8  ;;  %v1484_v37 = vpop.f32.mrf.mxu3 }
  0xed   : > { %v804_v38 = vpop.f32.mrf.mxu1 }
  0xee   : > { %v1540_v45 = vadd.f32 %v1484_v37, %v1153_v28  ;;  %v858_v46 = vadd.f32 %v804_v38, %v11340_v24  ;;  %v1783_v54 = vpop.f32.mrf.mxu0  ;;  %v644_v24 = vpack.c.b16 %v631_v47, %v631_v47  ;;  %v1426_v28 = vrot.slane %v1424_v51, 2  ;;  %v9473_v38 = vld [vmem:[%s12962_s1 + $0x12] sm:$0x3] }
  0xef   : > { %v1698_v37 = vpack.c.b16 %v1685_v63, %v1685_v63  ;;  %v3374_v49 = vsel %vm434_vm0, %v9473_v38, 0  ;;  %v740_v47 = vor.u32 %v738_v11, %v736_v17  ;;  %v10528_v17 = vld [vmem:[%s11167_s13 + $0x8] sm:$0xff] }
  0xf0   : > { %9044 = vmatmul.msk.bf16.gmra.mxu1 %vm397_vm1, %v737_v40  ;;  %9105 = vmatmul.msk.bf16.gmra.mxu2 %vm397_vm1, %v1039_v27  ;;  %v11428_v29 = vadd.f32 %v1780_v9, %v1540_v45  ;;  %v742_v12 = vshll.u32 %v644_v24, 16  ;;  %v9656_v40 = vld [vmem:[%s12962_s1 + $0x18] sm:$0x3]  ;;  %v1040_v45 = vrot.slane %v1015_v14, 1 }
  0xf1   : > { %9166 = vmatmul.msk.bf16.gmra.mxu3 %vm397_vm1, %v1419_v48  ;;  %9227 = vmatmul.msk.bf16.gmra.mxu0 %vm397_vm1, %v1722_v55  ;;  %v4305_v27 = vsel %vm434_vm0, %v9656_v40, 0  ;;  %v1723_v48 = vrot.slane %v1698_v37, 2  ;;  %v9415_v55 = vld [vmem:[%s11167_s13 + $0x8] sm:$0xe] }
  0xf2   : > { %3383 = vmatpush.bf16.msrb.mxu1 %v3374_v49  ;;  %4314 = vmatpush.bf16.msrb.mxu0 %v4305_v27  ;;  %v744_v44 = vrot.slane %v742_v12, 1  ;;  %v9416_v36 = vor.u32 %v10552_v59, %v9415_v55 }
  0xf3   : > { %v1100_v3 = vpop.f32.mrf.mxu2  ;;  %v1724_v1 = vsel %vm1699_vm5, %v1721_v23, %v1723_v48  ;;  %v10540_v23 = vld [vmem:[%s11167_s13 + $0x8] sm:$0xf0] }
  0xf4   : > { %v1154_v34 = vadd.f32 %v1100_v3, %v858_v46  ;;  %v1487_v8 = vpop.f32.mrf.mxu3  ;;  %v1427_v46 = vor.u32 %v1426_v28, %v1423_v16  ;;  %v745_v30 = vsel %vm645_vm2, %v740_v47, %v744_v44  ;;  %v10553_v3 = vld [vmem:[%s11167_s13 + $0x10] sm:$0xff] }
  0xf5   : > { %v806_v9 = vpop.f32.mrf.mxu1  ;;  %v2935_v11 = vshrl.u32 %v10553_v3, 16  ;;  %v2938_v12 = vshll.u32 %v10553_v3, 16  ;;  %v10541_v47 = vld [vmem:[%s11167_s13 + $0x10] sm:$0xff] }
  0xf6   : > { %v1541_v18 = vadd.f32 %v1487_v8, %v1154_v34  ;;  %v859_v10 = vadd.f32 %v806_v9, %v11357_v39  ;;  %v1785_v26 = vpop.f32.mrf.mxu0  ;;  %v1428_v0 = vsel %vm1312_vm4, %v11410_v22, %v1427_v46  ;;  %v2264_v34 = vshll.u32 %v10528_v17, 16  ;;  %v9354_v8 = vld [vmem:[%s11167_s13 + $0x8] sm:$0xe] }
  0xf7   : > { %v2927_v22 = vshrl.u32 %v9416_v36, 16  ;;  %v2930_v9 = vshll.u32 %v9416_v36, 16  ;;  %v9355_v38 = vor.u32 %v10540_v23, %v9354_v8  ;;  %v2937_v44 = vrot.slane %v2935_v11, 1  ;;  %v10516_v36 = vld [vmem:[%s11167_s13 + $0x8] sm:$0xff]  ;;  %v10554_v8 = vld [vmem:[%s11167_s13 + $0x18] sm:$0xff] }
  0xf8   : > { %v11450_v39 = vadd.f32 %v1783_v54, %v1541_v18  ;;  %v1041_v54 = vsel %vm1016_vm3, %v1038_v2, %v1040_v45  ;;  %v11472_v2 = vld [vmem:[%s11167_s13 + $0x10] sm:$0xff]  ;;  %v2266_v28 = vrot.slane %v2264_v34, 1  ;;  %v2940_v45 = vrot.slane %v2938_v12, 2 }
  0xf9   : > { %v2269_v37 = vshll.u32 %v11472_v2, 16  ;;  %v2929_v40 = vrot.slane %v2927_v22, 1  ;;  %v2631_v59 = vrot.slane %v9355_v38, 1  ;;  %v10530_v22 = vld [vmem:[%s11167_s13 + $0x18] sm:$0xff]  ;;  %v2944_v23 = vshrl.u32 %v10554_v8, 16 }
  0xfb   : > { %v1102_v61 = vpop.f32.mrf.mxu2  ;;  %v2271_v55 = vrot.slane %v2269_v37, 1  ;;  %v10542_v37 = vld [vmem:[%s11167_s13 + $0x18] sm:$0xff]  ;;  %v2946_v38 = vrot.slane %v2944_v23, 1 }
  0xfc   : > { %v1155_v24 = vadd.f32 %v1102_v61, %v859_v10  ;;  %v1489_v50 = vpop.f32.mrf.mxu3  ;;  %v2262_v10 = vshrl.u32 %v10528_v17, 16 }
  0xfd   : > { %v809_v62 = vpop.f32.mrf.mxu1 }
  0xfe   : > { %v1542_v51 = vadd.f32 %v1489_v50, %v1155_v24  ;;  %v1788_v63 = vpop.f32.mrf.mxu0  ;;  %v860_v13 = vadd.f32 %v809_v62, %v11280_v31  ;;  %v2932_v31 = vrot.slane %v2930_v9, 2  ;;  %v2267_v48 = vor.u32 %v2266_v28, %v2262_v10 }
  0xff   : > { %v2632_v24 = vrot.slane %v10541_v47, 1  ;;  %v2941_v62 = vor.u32 %v2940_v45, %v2937_v44  ;;  %v2947_v9 = vshll.u32 %v10554_v8, 16  ;;  %v2277_v10 = vshll.u32 %v10530_v22, 16 }
 0x100   : > { %9045 = vmatmul.msk.bf16.gmra.mxu1 %vm397_vm1, %v745_v30  ;;  %9106 = vmatmul.msk.bf16.gmra.mxu2 %vm397_vm1, %v1041_v54  ;;  %v11467_v7 = vadd.f32 %v1785_v26, %v1542_v51  ;;  %v2933_v50 = vor.u32 %v2932_v31, %v2929_v40  ;;  %v2634_v31 = vrot.slane %v10542_v37, 1  ;;  %v2281_v8 = vshrl.u32 %v10530_v22, 16 }
 0x101   : > { %9167 = vmatmul.msk.bf16.gmra.mxu3 %vm397_vm1, %v1428_v0  ;;  %9228 = vmatmul.msk.bf16.gmra.mxu0 %vm397_vm1, %v1724_v1  ;;  %v2272_v0 = vsel %vm645_vm2, %v2267_v48, %v2271_v55  ;;  %v2633_v3 = vsel %vm1016_vm3, %v2631_v59, %v2632_v24  ;;  %v2949_v40 = vrot.slane %v2947_v9, 2  ;;  %v10517_v59 = vld [vmem:[%s11167_s13 + $0x10] sm:$0xff] }
 0x102   : > { %v2942_v34 = vsel %vm1312_vm4, %v2933_v50, %v2941_v62 }
 0x103   : > { %v1105_v14 = vpop.f32.mrf.mxu2  ;;  %v2950_v44 = vor.u32 %v2949_v40, %v2946_v38  ;;  %v10518_v40 = vld [vmem:[%s11167_s13 + $0x18] sm:$0xff] }
 0x104   : > { %v1156_v16 = vadd.f32 %v1105_v14, %v860_v13  ;;  %v1492_v18 = vpop.f32.mrf.mxu3 }
 0x105   : > { %v811_v26 = vpop.f32.mrf.mxu1 }
 0x106   : > { %v1543_v49 = vadd.f32 %v1492_v18, %v1156_v16  ;;  %v1790_v27 = vpop.f32.mrf.mxu0  ;;  %v861_v61 = vadd.f32 %v811_v26, %v11298_v43  ;;  %v2273_v18 = vshrl.u32 %v11472_v2, 16 }
 0x108   : > { %v11479_v46 = vadd.f32 %v1788_v63, %v1543_v49 }
 0x10b   : > { %v1107_v30 = vpop.f32.mrf.mxu2 }
 0x10c   : > { %v1157_v54 = vadd.f32 %v1107_v30, %v861_v61  ;;  %v1494_v17 = vpop.f32.mrf.mxu3 }
 0x10d   : > { %v814_v51 = vpop.f32.mrf.mxu1 }
 0x10e   : > { %v1544_v1 = vadd.f32 %v1494_v17, %v1157_v54  ;;  %v1793_v63 = vpop.f32.mrf.mxu0  ;;  %v862_v13 = vadd.f32 %v814_v51, %v11308_v58  ;;  %v2279_v58 = vrot.slane %v2277_v10, 1  ;;  %v2635_v17 = vsel %vm1016_vm3, %v2632_v24, %v2634_v31  ;;  %v10531_v51 = vld [vmem:[%s11167_s13 + $0x20] sm:$0xff] }
 0x110   : > { %9278 = vmatmul.msk.bf16.vlgmr.msra.gmra.mxu1 %vm397_vm1, %v10516_v36  ;;  %9339 = vmatmul.msk.bf16.vlgmr.msra.gmra.mxu2 %vm397_vm1, %v2272_v0  ;;  %v11489_v43 = vadd.f32 %v1790_v27, %v1544_v1  ;;  %v2275_v27 = vor.u32 %v2273_v18, %v2271_v55  ;;  %v2951_v36 = vsel %vm1312_vm4, %v2941_v62, %v2950_v44  ;;  %v10555_v55 = vld [vmem:[%s11167_s13 + $0x20] sm:$0xff] }
 0x111   : > { %9400 = vmatmul.msk.bf16.vlgmr.msra.gmra.mxu3 %vm397_vm1, %v2633_v3  ;;  %9461 = vmatmul.msk.bf16.vlgmr.msra.gmra.mxu0 %vm397_vm1, %v2942_v34  ;;  %v2953_v1 = vshrl.u32 %v10555_v55, 16  ;;  %v2283_v18 = vor.u32 %v2281_v8, %v2279_v58 }
 0x112   : > { %v2280_v50 = vsel %vm645_vm2, %v2275_v27, %v2279_v58  ;;  %v10556_v58 = vld [vmem:[%s11167_s13 + $0x28] sm:$0xff] }
 0x113   : > { %v1110_v11 = vpop.f32.mrf.mxu2 }
 0x114   : > { %v1158_v12 = vadd.f32 %v1110_v11, %v862_v13  ;;  %v1497_v14 = vpop.f32.mrf.mxu3  ;;  %v2285_v13 = vshll.u32 %v10531_v51, 16  ;;  %v10543_v11 = vld [vmem:[%s11167_s13 + $0x20] sm:$0xff] }
 0x115   : > { %v816_v16 = vpop.f32.mrf.mxu1 }
 0x116   : > { %v1545_v26 = vadd.f32 %v1497_v14, %v1158_v12  ;;  %v1795_v28 = vpop.f32.mrf.mxu0  ;;  %v863_v47 = vadd.f32 %v816_v16, %v11326_v6  ;;  %v2955_v12 = vrot.slane %v2953_v1, 1  ;;  %v2287_v10 = vrot.slane %v2285_v13, 1 }
 0x118   : > { %v11497_v49 = vadd.f32 %v1793_v63, %v1545_v26  ;;  %v2956_v63 = vshll.u32 %v10555_v55, 16  ;;  %v2636_v26 = vrot.slane %v10543_v11, 1  ;;  %v2289_v55 = vshrl.u32 %v10531_v51, 16 }
 0x11a   : > { %v2958_v14 = vrot.slane %v2956_v63, 2  ;;  %v2291_v8 = vor.u32 %v2289_v55, %v2287_v10 }
 0x11b   : > { %v1112_v45 = vpop.f32.mrf.mxu2 }
 0x11c   : > { %v1159_v48 = vadd.f32 %v1112_v45, %v863_v47  ;;  %v1499_v2 = vpop.f32.mrf.mxu3  ;;  %v2288_v47 = vsel %vm645_vm2, %v2283_v18, %v2287_v10  ;;  %v10557_v10 = vld [vmem:[%s11167_s13 + $0x30] sm:$0xff] }
 0x11d   : > { %v819_v61 = vpop.f32.mrf.mxu1 }
 0x11e   : > { %v1546_v30 = vadd.f32 %v1499_v2, %v1159_v48  ;;  %v1798_v54 = vpop.f32.mrf.mxu0  ;;  %v864_v0 = vadd.f32 %v819_v61, %v11336_v21  ;;  %v2637_v2 = vsel %vm1016_vm3, %v2634_v31, %v2636_v26  ;;  %v10532_v61 = vld [vmem:[%s11167_s13 + $0x28] sm:$0xff] }
 0x120   : > { %9279 = vmatmul.msk.bf16.gmra.mxu1 %vm397_vm1, %v10517_v59  ;;  %9340 = vmatmul.msk.bf16.gmra.mxu2 %vm397_vm1, %v2280_v50  ;;  %v11507_v6 = vadd.f32 %v1795_v28, %v1546_v30  ;;  %v2959_v28 = vor.u32 %v2958_v14, %v2955_v12  ;;  %v2962_v30 = vshrl.u32 %v10556_v58, 16  ;;  %v10519_v14 = vld [vmem:[%s11167_s13 + $0x20] sm:$0xff] }
 0x121   : > { %9401 = vmatmul.msk.bf16.gmra.mxu3 %vm397_vm1, %v2635_v17  ;;  %9462 = vmatmul.msk.bf16.gmra.mxu0 %vm397_vm1, %v2951_v36 }
 0x122   : > { %v2960_v59 = vsel %vm1312_vm4, %v2950_v44, %v2959_v28 }
 0x123   : > { %v1115_v24 = vpop.f32.mrf.mxu2 }
 0x124   : > { %v1160_v3 = vadd.f32 %v1115_v24, %v864_v0  ;;  %v1502_v62 = vpop.f32.mrf.mxu3  ;;  %v2293_v0 = vshll.u32 %v10532_v61, 16  ;;  %v10544_v24 = vld [vmem:[%s11167_s13 + $0x28] sm:$0xff] }
 0x125   : > { %v821_v34 = vpop.f32.mrf.mxu1 }
 0x126   : > { %v1547_v23 = vadd.f32 %v1502_v62, %v1160_v3  ;;  %v1800_v9 = vpop.f32.mrf.mxu0  ;;  %v865_v21 = vadd.f32 %v821_v34, %v11354_v35  ;;  %v2964_v3 = vrot.slane %v2962_v30, 1  ;;  %v2295_v13 = vrot.slane %v2293_v0, 1 }
 0x128   : > { %v11514_v16 = vadd.f32 %v1798_v54, %v1547_v23  ;;  %v2965_v54 = vshll.u32 %v10556_v58, 16  ;;  %v2638_v23 = vrot.slane %v10544_v24, 1  ;;  %v2297_v58 = vshrl.u32 %v10532_v61, 16 }
 0x12a   : > { %v2967_v62 = vrot.slane %v2965_v54, 2  ;;  %v2299_v55 = vor.u32 %v2297_v58, %v2295_v13 }
 0x12b   : > { %v1117_v37 = vpop.f32.mrf.mxu2 }
 0x12c   : > { %v1161_v38 = vadd.f32 %v1117_v37, %v865_v21  ;;  %v1504_v22 = vpop.f32.mrf.mxu3  ;;  %v2296_v21 = vsel %vm645_vm2, %v2291_v8, %v2295_v13  ;;  %v10558_v13 = vld [vmem:[%s11167_s13 + $0x38] sm:$0xff] }
 0x12d   : > { %v824_v27 = vpop.f32.mrf.mxu1 }
 0x12e   : > { %v1548_v45 = vadd.f32 %v1504_v22, %v1161_v38  ;;  %v1803_v48 = vpop.f32.mrf.mxu0  ;;  %v866_v50 = vadd.f32 %v824_v27, %v11294_v41  ;;  %v2639_v22 = vsel %vm1016_vm3, %v2636_v26, %v2638_v23  ;;  %v10533_v27 = vld [vmem:[%s11167_s13 + $0x30] sm:$0xff] }
 0x130   : > { %9280 = vmatmul.msk.bf16.gmra.mxu1 %vm397_vm1, %v10518_v40  ;;  %9341 = vmatmul.msk.bf16.gmra.mxu2 %vm397_vm1, %v2288_v47  ;;  %v11524_v35 = vadd.f32 %v1800_v9, %v1548_v45  ;;  %v2968_v9 = vor.u32 %v2967_v62, %v2964_v3  ;;  %v2971_v45 = vshrl.u32 %v10557_v10, 16  ;;  %v10520_v62 = vld [vmem:[%s11167_s13 + $0x28] sm:$0xff] }
 0x131   : > { %9402 = vmatmul.msk.bf16.gmra.mxu3 %vm397_vm1, %v2637_v2  ;;  %9463 = vmatmul.msk.bf16.gmra.mxu0 %vm397_vm1, %v2960_v59 }
 0x132   : > { %v2969_v40 = vsel %vm1312_vm4, %v2959_v28, %v2968_v9 }
 0x133   : > { %v1120_v31 = vpop.f32.mrf.mxu2 }
 0x134   : > { %v1162_v17 = vadd.f32 %v1120_v31, %v866_v50  ;;  %v1507_v44 = vpop.f32.mrf.mxu3  ;;  %v2301_v50 = vshll.u32 %v10533_v27, 16  ;;  %v10545_v31 = vld [vmem:[%s11167_s13 + $0x30] sm:$0xff] }
 0x135   : > { %v826_v36 = vpop.f32.mrf.mxu1 }
 0x136   : > { %v1549_v1 = vadd.f32 %v1507_v44, %v1162_v17  ;;  %v1805_v63 = vpop.f32.mrf.mxu0  ;;  %v867_v41 = vadd.f32 %v826_v36, %v11304_v56  ;;  %v2973_v17 = vrot.slane %v2971_v45, 1  ;;  %v2303_v0 = vrot.slane %v2301_v50, 1 }
 0x138   : > { %v11531_v34 = vadd.f32 %v1803_v48, %v1549_v1  ;;  %v2974_v48 = vshll.u32 %v10557_v10, 16  ;;  %v2640_v1 = vrot.slane %v10545_v31, 1  ;;  %v2305_v10 = vshrl.u32 %v10533_v27, 16 }
 0x13a   : > { %v2976_v44 = vrot.slane %v2974_v48, 2  ;;  %v2307_v58 = vor.u32 %v2305_v10, %v2303_v0 }
 0x13b   : > { %v1122_v11 = vpop.f32.mrf.mxu2 }
 0x13c   : > { %v1163_v12 = vadd.f32 %v1122_v11, %v867_v41  ;;  %v1509_v51 = vpop.f32.mrf.mxu3  ;;  %v2304_v41 = vsel %vm645_vm2, %v2299_v55, %v2303_v0  ;;  %v10559_v0 = vld [vmem:[%s11167_s13 + $0x40] sm:$0xff] }
 0x13d   : > { %v829_v18 = vpop.f32.mrf.mxu1 }
 0x13e   : > { %v1550_v37 = vadd.f32 %v1509_v51, %v1163_v12  ;;  %v1808_v38 = vpop.f32.mrf.mxu0  ;;  %v868_v47 = vadd.f32 %v829_v18, %v11322_v4  ;;  %v2641_v51 = vsel %vm1016_vm3, %v2638_v23, %v2640_v1  ;;  %v10534_v18 = vld [vmem:[%s11167_s13 + $0x38] sm:$0xff] }
 0x140   : > { %9281 = vmatmul.msk.bf16.gmra.mxu1 %vm397_vm1, %v10519_v14  ;;  %9342 = vmatmul.msk.bf16.gmra.mxu2 %vm397_vm1, %v2296_v21  ;;  %v11541_v56 = vadd.f32 %v1805_v63, %v1550_v37  ;;  %v2977_v63 = vor.u32 %v2976_v44, %v2973_v17  ;;  %v2980_v37 = vshrl.u32 %v10558_v13, 16  ;;  %v10521_v44 = vld [vmem:[%s11167_s13 + $0x30] sm:$0xff] }
 0x141   : > { %9403 = vmatmul.msk.bf16.gmra.mxu3 %vm397_vm1, %v2639_v22  ;;  %9464 = vmatmul.msk.bf16.gmra.mxu0 %vm397_vm1, %v2969_v40 }
 0x142   : > { %v2978_v14 = vsel %vm1312_vm4, %v2968_v9, %v2977_v63 }
 0x143   : > { %v1125_v26 = vpop.f32.mrf.mxu2 }
 0x144   : > { %v1164_v2 = vadd.f32 %v1125_v26, %v868_v47  ;;  %v1512_v28 = vpop.f32.mrf.mxu3  ;;  %v2309_v47 = vshll.u32 %v10534_v18, 16  ;;  %v10546_v26 = vld [vmem:[%s11167_s13 + $0x38] sm:$0xff] }
 0x145   : > { %v831_v59 = vpop.f32.mrf.mxu1 }
 0x146   : > { %v1551_v30 = vadd.f32 %v1512_v28, %v1164_v2  ;;  %v1810_v54 = vpop.f32.mrf.mxu0  ;;  %v869_v4 = vadd.f32 %v831_v59, %v11332_v19  ;;  %v2982_v2 = vrot.slane %v2980_v37, 1  ;;  %v2311_v50 = vrot.slane %v2309_v47, 1 }
 0x148   : > { %v11548_v36 = vadd.f32 %v1808_v38, %v1551_v30  ;;  %v2983_v38 = vshll.u32 %v10558_v13, 16  ;;  %v2642_v30 = vrot.slane %v10546_v26, 1  ;;  %v2313_v13 = vshrl.u32 %v10534_v18, 16 }
 0x14a   : > { %v2985_v28 = vrot.slane %v2983_v38, 2  ;;  %v2315_v10 = vor.u32 %v2313_v13, %v2311_v50 }
 0x14b   : > { %v1127_v24 = vpop.f32.mrf.mxu2 }
 0x14c   : > { %v1165_v3 = vadd.f32 %v1127_v24, %v869_v4  ;;  %v1514_v61 = vpop.f32.mrf.mxu3  ;;  %v2312_v4 = vsel %vm645_vm2, %v2307_v58, %v2311_v50  ;;  %v10560_v50 = vld [vmem:[%s11167_s13 + $0x48] sm:$0xff] }
 0x14d   : > { %v834_v8 = vpop.f32.mrf.mxu1 }
 0x14e   : > { %v1552_v11 = vadd.f32 %v1514_v61, %v1165_v3  ;;  %v1813_v12 = vpop.f32.mrf.mxu0  ;;  %v870_v21 = vadd.f32 %v834_v8, %v11350_v32  ;;  %v2643_v61 = vsel %vm1016_vm3, %v2640_v1, %v2642_v30  ;;  %v10535_v8 = vld [vmem:[%s11167_s13 + $0x40] sm:$0xff] }
 0x150   : > { %9282 = vmatmul.msk.bf16.gmra.mxu1 %vm397_vm1, %v10520_v62  ;;  %9343 = vmatmul.msk.bf16.gmra.mxu2 %vm397_vm1, %v2304_v41  ;;  %v11558_v19 = vadd.f32 %v1810_v54, %v1552_v11  ;;  %v2986_v54 = vor.u32 %v2985_v28, %v2982_v2  ;;  %v2989_v11 = vshrl.u32 %v10559_v0, 16  ;;  %v10522_v28 = vld [vmem:[%s11167_s13 + $0x38] sm:$0xff] }
 0x151   : > { %9404 = vmatmul.msk.bf16.gmra.mxu3 %vm397_vm1, %v2641_v51  ;;  %9465 = vmatmul.msk.bf16.gmra.mxu0 %vm397_vm1, %v2978_v14 }
 0x152   : > { %v2987_v62 = vsel %vm1312_vm4, %v2977_v63, %v2986_v54 }
 0x153   : > { %v1130_v23 = vpop.f32.mrf.mxu2 }
 0x154   : > { %v1166_v22 = vadd.f32 %v1130_v23, %v870_v21  ;;  %v1517_v9 = vpop.f32.mrf.mxu3  ;;  %v2317_v21 = vshll.u32 %v10535_v8, 16  ;;  %v10547_v23 = vld [vmem:[%s11167_s13 + $0x40] sm:$0xff] }
 0x155   : > { %v836_v40 = vpop.f32.mrf.mxu1 }
 0x156   : > { %v1553_v45 = vadd.f32 %v1517_v9, %v1166_v22  ;;  %v1815_v48 = vpop.f32.mrf.mxu0  ;;  %v871_v32 = vadd.f32 %v836_v40, %v11360_v52  ;;  %v2991_v22 = vrot.slane %v2989_v11, 1  ;;  %v2319_v47 = vrot.slane %v2317_v21, 1 }
 0x158   : > { %v11565_v59 = vadd.f32 %v1813_v12, %v1553_v45  ;;  %v2992_v12 = vshll.u32 %v10559_v0, 16  ;;  %v2644_v45 = vrot.slane %v10547_v23, 1  ;;  %v2321_v0 = vshrl.u32 %v10535_v8, 16 }
 0x15a   : > { %v2994_v9 = vrot.slane %v2992_v12, 2  ;;  %v2323_v13 = vor.u32 %v2321_v0, %v2319_v47 }
 0x15b   : > { %v1132_v31 = vpop.f32.mrf.mxu2 }
 0x15c   : > { %v1167_v17 = vadd.f32 %v1132_v31, %v871_v32  ;;  %v1519_v27 = vpop.f32.mrf.mxu3  ;;  %v2320_v32 = vsel %vm645_vm2, %v2315_v10, %v2319_v47  ;;  %v10561_v47 = vld [vmem:[%s11167_s13 + $0x50] sm:$0xff] }
 0x15d   : > { %v839_v55 = vpop.f32.mrf.mxu1 }
 0x15e   : > { %v1554_v24 = vadd.f32 %v1519_v27, %v1167_v17  ;;  %v1818_v3 = vpop.f32.mrf.mxu0  ;;  %v872_v41 = vadd.f32 %v839_v55, %v11296_v42  ;;  %v2645_v27 = vsel %vm1016_vm3, %v2642_v30, %v2644_v45  ;;  %v10536_v55 = vld [vmem:[%s11167_s13 + $0x48] sm:$0xff] }
 0x160   : > { %9283 = vmatmul.msk.bf16.gmra.mxu1 %vm397_vm1, %v10521_v44  ;;  %9344 = vmatmul.msk.bf16.gmra.mxu2 %vm397_vm1, %v2312_v4  ;;  %v11575_v52 = vadd.f32 %v1815_v48, %v1554_v24  ;;  %v2995_v48 = vor.u32 %v2994_v9, %v2991_v22  ;;  %v2998_v24 = vshrl.u32 %v10560_v50, 16  ;;  %v10523_v9 = vld [vmem:[%s11167_s13 + $0x40] sm:$0xff] }
 0x161   : > { %9405 = vmatmul.msk.bf16.gmra.mxu3 %vm397_vm1, %v2643_v61  ;;  %9466 = vmatmul.msk.bf16.gmra.mxu0 %vm397_vm1, %v2987_v62 }
 0x162   : > { %v2996_v44 = vsel %vm1312_vm4, %v2986_v54, %v2995_v48 }
 0x163   : > { %v1135_v1 = vpop.f32.mrf.mxu2 }
 0x164   : > { %v1168_v51 = vadd.f32 %v1135_v1, %v872_v41  ;;  %v1522_v63 = vpop.f32.mrf.mxu3  ;;  %v2325_v41 = vshll.u32 %v10536_v55, 16  ;;  %v10548_v1 = vld [vmem:[%s11167_s13 + $0x48] sm:$0xff] }
 0x165   : > { %v841_v14 = vpop.f32.mrf.mxu1 }
 0x166   : > { %v1555_v37 = vadd.f32 %v1522_v63, %v1168_v51  ;;  %v1820_v38 = vpop.f32.mrf.mxu0  ;;  %v873_v42 = vadd.f32 %v841_v14, %v11306_v57  ;;  %v3000_v51 = vrot.slane %v2998_v24, 1  ;;  %v2327_v21 = vrot.slane %v2325_v41, 1 }
 0x168   : > { %v11582_v40 = vadd.f32 %v1818_v3, %v1555_v37  ;;  %v3001_v3 = vshll.u32 %v10560_v50, 16  ;;  %v2646_v37 = vrot.slane %v10548_v1, 1  ;;  %v2329_v50 = vshrl.u32 %v10536_v55, 16 }
 0x16a   : > { %v3003_v63 = vrot.slane %v3001_v3, 2  ;;  %v2331_v0 = vor.u32 %v2329_v50, %v2327_v21 }
 0x16b   : > { %v1137_v26 = vpop.f32.mrf.mxu2 }
 0x16c   : > { %v1169_v2 = vadd.f32 %v1137_v26, %v873_v42  ;;  %v1524_v18 = vpop.f32.mrf.mxu3  ;;  %v2328_v42 = vsel %vm645_vm2, %v2323_v13, %v2327_v21 }
 0x16d   : > { %v844_v58 = vpop.f32.mrf.mxu1 }
 0x16e   : > { %v1556_v31 = vadd.f32 %v1524_v18, %v1169_v2  ;;  %v1823_v17 = vpop.f32.mrf.mxu0  ;;  %v874_v4 = vadd.f32 %v844_v58, %v11324_v5  ;;  %v2647_v18 = vsel %vm1016_vm3, %v2644_v45, %v2646_v37  ;;  %v10537_v58 = vld [vmem:[%s11167_s13 + $0x50] sm:$0xff] }
 0x170   : > { %9284 = vmatmul.msk.bf16.gmra.mxu1 %vm397_vm1, %v10522_v28  ;;  %9345 = vmatmul.msk.bf16.gmra.mxu2 %vm397_vm1, %v2320_v32  ;;  %v11592_v57 = vadd.f32 %v1820_v38, %v1556_v31  ;;  %v3004_v38 = vor.u32 %v3003_v63, %v3000_v51  ;;  %v3007_v31 = vshrl.u32 %v10561_v47, 16  ;;  %v10524_v63 = vld [vmem:[%s11167_s13 + $0x48] sm:$0xff] }
 0x171   : > { %9406 = vmatmul.msk.bf16.gmra.mxu3 %vm397_vm1, %v2645_v27  ;;  %9467 = vmatmul.msk.bf16.gmra.mxu0 %vm397_vm1, %v2996_v44 }
 0x172   : > { %v3005_v28 = vsel %vm1312_vm4, %v2995_v48, %v3004_v38 }
 0x173   : > { %v1140_v30 = vpop.f32.mrf.mxu2 }
 0x174   : > { %v1170_v61 = vadd.f32 %v1140_v30, %v874_v4  ;;  %v1527_v54 = vpop.f32.mrf.mxu3  ;;  %v2333_v4 = vshll.u32 %v10537_v58, 16  ;;  %v10549_v30 = vld [vmem:[%s11167_s13 + $0x50] sm:$0xff] }
 0x175   : > { %v846_v62 = vpop.f32.mrf.mxu1 }
 0x176   : > { %v1557_v11 = vadd.f32 %v1527_v54, %v1170_v61  ;;  %v1825_v12 = vpop.f32.mrf.mxu0  ;;  %v875_v5 = vadd.f32 %v846_v62, %v11334_v20  ;;  %v3009_v61 = vrot.slane %v3007_v31, 1  ;;  %v2335_v41 = vrot.slane %v2333_v4, 1 }
 0x178   : > { %v11599_v14 = vadd.f32 %v1823_v17, %v1557_v11  ;;  %v3010_v17 = vshll.u32 %v10561_v47, 16  ;;  %v2648_v11 = vrot.slane %v10549_v30, 1 }
 0x17a   : > { %v3012_v54 = vrot.slane %v3010_v17, 2  ;;  %v2649_v21 = vsel %vm1016_vm3, %v2646_v37, %v2648_v11 }
 0x17b   : > { %v1142_v23 = vpop.f32.mrf.mxu2 }
 0x17c   : > { %v1171_v22 = vadd.f32 %v1142_v23, %v875_v5  ;;  %v1529_v8 = vpop.f32.mrf.mxu3  ;;  %v2336_v5 = vsel %vm645_vm2, %v2331_v0, %v2335_v41 }
 0x17d   : > { %v849_v10 = vpop.f32.mrf.mxu1 }
 0x17e   : > { %v1558_v26 = vadd.f32 %v1529_v8, %v1171_v22  ;;  %v1828_v2 = vpop.f32.mrf.mxu0  ;;  %v876_v32 = vadd.f32 %v849_v10, %v11352_v33  ;;  %v10562_v10 = vld [vmem:[%s11167_s13 + $0x58] sm:$0xff] }
 0x180   : > { %9285 = vmatmul.msk.bf16.gmra.mxu1 %vm397_vm1, %v10523_v9  ;;  %9346 = vmatmul.msk.bf16.gmra.mxu2 %vm397_vm1, %v2328_v42  ;;  %v11609_v20 = vadd.f32 %v1825_v12, %v1558_v26  ;;  %v3013_v12 = vor.u32 %v3012_v54, %v3009_v61  ;;  %v10538_v42 = vld [vmem:[%s11167_s13 + $0x58] sm:$0xff]  ;;  %v3016_v26 = vshrl.u32 %v10562_v10, 16  ;;  %v10525_v54 = vld [vmem:[%s11167_s13 + $0x50] sm:$0xff] }
 0x181   : > { %9407 = vmatmul.msk.bf16.gmra.mxu3 %vm397_vm1, %v2647_v18  ;;  %9468 = vmatmul.msk.bf16.gmra.mxu0 %vm397_vm1, %v3005_v28  ;;  %v2341_v47 = vshll.u32 %v10538_v42, 16 }
 0x182   : > { %v3014_v9 = vsel %vm1312_vm4, %v3004_v38, %v3013_v12  ;;  %v2337_v38 = vshrl.u32 %v10537_v58, 16 }
 0x183   : > { %v1145_v45 = vpop.f32.mrf.mxu2  ;;  %v2343_v4 = vrot.slane %v2341_v47, 1 }
 0x184   : > { %v1172_v27 = vadd.f32 %v1145_v45, %v876_v32  ;;  %v1532_v48 = vpop.f32.mrf.mxu3  ;;  %v10550_v45 = vld [vmem:[%s11167_s13 + $0x58] sm:$0xff]  ;;  %v2339_v50 = vor.u32 %v2337_v38, %v2335_v41  ;;  %v10563_v41 = vld [vmem:[%s11167_s13 + $0x60] sm:$0xff] }
 0x185   : > { %v851_v44 = vpop.f32.mrf.mxu1 }
 0x186   : > { %v1559_v24 = vadd.f32 %v1532_v48, %v1172_v27  ;;  %v1830_v3 = vpop.f32.mrf.mxu0  ;;  %v877_v33 = vadd.f32 %v851_v44, %v11362_v53  ;;  %v3018_v27 = vrot.slane %v3016_v26, 1 }
 0x188   : > { %v11616_v62 = vadd.f32 %v1828_v2, %v1559_v24  ;;  %v2650_v24 = vrot.slane %v10550_v45, 1 }
 0x18b   : > { %v1147_v1 = vpop.f32.mrf.mxu2 }
 0x18c   : > { %v1173_v51 = vadd.f32 %v1147_v1, %v877_v33  ;;  %v1534_v55 = vpop.f32.mrf.mxu3  ;;  %v2344_v33 = vsel %vm645_vm2, %v2339_v50, %v2343_v4 }
 0x18d   : > { %v2039_v13 = vpop.f32.mrf.mxu1 }
 0x18e   : > { %v1560_v23 = vadd.f32 %v1534_v55, %v1173_v51  ;;  %v2099_v22 = vadd.f32 %v2039_v13, %v11380_v25  ;;  %v3090_v8 = vpop.f32.mrf.mxu0  ;;  %v3019_v25 = vshll.u32 %v10562_v10, 16  ;;  %v2651_v55 = vsel %vm1016_vm3, %v2648_v11, %v2650_v24  ;;  %v11653_v10 = vld [vmem:[%s11167_s13 + $0x60] sm:$0xff] }
 0x190   : > { %9286 = vmatmul.msk.bf16.gmra.mxu1 %vm397_vm1, %v10524_v63  ;;  %9347 = vmatmul.msk.bf16.gmra.mxu2 %vm397_vm1, %v2336_v5  ;;  %v11627_v53 = vadd.f32 %v1830_v3, %v1560_v23  ;;  %v3021_v48 = vrot.slane %v3019_v25, 2  ;;  %v11649_v5 = vld [vmem:[%s11167_s13 + $0x60] sm:$0xff]  ;;  %v3028_v23 = vshll.u32 %v10563_v41, 16 }
 0x191   : > { %9408 = vmatmul.msk.bf16.gmra.mxu3 %vm397_vm1, %v2649_v21  ;;  %9469 = vmatmul.msk.bf16.gmra.mxu0 %vm397_vm1, %v3014_v9  ;;  %v2345_v21 = vshrl.u32 %v10538_v42, 16  ;;  %v2349_v9 = vshll.u32 %v11649_v5, 16 }
 0x192   : > { %v3022_v3 = vor.u32 %v3021_v48, %v3018_v27 }
 0x193   : > { %v2409_v2 = vpop.f32.mrf.mxu2  ;;  %v2347_v47 = vor.u32 %v2345_v21, %v2343_v4 }
 0x194   : > { %v2469_v18 = vadd.f32 %v2409_v2, %v2099_v22  ;;  %v2704_v37 = vpop.f32.mrf.mxu3  ;;  %v3023_v63 = vsel %vm1312_vm4, %v3013_v12, %v3022_v3 }
 0x195   : > { %v2041_v28 = vpop.f32.mrf.mxu1 }
 0x196   : > { %v2764_v32 = vadd.f32 %v2704_v37, %v2469_v18  ;;  %v2100_v31 = vadd.f32 %v2041_v28, %v11391_v60  ;;  %v3092_v17 = vpop.f32.mrf.mxu0  ;;  %v3030_v37 = vrot.slane %v3028_v23, 2  ;;  %v2836_v28 = vld [vmem:[%s11167_s13 + $0x68] sm:$0x3] }
 0x197   : > { %v2912_v45 = vunpack.c.l.b16 %v2836_v28 }
 0x198   : > { %v11634_v44 = vadd.f32 %v3090_v8, %v2764_v32  ;;  %v2351_v32 = vrot.slane %v2349_v9, 1  ;;  %v2353_v9 = vshrl.u32 %v11649_v5, 16 }
 0x19b   : > { %v2411_v30 = vpop.f32.mrf.mxu2 }
 0x19c   : > { %v2470_v61 = vadd.f32 %v2411_v30, %v2100_v31  ;;  %v2706_v58 = vpop.f32.mrf.mxu3  ;;  %v2652_v31 = vrot.slane %v11653_v10, 1  ;;  %v10526_v30 = vld [vmem:[%s11167_s13 + $0x58] sm:$0xff] }
 0x19d   : > { %v2044_v0 = vpop.f32.mrf.mxu1  ;;  %v10589_v10 = vld [vmem:[%s11167_s13 + $0x18] sm:$0xff] }
 0x19e   : > { %v2765_v60 = vadd.f32 %v2706_v58, %v2470_v61  ;;  %v2101_v1 = vadd.f32 %v2044_v0, %v11407_v15  ;;  %v3095_v51 = vpop.f32.mrf.mxu0  ;;  %v3025_v15 = vshrl.u32 %v10563_v41, 16  ;;  %v2352_v61 = vsel %vm645_vm2, %v2347_v47, %v2351_v32 }
 0x19f   : > { %v2653_v58 = vsel %vm1016_vm3, %v2650_v24, %v2652_v31 }
 0x1a0   : > { %9287 = vmatmul.msk.bf16.gmra.mxu1 %vm397_vm1, %v10525_v54  ;;  %9348 = vmatmul.msk.bf16.gmra.mxu2 %vm397_vm1, %v2344_v33  ;;  %v11644_v13 = vadd.f32 %v3092_v17, %v2765_v60  ;;  %v3027_v18 = vrot.slane %v3025_v15, 1  ;;  %v2171_v17 = vld [vmem:[%s11167_s13 + $0x68] sm:$0x1] }
 0x1a1   : > { %9409 = vmatmul.msk.bf16.gmra.mxu3 %vm397_vm1, %v2651_v55  ;;  %9470 = vmatmul.msk.bf16.gmra.mxu0 %vm397_vm1, %v3023_v63  ;;  %v2247_v4 = vunpack.c.l.b16 %v2171_v17  ;;  %v9717_v17 = vld [vmem:[%s12962_s1 + $0x1a] sm:$0x3] }
 0x1a2   : > { %v11660_v42 = vor.u32 %v3030_v37, %v3027_v18  ;;  %v4691_v5 = vsel %vm434_vm0, %v9717_v17, 0 }
 0x1a3   : > { %v2414_v11 = vpop.f32.mrf.mxu2  ;;  %v2260_v24 = vpack.c.b16 %v2247_v4, %v2247_v4  ;;  %4700 = vmatpush.bf16.msra.mxu1 %v4691_v5 }
 0x1a4   : > { %v2471_v22 = vadd.f32 %v2414_v11, %v2101_v1  ;;  %v2709_v12 = vpop.f32.mrf.mxu3  ;;  %v3032_v60 = vsel %vm1312_vm4, %v3022_v3, %v11660_v42  ;;  %v2541_v1 = vld [vmem:[%s11167_s13 + $0x68] sm:$0x1]  ;;  %v9839_v3 = vld [vmem:[%s12962_s1 + $0x1e] sm:$0x3] }
 0x1a5   : > { %v2046_v8 = vpop.f32.mrf.mxu1  ;;  %v2617_v63 = vunpack.c.l.b16 %v2541_v1  ;;  %v5252_v11 = vsel %vm434_vm0, %v9839_v3, 0  ;;  %v10588_v1 = vld [vmem:[%s11167_s13 + $0x10] sm:$0xff]  ;;  %v9476_v3 = vld [vmem:[%s11167_s13 + $0x8] sm:$0xc] }
 0x1a6   : > { %v2766_v26 = vadd.f32 %v2709_v12, %v2471_v22  ;;  %v2102_v25 = vadd.f32 %v2046_v8, %v11428_v29  ;;  %v3097_v2 = vpop.f32.mrf.mxu0  ;;  %5261 = vmatpush.bf16.msra.mxu3 %v5252_v11 }
 0x1a8   : > { %v11657_v38 = vadd.f32 %v3095_v51, %v2766_v26  ;;  %v2925_v51 = vpack.c.b16 %v2912_v45, %v2912_v45  ;;  %v2357_v26 = vshll.u32 %v2260_v24, 16  ;;  %v9900_v45 = vld [vmem:[%s12962_s1 + $0x20] sm:$0x3] }
 0x1aa   : > { %v3034_v41 = vshrl.u32 %v2925_v51, 16  ;;  %v3037_v15 = vshll.u32 %v2925_v51, 16 }
 0x1ab   : > { %v2416_v27 = vpop.f32.mrf.mxu2 }
 0x1ac   : > { %v2472_v48 = vadd.f32 %v2416_v27, %v2102_v25  ;;  %v2711_v50 = vpop.f32.mrf.mxu3  ;;  %v2630_v25 = vpack.c.b16 %v2617_v63, %v2617_v63  ;;  %v3036_v28 = vrot.slane %v3034_v41, 1  ;;  %v3039_v47 = vrot.slane %v3037_v15, 2  ;;  %v10564_v41 = vld [vmem:[%s11167_s13 + $0x8] sm:$0xf0]  ;;  %v9659_v15 = vld [vmem:[%s11167_s13 + $0x10] sm:$0xe] }
 0x1ad   : > { %v2049_v29 = vpop.f32.mrf.mxu1  ;;  %v5622_v27 = vsel %vm434_vm0, %v9900_v45, 0 }
 0x1ae   : > { %v2767_v54 = vadd.f32 %v2711_v50, %v2472_v48  ;;  %v2103_v0 = vadd.f32 %v2049_v29, %v11450_v39  ;;  %v3100_v33 = vpop.f32.mrf.mxu0  ;;  %v9778_v39 = vld [vmem:[%s12962_s1 + $0x1c] sm:$0x3]  ;;  %5631 = vmatpush.bf16.msra.mxu0 %v5622_v27  ;;  %v2355_v48 = vor.u32 %v2353_v9, %v2351_v32  ;;  %v2359_v50 = vrot.slane %v2357_v26, 1 }
 0x1af   : > { %v4986_v23 = vsel %vm434_vm0, %v9778_v39, 0  ;;  %v3040_v29 = vor.u32 %v3039_v47, %v3036_v28 }
 0x1b0   : > { %9288 = vmatmul.msk.bf16.gmra.mxu1 %vm397_vm1, %v10526_v30  ;;  %9349 = vmatmul.msk.bf16.gmra.mxu2 %vm397_vm1, %v2352_v61  ;;  %v11674_v55 = vadd.f32 %v3097_v2, %v2767_v54  ;;  %v2654_v30 = vrot.slane %v2630_v25, 1  ;;  %v10527_v54 = vld [vmem:[%s11167_s13 + $0x60] sm:$0xff] }
 0x1b1   : > { %9410 = vmatmul.msk.bf16.gmra.mxu3 %vm397_vm1, %v2653_v58  ;;  %9471 = vmatmul.msk.bf16.gmra.mxu0 %vm397_vm1, %v3032_v60  ;;  %v2360_v60 = vsel %vm645_vm2, %v2355_v48, %v2359_v50  ;;  %v3041_v63 = vsel %vm1312_vm4, %v11660_v42, %v3040_v29 }
 0x1b2   : > { %4995 = vmatpush.bf16.msra.mxu2 %v4986_v23  ;;  %v2655_v24 = vsel %vm1016_vm3, %v2652_v31, %v2654_v30  ;;  %v10600_v23 = vld [vmem:[%s11167_s13 + $0x10] sm:$0xf0] }
 0x1b3   : > { %v2419_v22 = vpop.f32.mrf.mxu2  ;;  %v9660_v28 = vor.u32 %v10600_v23, %v9659_v15  ;;  %v3885_v23 = vshrl.u32 %v10589_v10, 16 }
 0x1b4   : > { %v2473_v12 = vadd.f32 %v2419_v22, %v2103_v0  ;;  %v2714_v8 = vpop.f32.mrf.mxu3 }
 0x1b5   : > { %v2051_v21 = vpop.f32.mrf.mxu1  ;;  %v4243_v48 = vrot.slane %v9660_v28, 1 }
 0x1b6   : > { %v2768_v2 = vadd.f32 %v2714_v8, %v2473_v12  ;;  %v2104_v18 = vadd.f32 %v2051_v21, %v11467_v7  ;;  %v3102_v37 = vpop.f32.mrf.mxu0  ;;  %v10565_v12 = vld [vmem:[%s11167_s13 + $0x10] sm:$0xff]  ;;  %v9477_v8 = vor.u32 %v10564_v41, %v9476_v3  ;;  %v3874_v21 = vshrl.u32 %v10588_v1, 16  ;;  %v10566_v3 = vld [vmem:[%s11167_s13 + $0x18] sm:$0xff] }
 0x1b7   : > { %v3313_v45 = vrot.slane %v10565_v12, 2  ;;  %v3315_v12 = vrot.slane %v10566_v3, 2 }
 0x1b8   : > { %v11696_v7 = vadd.f32 %v3100_v33, %v2768_v2  ;;  %v3312_v17 = vrot.slane %v9477_v8, 2 }
 0x1b9   : > { %v3316_v28 = vsel %vm1699_vm5, %v3313_v45, %v3315_v12 }
 0x1bb   : > { %v2421_v61 = vpop.f32.mrf.mxu2 }
 0x1bc   : > { %v2474_v58 = vadd.f32 %v2421_v61, %v2104_v18  ;;  %v2716_v4 = vpop.f32.mrf.mxu3  ;;  %v3881_v18 = vshll.u32 %v10589_v10, 16 }
 0x1bd   : > { %v2054_v0 = vpop.f32.mrf.mxu1 }
 0x1be   : > { %v2769_v51 = vadd.f32 %v2716_v4, %v2474_v58  ;;  %v2105_v33 = vadd.f32 %v2054_v0, %v11479_v46  ;;  %v3105_v32 = vpop.f32.mrf.mxu0  ;;  %v3876_v46 = vshll.u32 %v10588_v1, 16  ;;  %v3883_v27 = vrot.slane %v3881_v18, 1  ;;  %v10576_v58 = vld [vmem:[%s11167_s13 + $0x10] sm:$0xff]  ;;  %v10577_v18 = vld [vmem:[%s11167_s13 + $0x18] sm:$0xff] }
 0x1c0   : > { %9289 = vmatmul.msk.bf16.gmra.mxu1 %vm397_vm1, %v10527_v54  ;;  %9350 = vmatmul.msk.bf16.gmra.mxu2 %vm397_vm1, %v2360_v60  ;;  %v11709_v39 = vadd.f32 %v3102_v37, %v2769_v51  ;;  %v3878_v9 = vrot.slane %v3876_v46, 1  ;;  %v10601_v37 = vld [vmem:[%s11167_s13 + $0x18] sm:$0xff]  ;;  %v3887_v8 = vor.u32 %v3885_v23, %v3883_v27 }
 0x1c1   : > { %9411 = vmatmul.msk.bf16.gmra.mxu3 %vm397_vm1, %v2655_v24  ;;  %9472 = vmatmul.msk.bf16.gmra.mxu0 %vm397_vm1, %v3041_v63  ;;  %v4244_v50 = vrot.slane %v10601_v37, 1 }
 0x1c2   : > { %v3879_v5 = vor.u32 %v3878_v9, %v3874_v21 }
 0x1c3   : > { %v2424_v31 = vpop.f32.mrf.mxu2  ;;  %v4245_v51 = vsel %vm1016_vm3, %v4243_v48, %v4244_v50 }
 0x1c4   : > { %v2475_v42 = vadd.f32 %v2424_v31, %v2105_v33  ;;  %v2719_v11 = vpop.f32.mrf.mxu3  ;;  %v3884_v1 = vsel %vm645_vm2, %v3879_v5, %v3883_v27 }
 0x1c5   : > { %v2056_v22 = vpop.f32.mrf.mxu1 }
 0x1c6   : > { %v2770_v26 = vadd.f32 %v2719_v11, %v2475_v42  ;;  %v2106_v25 = vadd.f32 %v2056_v22, %v11489_v43  ;;  %v3107_v2 = vpop.f32.mrf.mxu0  ;;  %v3314_v43 = vsel %vm1699_vm5, %v3312_v17, %v3313_v45  ;;  %v10602_v11 = vld [vmem:[%s11167_s13 + $0x20] sm:$0xff]  ;;  %v10591_v45 = vld [vmem:[%s11167_s13 + $0x28] sm:$0xff] }
 0x1c7   : > { %v4246_v9 = vrot.slane %v10602_v11, 1 }
 0x1c8   : > { %v11721_v47 = vadd.f32 %v3105_v32, %v2770_v26  ;;  %v10590_v32 = vld [vmem:[%s11167_s13 + $0x20] sm:$0xff] }
 0x1c9   : > { %v3889_v42 = vshll.u32 %v10590_v32, 16  ;;  %v4247_v48 = vsel %vm1016_vm3, %v4244_v50, %v4246_v9 }
 0x1cb   : > { %v2426_v30 = vpop.f32.mrf.mxu2  ;;  %v3891_v21 = vrot.slane %v3889_v42, 1 }
 0x1cc   : > { %v2476_v29 = vadd.f32 %v2426_v30, %v2106_v25  ;;  %v2721_v61 = vpop.f32.mrf.mxu3 }
 0x1cd   : > { %v2059_v4 = vpop.f32.mrf.mxu1  ;;  %v3892_v5 = vsel %vm645_vm2, %v3887_v8, %v3891_v21 }
 0x1ce   : > { %v2771_v54 = vadd.f32 %v2721_v61, %v2476_v29  ;;  %v2107_v0 = vadd.f32 %v2059_v4, %v11497_v49  ;;  %v3110_v60 = vpop.f32.mrf.mxu0 }
 0x1d0   : > { %9522 = vmatmul.msk.bf16.vlgmr.msrb.gmra.mxu1 %vm397_vm1, %v3314_v43  ;;  %9583 = vmatmul.msk.bf16.vlgmr.msrb.gmra.mxu2 %vm397_vm1, %v10576_v58  ;;  %v11730_v33 = vadd.f32 %v3107_v2, %v2771_v54  ;;  %v10567_v58 = vld [vmem:[%s11167_s13 + $0x20] sm:$0xff]  ;;  %v3893_v54 = vshrl.u32 %v10590_v32, 16 }
 0x1d1   : > { %9644 = vmatmul.msk.bf16.vlgmr.msrb.gmra.mxu3 %vm397_vm1, %v3884_v1  ;;  %9705 = vmatmul.msk.bf16.vlgmr.msrb.gmra.mxu0 %vm397_vm1, %v4245_v51  ;;  %v3317_v51 = vrot.slane %v10567_v58, 2 }
 0x1d3   : > { %v2429_v24 = vpop.f32.mrf.mxu2  ;;  %v3318_v23 = vsel %vm1699_vm5, %v3315_v12, %v3317_v51  ;;  %v10592_v12 = vld [vmem:[%s11167_s13 + $0x30] sm:$0xff] }
 0x1d4   : > { %v2477_v63 = vadd.f32 %v2429_v24, %v2107_v0  ;;  %v2724_v49 = vpop.f32.mrf.mxu3  ;;  %v3897_v0 = vshll.u32 %v10591_v45, 16  ;;  %v3895_v24 = vor.u32 %v3893_v54, %v3891_v21 }
 0x1d5   : > { %v2061_v46 = vpop.f32.mrf.mxu1 }
 0x1d6   : > { %v2772_v41 = vadd.f32 %v2724_v49, %v2477_v63  ;;  %v2108_v31 = vadd.f32 %v2061_v46, %v11507_v6  ;;  %v3112_v15 = vpop.f32.mrf.mxu0  ;;  %v3899_v63 = vrot.slane %v3897_v0, 1 }
 0x1d8   : > { %v11738_v22 = vadd.f32 %v3110_v60, %v2772_v41  ;;  %v10603_v60 = vld [vmem:[%s11167_s13 + $0x28] sm:$0xff]  ;;  %v3900_v11 = vsel %vm645_vm2, %v3895_v24, %v3899_v63 }
 0x1d9   : > { %v4248_v49 = vrot.slane %v10603_v60, 1 }
 0x1db   : > { %v2431_v26 = vpop.f32.mrf.mxu2  ;;  %v4249_v8 = vsel %vm1016_vm3, %v4246_v9, %v4248_v49 }
 0x1dc   : > { %v2478_v25 = vadd.f32 %v2431_v26, %v2108_v31  ;;  %v2726_v2 = vpop.f32.mrf.mxu3  ;;  %v10578_v31 = vld [vmem:[%s11167_s13 + $0x20] sm:$0xff] }
 0x1dd   : > { %v2064_v37 = vpop.f32.mrf.mxu1 }
 0x1de   : > { %v2773_v6 = vadd.f32 %v2726_v2, %v2478_v25  ;;  %v2109_v10 = vadd.f32 %v2064_v37, %v11514_v16  ;;  %v3115_v17 = vpop.f32.mrf.mxu0 }
 0x1e0   : > { %9523 = vmatmul.msk.bf16.gmra.mxu1 %vm397_vm1, %v3316_v28  ;;  %9584 = vmatmul.msk.bf16.gmra.mxu2 %vm397_vm1, %v10577_v18  ;;  %v11747_v27 = vadd.f32 %v3112_v15, %v2773_v6  ;;  %v10568_v18 = vld [vmem:[%s11167_s13 + $0x28] sm:$0xff]  ;;  %v3901_v6 = vshrl.u32 %v10591_v45, 16 }
 0x1e1   : > { %9645 = vmatmul.msk.bf16.gmra.mxu3 %vm397_vm1, %v3892_v5  ;;  %9706 = vmatmul.msk.bf16.gmra.mxu0 %vm397_vm1, %v4247_v48  ;;  %v3319_v48 = vrot.slane %v10568_v18, 2 }
 0x1e3   : > { %v2434_v30 = vpop.f32.mrf.mxu2  ;;  %v3320_v54 = vsel %vm1699_vm5, %v3317_v51, %v3319_v48  ;;  %v10593_v51 = vld [vmem:[%s11167_s13 + $0x38] sm:$0xff] }
 0x1e4   : > { %v2479_v29 = vadd.f32 %v2434_v30, %v2109_v10  ;;  %v2729_v16 = vpop.f32.mrf.mxu3  ;;  %v3905_v10 = vshll.u32 %v10592_v12, 16  ;;  %v3903_v30 = vor.u32 %v3901_v6, %v3899_v63 }
 0x1e5   : > { %v2066_v61 = vpop.f32.mrf.mxu1 }
 0x1e6   : > { %v2774_v4 = vadd.f32 %v2729_v16, %v2479_v29  ;;  %v2110_v50 = vadd.f32 %v2066_v61, %v11524_v35  ;;  %v3117_v43 = vpop.f32.mrf.mxu0  ;;  %v3907_v29 = vrot.slane %v3905_v10, 1 }
 0x1e8   : > { %v11755_v1 = vadd.f32 %v3115_v17, %v2774_v4  ;;  %v10604_v17 = vld [vmem:[%s11167_s13 + $0x30] sm:$0xff]  ;;  %v3908_v60 = vsel %vm645_vm2, %v3903_v30, %v3907_v29 }
 0x1e9   : > { %v4250_v16 = vrot.slane %v10604_v17, 1 }
 0x1eb   : > { %v2436_v46 = vpop.f32.mrf.mxu2  ;;  %v4251_v24 = vsel %vm1016_vm3, %v4248_v49, %v4250_v16 }
 0x1ec   : > { %v2480_v3 = vadd.f32 %v2436_v46, %v2110_v50  ;;  %v2731_v41 = vpop.f32.mrf.mxu3  ;;  %v10579_v50 = vld [vmem:[%s11167_s13 + $0x28] sm:$0xff] }
 0x1ed   : > { %v2069_v15 = vpop.f32.mrf.mxu1 }
 0x1ee   : > { %v2775_v35 = vadd.f32 %v2731_v41, %v2480_v3  ;;  %v2111_v32 = vadd.f32 %v2069_v15, %v11531_v34  ;;  %v3120_v42 = vpop.f32.mrf.mxu0 }
 0x1f0   : > { %9524 = vmatmul.msk.bf16.gmra.mxu1 %vm397_vm1, %v3318_v23  ;;  %9585 = vmatmul.msk.bf16.gmra.mxu2 %vm397_vm1, %v10578_v31  ;;  %v11764_v21 = vadd.f32 %v3117_v43, %v2775_v35  ;;  %v10569_v31 = vld [vmem:[%s11167_s13 + $0x30] sm:$0xff]  ;;  %v3909_v35 = vshrl.u32 %v10592_v12, 16 }
 0x1f1   : > { %9646 = vmatmul.msk.bf16.gmra.mxu3 %vm397_vm1, %v3900_v11  ;;  %9707 = vmatmul.msk.bf16.gmra.mxu0 %vm397_vm1, %v4249_v8  ;;  %v3321_v8 = vrot.slane %v10569_v31, 2 }
 0x1f3   : > { %v2439_v26 = vpop.f32.mrf.mxu2  ;;  %v3322_v6 = vsel %vm1699_vm5, %v3319_v48, %v3321_v8  ;;  %v10594_v48 = vld [vmem:[%s11167_s13 + $0x40] sm:$0xff] }
 0x1f4   : > { %v2481_v25 = vadd.f32 %v2439_v26, %v2111_v32  ;;  %v2734_v34 = vpop.f32.mrf.mxu3  ;;  %v3913_v32 = vshll.u32 %v10593_v51, 16  ;;  %v3911_v26 = vor.u32 %v3909_v35, %v3907_v29 }
 0x1f5   : > { %v2071_v2 = vpop.f32.mrf.mxu1 }
 0x1f6   : > { %v2776_v37 = vadd.f32 %v2734_v34, %v2481_v25  ;;  %v2112_v9 = vadd.f32 %v2071_v2, %v11541_v56  ;;  %v3122_v28 = vpop.f32.mrf.mxu0  ;;  %v3915_v25 = vrot.slane %v3913_v32, 1 }
 0x1f8   : > { %v11772_v5 = vadd.f32 %v3120_v42, %v2776_v37  ;;  %v10605_v42 = vld [vmem:[%s11167_s13 + $0x38] sm:$0xff]  ;;  %v3916_v17 = vsel %vm645_vm2, %v3911_v26, %v3915_v25 }
 0x1f9   : > { %v4252_v34 = vrot.slane %v10605_v42, 1 }
 0x1fb   : > { %v2441_v61 = vpop.f32.mrf.mxu2  ;;  %v4253_v30 = vsel %vm1016_vm3, %v4250_v16, %v4252_v34 }
 0x1fc   : > { %v2482_v58 = vadd.f32 %v2441_v61, %v2112_v9  ;;  %v2736_v4 = vpop.f32.mrf.mxu3  ;;  %v10580_v9 = vld [vmem:[%s11167_s13 + $0x30] sm:$0xff] }
 0x1fd   : > { %v2074_v43 = vpop.f32.mrf.mxu1 }
 0x1fe   : > { %v2777_v56 = vadd.f32 %v2736_v4, %v2482_v58  ;;  %v2113_v45 = vadd.f32 %v2074_v43, %v11548_v36  ;;  %v3125_v0 = vpop.f32.mrf.mxu0 }
 0x200   : > { %9525 = vmatmul.msk.bf16.gmra.mxu1 %vm397_vm1, %v3320_v54  ;;  %9586 = vmatmul.msk.bf16.gmra.mxu2 %vm397_vm1, %v10579_v50  ;;  %v11781_v63 = vadd.f32 %v3122_v28, %v2777_v56  ;;  %v10570_v50 = vld [vmem:[%s11167_s13 + $0x38] sm:$0xff]  ;;  %v3917_v56 = vshrl.u32 %v10593_v51, 16 }
 0x201   : > { %9647 = vmatmul.msk.bf16.gmra.mxu3 %vm397_vm1, %v3908_v60  ;;  %9708 = vmatmul.msk.bf16.gmra.mxu0 %vm397_vm1, %v4251_v24  ;;  %v3323_v24 = vrot.slane %v10570_v50, 2 }
 0x203   : > { %v2444_v46 = vpop.f32.mrf.mxu2  ;;  %v3324_v35 = vsel %vm1699_vm5, %v3321_v8, %v3323_v24  ;;  %v10595_v8 = vld [vmem:[%s11167_s13 + $0x48] sm:$0xff] }
 0x204   : > { %v2483_v3 = vadd.f32 %v2444_v46, %v2113_v45  ;;  %v2739_v36 = vpop.f32.mrf.mxu3  ;;  %v3921_v45 = vshll.u32 %v10594_v48, 16  ;;  %v3919_v46 = vor.u32 %v3917_v56, %v3915_v25 }
 0x205   : > { %v2076_v41 = vpop.f32.mrf.mxu1 }
 0x206   : > { %v2778_v15 = vadd.f32 %v2739_v36, %v2483_v3  ;;  %v2114_v49 = vadd.f32 %v2076_v41, %v11558_v19  ;;  %v3127_v23 = vpop.f32.mrf.mxu0  ;;  %v3923_v3 = vrot.slane %v3921_v45, 1 }
 0x208   : > { %v11789_v11 = vadd.f32 %v3125_v0, %v2778_v15  ;;  %v10606_v0 = vld [vmem:[%s11167_s13 + $0x40] sm:$0xff]  ;;  %v3924_v42 = vsel %vm645_vm2, %v3919_v46, %v3923_v3 }
 0x209   : > { %v4254_v36 = vrot.slane %v10606_v0, 1 }
 0x20b   : > { %v2446_v2 = vpop.f32.mrf.mxu2  ;;  %v4255_v26 = vsel %vm1016_vm3, %v4252_v34, %v4254_v36 }
 0x20c   : > { %v2484_v18 = vadd.f32 %v2446_v2, %v2114_v49  ;;  %v2741_v37 = vpop.f32.mrf.mxu3  ;;  %v10581_v49 = vld [vmem:[%s11167_s13 + $0x38] sm:$0xff] }
 0x20d   : > { %v2079_v28 = vpop.f32.mrf.mxu1 }
 0x20e   : > { %v2779_v19 = vadd.f32 %v2741_v37, %v2484_v18  ;;  %v2115_v12 = vadd.f32 %v2079_v28, %v11565_v59  ;;  %v3130_v10 = vpop.f32.mrf.mxu0 }
 0x210   : > { %9526 = vmatmul.msk.bf16.gmra.mxu1 %vm397_vm1, %v3322_v6  ;;  %9587 = vmatmul.msk.bf16.gmra.mxu2 %vm397_vm1, %v10580_v9  ;;  %v11798_v29 = vadd.f32 %v3127_v23, %v2779_v19  ;;  %v10571_v9 = vld [vmem:[%s11167_s13 + $0x40] sm:$0xff]  ;;  %v3925_v19 = vshrl.u32 %v10594_v48, 16 }
 0x211   : > { %9648 = vmatmul.msk.bf16.gmra.mxu3 %vm397_vm1, %v3916_v17  ;;  %9709 = vmatmul.msk.bf16.gmra.mxu0 %vm397_vm1, %v4253_v30  ;;  %v3325_v30 = vrot.slane %v10571_v9, 2 }
 0x213   : > { %v2449_v61 = vpop.f32.mrf.mxu2  ;;  %v3326_v56 = vsel %vm1699_vm5, %v3323_v24, %v3325_v30  ;;  %v10596_v24 = vld [vmem:[%s11167_s13 + $0x50] sm:$0xff] }
 0x214   : > { %v2485_v58 = vadd.f32 %v2449_v61, %v2115_v12  ;;  %v2744_v59 = vpop.f32.mrf.mxu3  ;;  %v3929_v12 = vshll.u32 %v10595_v8, 16  ;;  %v3927_v61 = vor.u32 %v3925_v19, %v3923_v3 }
 0x215   : > { %v2081_v4 = vpop.f32.mrf.mxu1 }
 0x216   : > { %v2780_v43 = vadd.f32 %v2744_v59, %v2485_v58  ;;  %v2116_v16 = vadd.f32 %v2081_v4, %v11575_v52  ;;  %v3132_v54 = vpop.f32.mrf.mxu0  ;;  %v3931_v58 = vrot.slane %v3929_v12, 1 }
 0x218   : > { %v11806_v60 = vadd.f32 %v3130_v10, %v2780_v43  ;;  %v10607_v10 = vld [vmem:[%s11167_s13 + $0x48] sm:$0xff]  ;;  %v3932_v0 = vsel %vm645_vm2, %v3927_v61, %v3931_v58 }
 0x219   : > { %v4256_v59 = vrot.slane %v10607_v10, 1 }
 0x21b   : > { %v2451_v41 = vpop.f32.mrf.mxu2  ;;  %v4257_v46 = vsel %vm1016_vm3, %v4254_v36, %v4256_v59 }
 0x21c   : > { %v2486_v31 = vadd.f32 %v2451_v41, %v2116_v16  ;;  %v2746_v15 = vpop.f32.mrf.mxu3  ;;  %v10582_v16 = vld [vmem:[%s11167_s13 + $0x40] sm:$0xff] }
 0x21d   : > { %v2084_v23 = vpop.f32.mrf.mxu1 }
 0x21e   : > { %v2781_v52 = vadd.f32 %v2746_v15, %v2486_v31  ;;  %v2117_v51 = vadd.f32 %v2084_v23, %v11582_v40  ;;  %v3135_v32 = vpop.f32.mrf.mxu0 }
 0x220   : > { %9527 = vmatmul.msk.bf16.gmra.mxu1 %vm397_vm1, %v3324_v35  ;;  %9588 = vmatmul.msk.bf16.gmra.mxu2 %vm397_vm1, %v10581_v49  ;;  %v11815_v25 = vadd.f32 %v3132_v54, %v2781_v52  ;;  %v10572_v49 = vld [vmem:[%s11167_s13 + $0x48] sm:$0xff]  ;;  %v3933_v52 = vshrl.u32 %v10595_v8, 16 }
 0x221   : > { %9649 = vmatmul.msk.bf16.gmra.mxu3 %vm397_vm1, %v3924_v42  ;;  %9710 = vmatmul.msk.bf16.gmra.mxu0 %vm397_vm1, %v4255_v26  ;;  %v3327_v26 = vrot.slane %v10572_v49, 2 }
 0x223   : > { %v2454_v2 = vpop.f32.mrf.mxu2  ;;  %v3328_v19 = vsel %vm1699_vm5, %v3325_v30, %v3327_v26  ;;  %v10597_v30 = vld [vmem:[%s11167_s13 + $0x58] sm:$0xff] }
 0x224   : > { %v2487_v18 = vadd.f32 %v2454_v2, %v2117_v51  ;;  %v2749_v40 = vpop.f32.mrf.mxu3  ;;  %v3937_v51 = vshll.u32 %v10596_v24, 16  ;;  %v3935_v2 = vor.u32 %v3933_v52, %v3931_v58 }
 0x225   : > { %v2086_v37 = vpop.f32.mrf.mxu1 }
 0x226   : > { %v2782_v28 = vadd.f32 %v2749_v40, %v2487_v18  ;;  %v2118_v34 = vadd.f32 %v2086_v37, %v11592_v57  ;;  %v3137_v6 = vpop.f32.mrf.mxu0  ;;  %v3939_v18 = vrot.slane %v3937_v51, 1 }
 0x228   : > { %v11823_v17 = vadd.f32 %v3135_v32, %v2782_v28  ;;  %v10608_v32 = vld [vmem:[%s11167_s13 + $0x50] sm:$0xff]  ;;  %v3940_v10 = vsel %vm645_vm2, %v3935_v2, %v3939_v18 }
 0x229   : > { %v4258_v40 = vrot.slane %v10608_v32, 1 }
 0x22b   : > { %v2456_v4 = vpop.f32.mrf.mxu2  ;;  %v4259_v61 = vsel %vm1016_vm3, %v4256_v59, %v4258_v40 }
 0x22c   : > { %v2488_v50 = vadd.f32 %v2456_v4, %v2118_v34  ;;  %v2751_v43 = vpop.f32.mrf.mxu3  ;;  %v10583_v34 = vld [vmem:[%s11167_s13 + $0x48] sm:$0xff] }
 0x22d   : > { %v2089_v54 = vpop.f32.mrf.mxu1 }
 0x22e   : > { %v2783_v57 = vadd.f32 %v2751_v43, %v2488_v50  ;;  %v2119_v48 = vadd.f32 %v2089_v54, %v11599_v14  ;;  %v3140_v45 = vpop.f32.mrf.mxu0 }
 0x230   : > { %9528 = vmatmul.msk.bf16.gmra.mxu1 %vm397_vm1, %v3326_v56  ;;  %9589 = vmatmul.msk.bf16.gmra.mxu2 %vm397_vm1, %v10582_v16  ;;  %v11832_v3 = vadd.f32 %v3137_v6, %v2783_v57  ;;  %v10573_v16 = vld [vmem:[%s11167_s13 + $0x50] sm:$0xff]  ;;  %v3941_v57 = vshrl.u32 %v10596_v24, 16 }
 0x231   : > { %9650 = vmatmul.msk.bf16.gmra.mxu3 %vm397_vm1, %v3932_v0  ;;  %9711 = vmatmul.msk.bf16.gmra.mxu0 %vm397_vm1, %v4257_v46  ;;  %v3329_v46 = vrot.slane %v10573_v16, 2 }
 0x233   : > { %v2459_v41 = vpop.f32.mrf.mxu2  ;;  %v3330_v52 = vsel %vm1699_vm5, %v3327_v26, %v3329_v46  ;;  %v10598_v26 = vld [vmem:[%s11167_s13 + $0x60] sm:$0xff] }
 0x234   : > { %v2489_v31 = vadd.f32 %v2459_v41, %v2119_v48  ;;  %v2754_v14 = vpop.f32.mrf.mxu3  ;;  %v3945_v48 = vshll.u32 %v10597_v30, 16  ;;  %v3943_v41 = vor.u32 %v3941_v57, %v3939_v18 }
 0x235   : > { %v2091_v15 = vpop.f32.mrf.mxu1 }
 0x236   : > { %v2784_v23 = vadd.f32 %v2754_v14, %v2489_v31  ;;  %v2120_v36 = vadd.f32 %v2091_v15, %v11609_v20  ;;  %v3142_v35 = vpop.f32.mrf.mxu0  ;;  %v3947_v31 = vrot.slane %v3945_v48, 1 }
 0x238   : > { %v11840_v42 = vadd.f32 %v3140_v45, %v2784_v23  ;;  %v10609_v45 = vld [vmem:[%s11167_s13 + $0x58] sm:$0xff]  ;;  %v3948_v32 = vsel %vm645_vm2, %v3943_v41, %v3947_v31 }
 0x239   : > { %v4260_v14 = vrot.slane %v10609_v45, 1 }
 0x23b   : > { %v2461_v37 = vpop.f32.mrf.mxu2  ;;  %v4261_v2 = vsel %vm1016_vm3, %v4258_v40, %v4260_v14 }
 0x23c   : > { %v2490_v9 = vadd.f32 %v2461_v37, %v2120_v36  ;;  %v2756_v28 = vpop.f32.mrf.mxu3  ;;  %v10584_v36 = vld [vmem:[%s11167_s13 + $0x50] sm:$0xff] }
 0x23d   : > { %v2094_v6 = vpop.f32.mrf.mxu1 }
 0x23e   : > { %v2785_v20 = vadd.f32 %v2756_v28, %v2490_v9  ;;  %v2121_v8 = vadd.f32 %v2094_v6, %v11616_v62  ;;  %v3145_v12 = vpop.f32.mrf.mxu0 }
 0x240   : > { %9529 = vmatmul.msk.bf16.gmra.mxu1 %vm397_vm1, %v3328_v19  ;;  %9590 = vmatmul.msk.bf16.gmra.mxu2 %vm397_vm1, %v10583_v34  ;;  %v11849_v58 = vadd.f32 %v3142_v35, %v2785_v20  ;;  %v10574_v34 = vld [vmem:[%s11167_s13 + $0x58] sm:$0xff]  ;;  %v3949_v20 = vshrl.u32 %v10597_v30, 16 }
 0x241   : > { %9651 = vmatmul.msk.bf16.gmra.mxu3 %vm397_vm1, %v3940_v10  ;;  %9712 = vmatmul.msk.bf16.gmra.mxu0 %vm397_vm1, %v4259_v61  ;;  %v3331_v61 = vrot.slane %v10574_v34, 2 }
 0x243   : > { %v2464_v4 = vpop.f32.mrf.mxu2  ;;  %v3332_v57 = vsel %vm1699_vm5, %v3329_v46, %v3331_v61  ;;  %v11888_v46 = vld [vmem:[%s11167_s13 + $0x68] sm:$0xff] }
 0x244   : > { %v2491_v50 = vadd.f32 %v2464_v4, %v2121_v8  ;;  %v2759_v62 = vpop.f32.mrf.mxu3  ;;  %v3953_v8 = vshll.u32 %v10598_v26, 16  ;;  %v3951_v4 = vor.u32 %v3949_v20, %v3947_v31 }
 0x245   : > { %v2096_v43 = vpop.f32.mrf.mxu1 }
 0x246   : > { %v2786_v54 = vadd.f32 %v2759_v62, %v2491_v50  ;;  %v2122_v59 = vadd.f32 %v2096_v43, %v11627_v53  ;;  %v3147_v56 = vpop.f32.mrf.mxu0  ;;  %v3955_v50 = vrot.slane %v3953_v8, 1 }
 0x248   : > { %v11857_v0 = vadd.f32 %v3145_v12, %v2786_v54  ;;  %v10610_v12 = vld [vmem:[%s11167_s13 + $0x60] sm:$0xff]  ;;  %v3956_v45 = vsel %vm645_vm2, %v3951_v4, %v3955_v50 }
 0x249   : > { %v4262_v62 = vrot.slane %v10610_v12, 1 }
 0x24b   : > { %v2466_v15 = vpop.f32.mrf.mxu2  ;;  %v4263_v41 = vsel %vm1016_vm3, %v4260_v14, %v4262_v62  ;;  %v3957_v14 = vshrl.u32 %v10598_v26, 16  ;;  %v3783_v26 = vld [vmem:[%s11167_s13 + $0x70] sm:$0x1] }
 0x24c   : > { %v2492_v49 = vadd.f32 %v2466_v15, %v2122_v59  ;;  %v2761_v23 = vpop.f32.mrf.mxu3  ;;  %v10585_v59 = vld [vmem:[%s11167_s13 + $0x58] sm:$0xff] }
 0x24d   : > { %v3385_v35 = vpop.f32.mrf.mxu1 }
 0x24e   : > { %v2787_v53 = vadd.f32 %v2761_v23, %v2492_v49  ;;  %v3445_v24 = vadd.f32 %v3385_v35, %v11634_v44  ;;  %v4316_v51 = vpop.f32.mrf.mxu0  ;;  %v3961_v35 = vshll.u32 %v11888_v46, 16 }
 0x250   : > { %9530 = vmatmul.msk.bf16.gmra.mxu1 %vm397_vm1, %v3330_v52  ;;  %9591 = vmatmul.msk.bf16.gmra.mxu2 %vm397_vm1, %v10584_v36  ;;  %v11866_v18 = vadd.f32 %v3147_v56, %v2787_v53  ;;  %v11891_v36 = vld [vmem:[%s11167_s13 + $0x60] sm:$0xff] }
 0x251   : > { %9652 = vmatmul.msk.bf16.gmra.mxu3 %vm397_vm1, %v3948_v32  ;;  %9713 = vmatmul.msk.bf16.gmra.mxu0 %vm397_vm1, %v4261_v2  ;;  %v3333_v2 = vrot.slane %v11891_v36, 2 }
 0x253   : > { %v3651_v37 = vpop.f32.mrf.mxu2 }
 0x254   : > { %v3711_v9 = vadd.f32 %v3651_v37, %v3445_v24  ;;  %v4021_v44 = vpop.f32.mrf.mxu3  ;;  %v3959_v37 = vor.u32 %v3957_v14, %v3955_v50 }
 0x255   : > { %v3387_v28 = vpop.f32.mrf.mxu1 }
 0x256   : > { %v4081_v6 = vadd.f32 %v4021_v44, %v3711_v9  ;;  %v3446_v40 = vadd.f32 %v3387_v28, %v11644_v13  ;;  %v4318_v19 = vpop.f32.mrf.mxu0  ;;  %v3963_v9 = vrot.slane %v3961_v35, 1 }
 0x258   : > { %v11874_v10 = vadd.f32 %v4316_v51, %v4081_v6  ;;  %v11896_v51 = vld [vmem:[%s11167_s13 + $0x68] sm:$0xff]  ;;  %v3964_v20 = vsel %vm645_vm2, %v3959_v37, %v3963_v9 }
 0x259   : > { %v4264_v44 = vrot.slane %v11896_v51, 1  ;;  %v10144_v37 = vld [vmem:[%s12962_s1 + $0x28] sm:$0x3]  ;;  %v10624_v51 = vld [vmem:[%s11167_s13 + $0x10] sm:$0xf0] }
 0x25b   : > { %v3653_v43 = vpop.f32.mrf.mxu2  ;;  %v4265_v50 = vsel %vm1016_vm3, %v4262_v62, %v4264_v44  ;;  %v10083_v62 = vld [vmem:[%s12962_s1 + $0x26] sm:$0x3] }
 0x25c   : > { %v3712_v16 = vadd.f32 %v3653_v43, %v3446_v40  ;;  %v4023_v54 = vpop.f32.mrf.mxu3  ;;  %v10586_v40 = vld [vmem:[%s11167_s13 + $0x60] sm:$0xff]  ;;  %v3222_v43 = vld [vmem:[%s11167_s13 + $0x68] sm:$0x3] }
 0x25d   : > { %v3390_v56 = vpop.f32.mrf.mxu1 }
 0x25e   : > { %v4082_v13 = vadd.f32 %v4023_v54, %v3712_v16  ;;  %v3447_v30 = vadd.f32 %v3390_v56, %v11657_v38  ;;  %v4321_v48 = vpop.f32.mrf.mxu0  ;;  %v3859_v16 = vunpack.c.l.b16 %v3783_v26  ;;  %v4153_v54 = vld [vmem:[%s11167_s13 + $0x70] sm:$0x1]  ;;  %v6864_v26 = vsel %vm434_vm0, %v10144_v37, 0 }
 0x25f   : > { %6873 = vmatpush.bf16.msrb.mxu0 %v6864_v26 }
 0x260   : > { %9531 = vmatmul.msk.bf16.gmra.mxu1 %vm397_vm1, %v3332_v57  ;;  %9592 = vmatmul.msk.bf16.gmra.mxu2 %vm397_vm1, %v10585_v59  ;;  %v11883_v31 = vadd.f32 %v4318_v19, %v4082_v13  ;;  %v3872_v56 = vpack.c.b16 %v3859_v16, %v3859_v16  ;;  %v4229_v57 = vunpack.c.l.b16 %v4153_v54 }
 0x261   : > { %9653 = vmatmul.msk.bf16.gmra.mxu3 %vm397_vm1, %v3956_v45  ;;  %9714 = vmatmul.msk.bf16.gmra.mxu0 %vm397_vm1, %v4263_v41 }
 0x263   : > { %v3656_v15 = vpop.f32.mrf.mxu2 }
 0x264   : > { %v3713_v38 = vadd.f32 %v3656_v15, %v3447_v30  ;;  %v4026_v49 = vpop.f32.mrf.mxu3  ;;  %v6598_v30 = vsel %vm434_vm0, %v10083_v62, 0 }
 0x265   : > { %v3392_v23 = vpop.f32.mrf.mxu1  ;;  %6607 = vmatpush.bf16.msrb.mxu3 %v6598_v30 }
 0x266   : > { %v4083_v52 = vadd.f32 %v4026_v49, %v3713_v38  ;;  %v3448_v53 = vadd.f32 %v3392_v23, %v11674_v55  ;;  %v4323_v24 = vpop.f32.mrf.mxu0  ;;  %v3334_v55 = vsel %vm1699_vm5, %v3331_v61, %v3333_v2  ;;  %v3298_v61 = vunpack.c.l.b16 %v3222_v43 }
 0x267   : > { %v3965_v49 = vshrl.u32 %v11888_v46, 16 }
 0x268   : > { %v11898_v32 = vadd.f32 %v4321_v48, %v4083_v52  ;;  %v3311_v38 = vpack.c.b16 %v3298_v61, %v3298_v61  ;;  %v3969_v52 = vshll.u32 %v3872_v56, 16  ;;  %v10613_v61 = vld [vmem:[%s11167_s13 + $0x18] sm:$0xff] }
 0x269   : > { %v4550_v30 = vshll.u32 %v10613_v61, 16 }
 0x26a   : > { %v3335_v46 = vrot.slane %v3311_v38, 2 }
 0x26b   : > { %v3658_v28 = vpop.f32.mrf.mxu2 }
 0x26c   : > { %v3714_v34 = vadd.f32 %v3658_v28, %v3448_v53  ;;  %v4028_v6 = vpop.f32.mrf.mxu3  ;;  %v4242_v53 = vpack.c.b16 %v4229_v57, %v4229_v57  ;;  %v3336_v54 = vsel %vm1699_vm5, %v3333_v2, %v3335_v46  ;;  %v10648_v57 = vld [vmem:[%s11167_s13 + $0x18] sm:$0xff] }
 0x26d   : > { %v3395_v19 = vpop.f32.mrf.mxu1  ;;  %v5486_v37 = vshrl.u32 %v10648_v57, 16 }
 0x26e   : > { %v4084_v8 = vadd.f32 %v4028_v6, %v3714_v34  ;;  %v3449_v12 = vadd.f32 %v3395_v19, %v11696_v7  ;;  %v4326_v4 = vpop.f32.mrf.mxu0  ;;  %v10022_v7 = vld [vmem:[%s12962_s1 + $0x24] sm:$0x3]  ;;  %v9720_v34 = vld [vmem:[%s11167_s13 + $0x10] sm:$0xe]  ;;  %v10612_v6 = vld [vmem:[%s11167_s13 + $0x10] sm:$0xf0] }
 0x26f   : > { %v6303_v13 = vsel %vm434_vm0, %v10022_v7, 0  ;;  %v3971_v19 = vrot.slane %v3969_v52, 1  ;;  %v9721_v43 = vor.u32 %v10612_v6, %v9720_v34 }
 0x270   : > { %9532 = vmatmul.msk.bf16.gmra.mxu1 %vm397_vm1, %v3334_v55  ;;  %9593 = vmatmul.msk.bf16.gmra.mxu2 %vm397_vm1, %v10586_v40  ;;  %v11916_v59 = vadd.f32 %v4323_v24, %v4084_v8  ;;  %v9961_v24 = vld [vmem:[%s12962_s1 + $0x22] sm:$0x3]  ;;  %v3967_v40 = vor.u32 %v3965_v49, %v3963_v9  ;;  %v4266_v55 = vrot.slane %v4242_v53, 1  ;;  %v10625_v53 = vld [vmem:[%s11167_s13 + $0x18] sm:$0xff] }
 0x271   : > { %9654 = vmatmul.msk.bf16.gmra.mxu3 %vm397_vm1, %v3964_v20  ;;  %9715 = vmatmul.msk.bf16.gmra.mxu0 %vm397_vm1, %v4265_v50  ;;  %v5917_v28 = vsel %vm434_vm0, %v9961_v24, 0  ;;  %v10587_v50 = vld [vmem:[%s11167_s13 + $0x68] sm:$0xff]  ;;  %v4539_v36 = vshrl.u32 %v9721_v43, 16  ;;  %v4542_v2 = vshll.u32 %v9721_v43, 16 }
 0x272   : > { %6312 = vmatpush.bf16.msrb.mxu2 %v6303_v13  ;;  %5926 = vmatpush.bf16.msrb.mxu1 %v5917_v28  ;;  %v3972_v62 = vsel %vm645_vm2, %v3967_v40, %v3971_v19  ;;  %v4267_v56 = vsel %vm1016_vm3, %v4264_v44, %v4266_v55  ;;  %v5488_v44 = vshll.u32 %v10648_v57, 16 }
 0x273   : > { %v3661_v48 = vpop.f32.mrf.mxu2  ;;  %v4541_v49 = vrot.slane %v4539_v36, 1 }
 0x274   : > { %v3715_v45 = vadd.f32 %v3661_v48, %v3449_v12  ;;  %v4031_v41 = vpop.f32.mrf.mxu3  ;;  %v9781_v48 = vld [vmem:[%s11167_s13 + $0x10] sm:$0xc]  ;;  %v5490_v34 = vrot.slane %v5488_v44, 1 }
 0x275   : > { %v3397_v15 = vpop.f32.mrf.mxu1  ;;  %v9782_v24 = vor.u32 %v10624_v51, %v9781_v48  ;;  %v10650_v48 = vld [vmem:[%s11167_s13 + $0x28] sm:$0xff] }
 0x276   : > { %v4085_v23 = vadd.f32 %v4031_v41, %v3715_v45  ;;  %v3450_v14 = vadd.f32 %v3397_v15, %v11709_v39  ;;  %v4328_v35 = vpop.f32.mrf.mxu0  ;;  %v10649_v45 = vld [vmem:[%s11167_s13 + $0x20] sm:$0xff] }
 0x277   : > { %v5493_v6 = vshll.u32 %v10649_v45, 16 }
 0x278   : > { %v11938_v39 = vadd.f32 %v4326_v4, %v4085_v23  ;;  %v4544_v23 = vrot.slane %v4542_v2, 2 }
 0x27a   : > { %v4545_v19 = vor.u32 %v4544_v23, %v4541_v49  ;;  %v10626_v49 = vld [vmem:[%s11167_s13 + $0x20] sm:$0xff] }
 0x27b   : > { %v3663_v20 = vpop.f32.mrf.mxu2 }
 0x27c   : > { %v3716_v8 = vadd.f32 %v3663_v20, %v3450_v14  ;;  %v4033_v12 = vpop.f32.mrf.mxu3  ;;  %v4924_v20 = vrot.slane %v9782_v24, 2 }
 0x27d   : > { %v3400_v16 = vpop.f32.mrf.mxu1 }
 0x27e   : > { %v4086_v4 = vadd.f32 %v4033_v12, %v3716_v8  ;;  %v3451_v7 = vadd.f32 %v3400_v16, %v11721_v47  ;;  %v4331_v9 = vpop.f32.mrf.mxu0  ;;  %v4547_v47 = vshrl.u32 %v10613_v61, 16  ;;  %v4925_v8 = vrot.slane %v10625_v53, 2 }
 0x27f   : > { %v5491_v12 = vor.u32 %v5490_v34, %v5486_v37  ;;  %v5501_v53 = vshll.u32 %v10650_v48, 16 }
 0x280   : > { %9533 = vmatmul.msk.bf16.gmra.mxu1 %vm397_vm1, %v3336_v54  ;;  %9594 = vmatmul.msk.bf16.gmra.mxu2 %vm397_vm1, %v10587_v50  ;;  %v11955_v13 = vadd.f32 %v4328_v35, %v4086_v4  ;;  %v4549_v52 = vrot.slane %v4547_v47, 1  ;;  %v4552_v35 = vrot.slane %v4550_v30, 2  ;;  %v5495_v50 = vrot.slane %v5493_v6, 1 }
 0x281   : > { %9655 = vmatmul.msk.bf16.gmra.mxu3 %vm397_vm1, %v3972_v62  ;;  %9716 = vmatmul.msk.bf16.gmra.mxu0 %vm397_vm1, %v4267_v56  ;;  %v4926_v4 = vsel %vm1699_vm5, %v4924_v20, %v4925_v8  ;;  %v10614_v62 = vld [vmem:[%s11167_s13 + $0x20] sm:$0xff] }
 0x282   : > { %v4553_v55 = vor.u32 %v4552_v35, %v4549_v52  ;;  %v5496_v36 = vsel %vm645_vm2, %v5491_v12, %v5495_v50  ;;  %v4556_v47 = vshrl.u32 %v10614_v62, 16  ;;  %v4559_v30 = vshll.u32 %v10614_v62, 16 }
 0x283   : > { %v3666_v41 = vpop.f32.mrf.mxu2  ;;  %v5497_v35 = vshrl.u32 %v10649_v45, 16 }
 0x284   : > { %v3717_v15 = vadd.f32 %v3666_v41, %v3451_v7  ;;  %v4036_v38 = vpop.f32.mrf.mxu3  ;;  %v10636_v7 = vld [vmem:[%s11167_s13 + $0x18] sm:$0xff] }
 0x285   : > { %v3402_v14 = vpop.f32.mrf.mxu1 }
 0x286   : > { %v4087_v28 = vadd.f32 %v4036_v38, %v3717_v15  ;;  %v3452_v26 = vadd.f32 %v3402_v14, %v11730_v33  ;;  %v4333_v46 = vpop.f32.mrf.mxu0  ;;  %v4554_v33 = vsel %vm1312_vm4, %v4545_v19, %v4553_v55  ;;  %v4558_v15 = vrot.slane %v4556_v47, 1 }
 0x287   : > { %v4561_v38 = vrot.slane %v4559_v30, 2 }
 0x288   : > { %v11964_v40 = vadd.f32 %v4331_v9, %v4087_v28  ;;  %v4927_v28 = vrot.slane %v10626_v49, 2 }
 0x289   : > { %v4562_v37 = vor.u32 %v4561_v38, %v4558_v15 }
 0x28b   : > { %v3668_v43 = vpop.f32.mrf.mxu2  ;;  %v4563_v12 = vsel %vm1312_vm4, %v4553_v55, %v4562_v37 }
 0x28c   : > { %v3718_v16 = vadd.f32 %v3668_v43, %v3452_v26  ;;  %v4038_v54 = vpop.f32.mrf.mxu3  ;;  %v5499_v26 = vor.u32 %v5497_v35, %v5495_v50  ;;  %v4928_v43 = vsel %vm1699_vm5, %v4925_v8, %v4927_v28 }
 0x28d   : > { %v3405_v61 = vpop.f32.mrf.mxu1 }
 0x28e   : > { %v4088_v56 = vadd.f32 %v4038_v54, %v3718_v16  ;;  %v3453_v9 = vadd.f32 %v3405_v61, %v11738_v22  ;;  %v4336_v57 = vpop.f32.mrf.mxu0  ;;  %v10615_v16 = vld [vmem:[%s11167_s13 + $0x28] sm:$0xff] }
 0x28f   : > { %v4565_v55 = vshrl.u32 %v10615_v16, 16  ;;  %v4568_v8 = vshll.u32 %v10615_v16, 16 }
 0x290   : > { %9766 = vmatmul.msk.bf16.vlgmr.msra.gmra.mxu1 %vm397_vm1, %v4554_v33  ;;  %9827 = vmatmul.msk.bf16.vlgmr.msra.gmra.mxu2 %vm397_vm1, %v4926_v4  ;;  %v11974_v2 = vadd.f32 %v4333_v46, %v4088_v56  ;;  %v5503_v46 = vrot.slane %v5501_v53, 1  ;;  %v10651_v4 = vld [vmem:[%s11167_s13 + $0x30] sm:$0xff] }
 0x291   : > { %9888 = vmatmul.msk.bf16.vlgmr.msra.gmra.mxu3 %vm397_vm1, %v10636_v7  ;;  %9949 = vmatmul.msk.bf16.vlgmr.msra.gmra.mxu0 %vm397_vm1, %v5496_v36  ;;  %v10627_v36 = vld [vmem:[%s11167_s13 + $0x28] sm:$0xff] }
 0x292   : > { %v5504_v33 = vsel %vm645_vm2, %v5499_v26, %v5503_v46  ;;  %v4929_v38 = vrot.slane %v10627_v36, 2 }
 0x293   : > { %v3671_v51 = vpop.f32.mrf.mxu2 }
 0x294   : > { %v3719_v44 = vadd.f32 %v3671_v51, %v3453_v9  ;;  %v4041_v22 = vpop.f32.mrf.mxu3  ;;  %v4567_v9 = vrot.slane %v4565_v55, 1 }
 0x295   : > { %v3407_v41 = vpop.f32.mrf.mxu1 }
 0x296   : > { %v4089_v23 = vadd.f32 %v4041_v22, %v3719_v44  ;;  %v3454_v14 = vadd.f32 %v3407_v41, %v11747_v27  ;;  %v4338_v52 = vpop.f32.mrf.mxu0  ;;  %v10637_v27 = vld [vmem:[%s11167_s13 + $0x20] sm:$0xff]  ;;  %v5505_v44 = vshrl.u32 %v10650_v48, 16  ;;  %v5509_v22 = vshll.u32 %v10651_v4, 16 }
 0x298   : > { %v11981_v24 = vadd.f32 %v4336_v57, %v4089_v23  ;;  %v4570_v57 = vrot.slane %v4568_v8, 2  ;;  %v5507_v49 = vor.u32 %v5505_v44, %v5503_v46  ;;  %v5511_v23 = vrot.slane %v5509_v22, 1 }
 0x29a   : > { %v4571_v15 = vor.u32 %v4570_v57, %v4567_v9 }
 0x29b   : > { %v3673_v34 = vpop.f32.mrf.mxu2 }
 0x29c   : > { %v3720_v6 = vadd.f32 %v3673_v34, %v3454_v14  ;;  %v4043_v19 = vpop.f32.mrf.mxu3  ;;  %v4572_v26 = vsel %vm1312_vm4, %v4562_v37, %v4571_v15  ;;  %v4930_v34 = vsel %vm1699_vm5, %v4927_v28, %v4929_v38 }
 0x29d   : > { %v3410_v20 = vpop.f32.mrf.mxu1 }
 0x29e   : > { %v4090_v54 = vadd.f32 %v4043_v19, %v3720_v6  ;;  %v3455_v45 = vadd.f32 %v3410_v20, %v11755_v1  ;;  %v4341_v61 = vpop.f32.mrf.mxu0  ;;  %v10616_v6 = vld [vmem:[%s11167_s13 + $0x30] sm:$0xff] }
 0x29f   : > { %v4574_v37 = vshrl.u32 %v10616_v6, 16  ;;  %v4577_v28 = vshll.u32 %v10616_v6, 16 }
 0x2a0   : > { %9767 = vmatmul.msk.bf16.gmra.mxu1 %vm397_vm1, %v4563_v12  ;;  %9828 = vmatmul.msk.bf16.gmra.mxu2 %vm397_vm1, %v4928_v43  ;;  %v11991_v50 = vadd.f32 %v4338_v52, %v4090_v54  ;;  %v5512_v12 = vsel %vm645_vm2, %v5507_v49, %v5511_v23  ;;  %v10652_v43 = vld [vmem:[%s11167_s13 + $0x38] sm:$0xff] }
 0x2a1   : > { %9889 = vmatmul.msk.bf16.gmra.mxu3 %vm397_vm1, %v10637_v27  ;;  %9950 = vmatmul.msk.bf16.gmra.mxu0 %vm397_vm1, %v5504_v33  ;;  %v10628_v33 = vld [vmem:[%s11167_s13 + $0x30] sm:$0xff] }
 0x2a2   : > { %v4931_v57 = vrot.slane %v10628_v33, 2 }
 0x2a3   : > { %v3676_v7 = vpop.f32.mrf.mxu2 }
 0x2a4   : > { %v3721_v62 = vadd.f32 %v3676_v7, %v3455_v45  ;;  %v4046_v1 = vpop.f32.mrf.mxu3  ;;  %v4576_v45 = vrot.slane %v4574_v37, 1 }
 0x2a5   : > { %v3412_v56 = vpop.f32.mrf.mxu1 }
 0x2a6   : > { %v4091_v47 = vadd.f32 %v4046_v1, %v3721_v62  ;;  %v3456_v30 = vadd.f32 %v3412_v56, %v11764_v21  ;;  %v4343_v51 = vpop.f32.mrf.mxu0  ;;  %v10638_v21 = vld [vmem:[%s11167_s13 + $0x28] sm:$0xff]  ;;  %v5513_v62 = vshrl.u32 %v10651_v4, 16  ;;  %v5517_v1 = vshll.u32 %v10652_v43, 16 }
 0x2a8   : > { %v11998_v41 = vadd.f32 %v4341_v61, %v4091_v47  ;;  %v4579_v61 = vrot.slane %v4577_v28, 2  ;;  %v5515_v36 = vor.u32 %v5513_v62, %v5511_v23  ;;  %v5519_v47 = vrot.slane %v5517_v1, 1 }
 0x2aa   : > { %v4580_v9 = vor.u32 %v4579_v61, %v4576_v45 }
 0x2ab   : > { %v3678_v14 = vpop.f32.mrf.mxu2 }
 0x2ac   : > { %v3722_v52 = vadd.f32 %v3678_v14, %v3456_v30  ;;  %v4048_v35 = vpop.f32.mrf.mxu3  ;;  %v4581_v49 = vsel %vm1312_vm4, %v4571_v15, %v4580_v9  ;;  %v4932_v14 = vsel %vm1699_vm5, %v4929_v38, %v4931_v57 }
 0x2ad   : > { %v3415_v53 = vpop.f32.mrf.mxu1 }
 0x2ae   : > { %v4092_v19 = vadd.f32 %v4048_v35, %v3722_v52  ;;  %v3457_v48 = vadd.f32 %v3415_v53, %v11772_v5  ;;  %v4346_v20 = vpop.f32.mrf.mxu0  ;;  %v10617_v52 = vld [vmem:[%s11167_s13 + $0x38] sm:$0xff] }
 0x2af   : > { %v4583_v15 = vshrl.u32 %v10617_v52, 16  ;;  %v4586_v38 = vshll.u32 %v10617_v52, 16 }
 0x2b0   : > { %9768 = vmatmul.msk.bf16.gmra.mxu1 %vm397_vm1, %v4572_v26  ;;  %9829 = vmatmul.msk.bf16.gmra.mxu2 %vm397_vm1, %v4930_v34  ;;  %v12008_v46 = vadd.f32 %v4343_v51, %v4092_v19  ;;  %v5520_v26 = vsel %vm645_vm2, %v5515_v36, %v5519_v47  ;;  %v10653_v34 = vld [vmem:[%s11167_s13 + $0x40] sm:$0xff] }
 0x2b1   : > { %9890 = vmatmul.msk.bf16.gmra.mxu3 %vm397_vm1, %v10638_v21  ;;  %9951 = vmatmul.msk.bf16.gmra.mxu0 %vm397_vm1, %v5512_v12  ;;  %v10629_v12 = vld [vmem:[%s11167_s13 + $0x38] sm:$0xff] }
 0x2b2   : > { %v4933_v61 = vrot.slane %v10629_v12, 2 }
 0x2b3   : > { %v3681_v27 = vpop.f32.mrf.mxu2 }
 0x2b4   : > { %v3723_v16 = vadd.f32 %v3681_v27, %v3457_v48  ;;  %v4051_v5 = vpop.f32.mrf.mxu3  ;;  %v4585_v48 = vrot.slane %v4583_v15, 1 }
 0x2b5   : > { %v3417_v54 = vpop.f32.mrf.mxu1 }
 0x2b6   : > { %v4093_v55 = vadd.f32 %v4051_v5, %v3723_v16  ;;  %v3458_v8 = vadd.f32 %v3417_v54, %v11781_v63  ;;  %v4348_v7 = vpop.f32.mrf.mxu0  ;;  %v10639_v63 = vld [vmem:[%s11167_s13 + $0x30] sm:$0xff]  ;;  %v5521_v16 = vshrl.u32 %v10652_v43, 16  ;;  %v5525_v5 = vshll.u32 %v10653_v34, 16 }
 0x2b8   : > { %v12015_v56 = vadd.f32 %v4346_v20, %v4093_v55  ;;  %v4588_v20 = vrot.slane %v4586_v38, 2  ;;  %v5523_v33 = vor.u32 %v5521_v16, %v5519_v47  ;;  %v5527_v55 = vrot.slane %v5525_v5, 1 }
 0x2ba   : > { %v4589_v45 = vor.u32 %v4588_v20, %v4585_v48 }
 0x2bb   : > { %v3683_v30 = vpop.f32.mrf.mxu2 }
 0x2bc   : > { %v3724_v51 = vadd.f32 %v3683_v30, %v3458_v8  ;;  %v4053_v44 = vpop.f32.mrf.mxu3  ;;  %v4590_v36 = vsel %vm1312_vm4, %v4580_v9, %v4589_v45  ;;  %v4934_v30 = vsel %vm1699_vm5, %v4931_v57, %v4933_v61 }
 0x2bd   : > { %v3420_v22 = vpop.f32.mrf.mxu1 }
 0x2be   : > { %v4094_v35 = vadd.f32 %v4053_v44, %v3724_v51  ;;  %v3459_v4 = vadd.f32 %v3420_v22, %v11789_v11  ;;  %v4351_v53 = vpop.f32.mrf.mxu0  ;;  %v10618_v51 = vld [vmem:[%s11167_s13 + $0x40] sm:$0xff] }
 0x2bf   : > { %v4592_v9 = vshrl.u32 %v10618_v51, 16  ;;  %v4595_v57 = vshll.u32 %v10618_v51, 16 }
 0x2c0   : > { %9769 = vmatmul.msk.bf16.gmra.mxu1 %vm397_vm1, %v4581_v49  ;;  %9830 = vmatmul.msk.bf16.gmra.mxu2 %vm397_vm1, %v4932_v14  ;;  %v12025_v23 = vadd.f32 %v4348_v7, %v4094_v35  ;;  %v5528_v49 = vsel %vm645_vm2, %v5523_v33, %v5527_v55  ;;  %v10654_v14 = vld [vmem:[%s11167_s13 + $0x48] sm:$0xff] }
 0x2c1   : > { %9891 = vmatmul.msk.bf16.gmra.mxu3 %vm397_vm1, %v10639_v63  ;;  %9952 = vmatmul.msk.bf16.gmra.mxu0 %vm397_vm1, %v5520_v26  ;;  %v10630_v26 = vld [vmem:[%s11167_s13 + $0x40] sm:$0xff] }
 0x2c2   : > { %v4935_v20 = vrot.slane %v10630_v26, 2 }
 0x2c3   : > { %v3686_v21 = vpop.f32.mrf.mxu2 }
 0x2c4   : > { %v3725_v6 = vadd.f32 %v3686_v21, %v3459_v4  ;;  %v4056_v11 = vpop.f32.mrf.mxu3  ;;  %v4594_v4 = vrot.slane %v4592_v9, 1 }
 0x2c5   : > { %v3422_v19 = vpop.f32.mrf.mxu1 }
 0x2c6   : > { %v4095_v37 = vadd.f32 %v4056_v11, %v3725_v6  ;;  %v3460_v28 = vadd.f32 %v3422_v19, %v11798_v29  ;;  %v4353_v27 = vpop.f32.mrf.mxu0  ;;  %v10640_v29 = vld [vmem:[%s11167_s13 + $0x38] sm:$0xff]  ;;  %v5529_v6 = vshrl.u32 %v10653_v34, 16  ;;  %v5533_v11 = vshll.u32 %v10654_v14, 16 }
 0x2c8   : > { %v12032_v54 = vadd.f32 %v4351_v53, %v4095_v37  ;;  %v4597_v53 = vrot.slane %v4595_v57, 2  ;;  %v5531_v12 = vor.u32 %v5529_v6, %v5527_v55  ;;  %v5535_v37 = vrot.slane %v5533_v11, 1 }
 0x2ca   : > { %v4598_v48 = vor.u32 %v4597_v53, %v4594_v4 }
 0x2cb   : > { %v3688_v8 = vpop.f32.mrf.mxu2 }
 0x2cc   : > { %v3726_v7 = vadd.f32 %v3688_v8, %v3460_v28  ;;  %v4058_v62 = vpop.f32.mrf.mxu3  ;;  %v4599_v33 = vsel %vm1312_vm4, %v4589_v45, %v4598_v48  ;;  %v4936_v8 = vsel %vm1699_vm5, %v4933_v61, %v4935_v20 }
 0x2cd   : > { %v3425_v1 = vpop.f32.mrf.mxu1 }
 0x2ce   : > { %v4096_v44 = vadd.f32 %v4058_v62, %v3726_v7  ;;  %v3461_v43 = vadd.f32 %v3425_v1, %v11806_v60  ;;  %v4356_v22 = vpop.f32.mrf.mxu0  ;;  %v10619_v7 = vld [vmem:[%s11167_s13 + $0x48] sm:$0xff] }
 0x2cf   : > { %v4601_v45 = vshrl.u32 %v10619_v7, 16  ;;  %v4604_v61 = vshll.u32 %v10619_v7, 16 }
 0x2d0   : > { %9770 = vmatmul.msk.bf16.gmra.mxu1 %vm397_vm1, %v4590_v36  ;;  %9831 = vmatmul.msk.bf16.gmra.mxu2 %vm397_vm1, %v4934_v30  ;;  %v12042_v47 = vadd.f32 %v4353_v27, %v4096_v44  ;;  %v5536_v36 = vsel %vm645_vm2, %v5531_v12, %v5535_v37  ;;  %v10655_v30 = vld [vmem:[%s11167_s13 + $0x50] sm:$0xff] }
 0x2d1   : > { %9892 = vmatmul.msk.bf16.gmra.mxu3 %vm397_vm1, %v10640_v29  ;;  %9953 = vmatmul.msk.bf16.gmra.mxu0 %vm397_vm1, %v5528_v49  ;;  %v10631_v49 = vld [vmem:[%s11167_s13 + $0x48] sm:$0xff] }
 0x2d2   : > { %v4937_v53 = vrot.slane %v10631_v49, 2 }
 0x2d3   : > { %v3691_v63 = vpop.f32.mrf.mxu2 }
 0x2d4   : > { %v3727_v52 = vadd.f32 %v3691_v63, %v3461_v43  ;;  %v4061_v60 = vpop.f32.mrf.mxu3  ;;  %v4603_v43 = vrot.slane %v4601_v45, 1 }
 0x2d5   : > { %v3427_v35 = vpop.f32.mrf.mxu1 }
 0x2d6   : > { %v4097_v15 = vadd.f32 %v4061_v60, %v3727_v52  ;;  %v3462_v38 = vadd.f32 %v3427_v35, %v11815_v25  ;;  %v4358_v21 = vpop.f32.mrf.mxu0  ;;  %v10641_v25 = vld [vmem:[%s11167_s13 + $0x40] sm:$0xff]  ;;  %v5537_v52 = vshrl.u32 %v10654_v14, 16  ;;  %v5541_v60 = vshll.u32 %v10655_v30, 16 }
 0x2d8   : > { %v12049_v19 = vadd.f32 %v4356_v22, %v4097_v15  ;;  %v4606_v22 = vrot.slane %v4604_v61, 2  ;;  %v5539_v26 = vor.u32 %v5537_v52, %v5535_v37  ;;  %v5543_v15 = vrot.slane %v5541_v60, 1 }
 0x2da   : > { %v4607_v4 = vor.u32 %v4606_v22, %v4603_v43 }
 0x2db   : > { %v3693_v28 = vpop.f32.mrf.mxu2 }
 0x2dc   : > { %v3728_v27 = vadd.f32 %v3693_v28, %v3462_v38  ;;  %v4063_v16 = vpop.f32.mrf.mxu3  ;;  %v4608_v12 = vsel %vm1312_vm4, %v4598_v48, %v4607_v4  ;;  %v4938_v28 = vsel %vm1699_vm5, %v4935_v20, %v4937_v53 }
 0x2dd   : > { %v3430_v5 = vpop.f32.mrf.mxu1 }
 0x2de   : > { %v4098_v62 = vadd.f32 %v4063_v16, %v3728_v27  ;;  %v3463_v34 = vadd.f32 %v3430_v5, %v11823_v17  ;;  %v4361_v1 = vpop.f32.mrf.mxu0  ;;  %v10620_v27 = vld [vmem:[%s11167_s13 + $0x50] sm:$0xff] }
 0x2df   : > { %v4610_v48 = vshrl.u32 %v10620_v27, 16  ;;  %v4613_v20 = vshll.u32 %v10620_v27, 16 }
 0x2e0   : > { %9771 = vmatmul.msk.bf16.gmra.mxu1 %vm397_vm1, %v4599_v33  ;;  %9832 = vmatmul.msk.bf16.gmra.mxu2 %vm397_vm1, %v4936_v8  ;;  %v12059_v55 = vadd.f32 %v4358_v21, %v4098_v62  ;;  %v5544_v33 = vsel %vm645_vm2, %v5539_v26, %v5543_v15  ;;  %v10656_v8 = vld [vmem:[%s11167_s13 + $0x58] sm:$0xff] }
 0x2e1   : > { %9893 = vmatmul.msk.bf16.gmra.mxu3 %vm397_vm1, %v10641_v25  ;;  %9954 = vmatmul.msk.bf16.gmra.mxu0 %vm397_vm1, %v5536_v36  ;;  %v10632_v36 = vld [vmem:[%s11167_s13 + $0x50] sm:$0xff] }
 0x2e2   : > { %v4939_v22 = vrot.slane %v10632_v36, 2 }
 0x2e3   : > { %v3696_v29 = vpop.f32.mrf.mxu2 }
 0x2e4   : > { %v3729_v51 = vadd.f32 %v3696_v29, %v3463_v34  ;;  %v4066_v17 = vpop.f32.mrf.mxu3  ;;  %v4612_v34 = vrot.slane %v4610_v48, 1 }
 0x2e5   : > { %v3432_v44 = vpop.f32.mrf.mxu1 }
 0x2e6   : > { %v4099_v9 = vadd.f32 %v4066_v17, %v3729_v51  ;;  %v3464_v57 = vadd.f32 %v3432_v44, %v11832_v3  ;;  %v4363_v63 = vpop.f32.mrf.mxu0  ;;  %v10642_v3 = vld [vmem:[%s11167_s13 + $0x48] sm:$0xff]  ;;  %v5545_v51 = vshrl.u32 %v10655_v30, 16  ;;  %v5549_v17 = vshll.u32 %v10656_v8, 16 }
 0x2e8   : > { %v12066_v35 = vadd.f32 %v4361_v1, %v4099_v9  ;;  %v4615_v1 = vrot.slane %v4613_v20, 2  ;;  %v5547_v49 = vor.u32 %v5545_v51, %v5543_v15  ;;  %v5551_v9 = vrot.slane %v5549_v17, 1 }
 0x2ea   : > { %v4616_v43 = vor.u32 %v4615_v1, %v4612_v34 }
 0x2eb   : > { %v3698_v38 = vpop.f32.mrf.mxu2 }
 0x2ec   : > { %v3730_v21 = vadd.f32 %v3698_v38, %v3464_v57  ;;  %v4068_v6 = vpop.f32.mrf.mxu3  ;;  %v4617_v26 = vsel %vm1312_vm4, %v4607_v4, %v4616_v43  ;;  %v4940_v38 = vsel %vm1699_vm5, %v4937_v53, %v4939_v22 }
 0x2ed   : > { %v3435_v11 = vpop.f32.mrf.mxu1 }
 0x2ee   : > { %v4100_v16 = vadd.f32 %v4068_v6, %v3730_v21  ;;  %v3465_v14 = vadd.f32 %v3435_v11, %v11840_v42  ;;  %v4366_v5 = vpop.f32.mrf.mxu0  ;;  %v10621_v21 = vld [vmem:[%s11167_s13 + $0x58] sm:$0xff] }
 0x2ef   : > { %v4619_v4 = vshrl.u32 %v10621_v21, 16  ;;  %v4622_v53 = vshll.u32 %v10621_v21, 16 }
 0x2f0   : > { %9772 = vmatmul.msk.bf16.gmra.mxu1 %vm397_vm1, %v4608_v12  ;;  %9833 = vmatmul.msk.bf16.gmra.mxu2 %vm397_vm1, %v4938_v28  ;;  %v12076_v37 = vadd.f32 %v4363_v63, %v4100_v16  ;;  %v5552_v12 = vsel %vm645_vm2, %v5547_v49, %v5551_v9  ;;  %v10657_v28 = vld [vmem:[%s11167_s13 + $0x60] sm:$0xff] }
 0x2f1   : > { %9894 = vmatmul.msk.bf16.gmra.mxu3 %vm397_vm1, %v10642_v3  ;;  %9955 = vmatmul.msk.bf16.gmra.mxu0 %vm397_vm1, %v5544_v33  ;;  %v10633_v33 = vld [vmem:[%s11167_s13 + $0x58] sm:$0xff] }
 0x2f2   : > { %v4941_v1 = vrot.slane %v10633_v33, 2 }
 0x2f3   : > { %v3701_v25 = vpop.f32.mrf.mxu2 }
 0x2f4   : > { %v3731_v7 = vadd.f32 %v3701_v25, %v3465_v14  ;;  %v4071_v42 = vpop.f32.mrf.mxu3  ;;  %v4621_v14 = vrot.slane %v4619_v4, 1 }
 0x2f5   : > { %v3437_v62 = vpop.f32.mrf.mxu1 }
 0x2f6   : > { %v4101_v45 = vadd.f32 %v4071_v42, %v3731_v7  ;;  %v3466_v61 = vadd.f32 %v3437_v62, %v11849_v58  ;;  %v4368_v29 = vpop.f32.mrf.mxu0  ;;  %v10643_v58 = vld [vmem:[%s11167_s13 + $0x50] sm:$0xff]  ;;  %v5553_v7 = vshrl.u32 %v10656_v8, 16  ;;  %v5557_v42 = vshll.u32 %v10657_v28, 16 }
 0x2f8   : > { %v12083_v44 = vadd.f32 %v4366_v5, %v4101_v45  ;;  %v4624_v5 = vrot.slane %v4622_v53, 2  ;;  %v5555_v36 = vor.u32 %v5553_v7, %v5551_v9  ;;  %v5559_v45 = vrot.slane %v5557_v42, 1 }
 0x2fa   : > { %v4625_v34 = vor.u32 %v4624_v5, %v4621_v14 }
 0x2fb   : > { %v3703_v57 = vpop.f32.mrf.mxu2 }
 0x2fc   : > { %v3732_v63 = vadd.f32 %v3703_v57, %v3466_v61  ;;  %v4073_v52 = vpop.f32.mrf.mxu3  ;;  %v4626_v49 = vsel %vm1312_vm4, %v4616_v43, %v4625_v34  ;;  %v4942_v57 = vsel %vm1699_vm5, %v4939_v22, %v4941_v1 }
 0x2fd   : > { %v3440_v60 = vpop.f32.mrf.mxu1 }
 0x2fe   : > { %v4102_v6 = vadd.f32 %v4073_v52, %v3732_v63  ;;  %v3467_v30 = vadd.f32 %v3440_v60, %v11857_v0  ;;  %v4371_v11 = vpop.f32.mrf.mxu0  ;;  %v10622_v63 = vld [vmem:[%s11167_s13 + $0x60] sm:$0xff] }
 0x2ff   : > { %v4628_v43 = vshrl.u32 %v10622_v63, 16  ;;  %v4631_v22 = vshll.u32 %v10622_v63, 16 }
 0x300   : > { %9773 = vmatmul.msk.bf16.gmra.mxu1 %vm397_vm1, %v4617_v26  ;;  %9834 = vmatmul.msk.bf16.gmra.mxu2 %vm397_vm1, %v4940_v38  ;;  %v12093_v15 = vadd.f32 %v4368_v29, %v4102_v6  ;;  %v5560_v26 = vsel %vm645_vm2, %v5555_v36, %v5559_v45  ;;  %v10658_v38 = vld [vmem:[%s11167_s13 + $0x68] sm:$0xff] }
 0x301   : > { %9895 = vmatmul.msk.bf16.gmra.mxu3 %vm397_vm1, %v10643_v58  ;;  %9956 = vmatmul.msk.bf16.gmra.mxu0 %vm397_vm1, %v5552_v12  ;;  %v10634_v12 = vld [vmem:[%s11167_s13 + $0x60] sm:$0xff] }
 0x302   : > { %v4943_v5 = vrot.slane %v10634_v12, 2 }
 0x303   : > { %v3706_v3 = vpop.f32.mrf.mxu2 }
 0x304   : > { %v3733_v27 = vadd.f32 %v3706_v3, %v3467_v30  ;;  %v4076_v0 = vpop.f32.mrf.mxu3  ;;  %v4630_v30 = vrot.slane %v4628_v43, 1 }
 0x305   : > { %v3442_v16 = vpop.f32.mrf.mxu1 }
 0x306   : > { %v4103_v48 = vadd.f32 %v4076_v0, %v3733_v27  ;;  %v3468_v20 = vadd.f32 %v3442_v16, %v11866_v18  ;;  %v4373_v25 = vpop.f32.mrf.mxu0  ;;  %v10644_v18 = vld [vmem:[%s11167_s13 + $0x58] sm:$0xff]  ;;  %v5561_v27 = vshrl.u32 %v10657_v28, 16  ;;  %v5565_v0 = vshll.u32 %v10658_v38, 16 }
 0x308   : > { %v12100_v62 = vadd.f32 %v4371_v11, %v4103_v48  ;;  %v4633_v11 = vrot.slane %v4631_v22, 2  ;;  %v5563_v33 = vor.u32 %v5561_v27, %v5559_v45  ;;  %v5567_v48 = vrot.slane %v5565_v0, 1  ;;  %v5395_v0 = vld [vmem:[%s11167_s13 + $0x78] sm:$0x1] }
 0x30a   : > { %v4634_v14 = vor.u32 %v4633_v11, %v4630_v30 }
 0x30b   : > { %v3708_v61 = vpop.f32.mrf.mxu2 }
 0x30c   : > { %v3734_v29 = vadd.f32 %v3708_v61, %v3468_v20  ;;  %v4078_v51 = vpop.f32.mrf.mxu3  ;;  %v4635_v36 = vsel %vm1312_vm4, %v4625_v34, %v4634_v14  ;;  %v4944_v61 = vsel %vm1699_vm5, %v4941_v1, %v4943_v5 }
 0x30d   : > { %v4702_v17 = vpop.f32.mrf.mxu1 }
 0x30e   : > { %v4104_v52 = vadd.f32 %v4078_v51, %v3734_v29  ;;  %v4762_v8 = vadd.f32 %v4702_v17, %v11874_v10  ;;  %v5633_v60 = vpop.f32.mrf.mxu0  ;;  %v10623_v29 = vld [vmem:[%s11167_s13 + $0x68] sm:$0xff] }
 0x30f   : > { %v4637_v34 = vshrl.u32 %v10623_v29, 16  ;;  %v4640_v1 = vshll.u32 %v10623_v29, 16  ;;  %v4834_v29 = vld [vmem:[%s11167_s13 + $0x70] sm:$0x3] }
 0x310   : > { %9774 = vmatmul.msk.bf16.gmra.mxu1 %vm397_vm1, %v4626_v49  ;;  %9835 = vmatmul.msk.bf16.gmra.mxu2 %vm397_vm1, %v4942_v57  ;;  %v12110_v9 = vadd.f32 %v4373_v25, %v4104_v52  ;;  %v5568_v49 = vsel %vm645_vm2, %v5563_v33, %v5567_v48  ;;  %v12132_v57 = vld [vmem:[%s11167_s13 + $0x70] sm:$0xff] }
 0x311   : > { %9896 = vmatmul.msk.bf16.gmra.mxu3 %vm397_vm1, %v10644_v18  ;;  %9957 = vmatmul.msk.bf16.gmra.mxu0 %vm397_vm1, %v5560_v26  ;;  %v12135_v26 = vld [vmem:[%s11167_s13 + $0x68] sm:$0xff] }
 0x312   : > { %v4945_v12 = vrot.slane %v12135_v26, 2 }
 0x313   : > { %v4997_v58 = vpop.f32.mrf.mxu2 }
 0x314   : > { %v5057_v21 = vadd.f32 %v4997_v58, %v4762_v8  ;;  %v5263_v10 = vpop.f32.mrf.mxu3  ;;  %v4639_v8 = vrot.slane %v4637_v34, 1 }
 0x315   : > { %v4704_v6 = vpop.f32.mrf.mxu1 }
 0x316   : > { %v5323_v4 = vadd.f32 %v5263_v10, %v5057_v21  ;;  %v4763_v53 = vadd.f32 %v4704_v6, %v11883_v31  ;;  %v5635_v3 = vpop.f32.mrf.mxu0  ;;  %v10645_v31 = vld [vmem:[%s11167_s13 + $0x60] sm:$0xff]  ;;  %v5569_v21 = vshrl.u32 %v10658_v38, 16  ;;  %v5573_v10 = vshll.u32 %v12132_v57, 16  ;;  %v4448_v6 = vld [vmem:[%s11167_s13 + $0x70] sm:$0x3] }
 0x318   : > { %v12117_v16 = vadd.f32 %v5633_v60, %v5323_v4  ;;  %v4642_v60 = vrot.slane %v4640_v1, 2  ;;  %v4524_v4 = vunpack.c.l.b16 %v4448_v6  ;;  %v5577_v6 = vshrl.u32 %v12132_v57, 16 }
 0x31a   : > { %v12142_v11 = vor.u32 %v4642_v60, %v4639_v8 }
 0x31b   : > { %v4999_v20 = vpop.f32.mrf.mxu2 }
 0x31c   : > { %v5058_v25 = vadd.f32 %v4999_v20, %v4763_v53  ;;  %v5265_v7 = vpop.f32.mrf.mxu3  ;;  %v5571_v53 = vor.u32 %v5569_v21, %v5567_v48  ;;  %v4644_v38 = vsel %vm1312_vm4, %v4634_v14, %v12142_v11 }
 0x31d   : > { %v4707_v42 = vpop.f32.mrf.mxu1 }
 0x31e   : > { %v5324_v51 = vadd.f32 %v5265_v7, %v5058_v25  ;;  %v4764_v28 = vadd.f32 %v4707_v42, %v11898_v32  ;;  %v5638_v17 = vpop.f32.mrf.mxu0  ;;  %v4946_v25 = vsel %vm1699_vm5, %v4943_v5, %v4945_v12  ;;  %v10646_v7 = vld [vmem:[%s11167_s13 + $0x68] sm:$0xff]  ;;  %v4537_v42 = vpack.c.b16 %v4524_v4, %v4524_v4 }
 0x320   : > { %9775 = vmatmul.msk.bf16.gmra.mxu1 %vm397_vm1, %v4635_v36  ;;  %9836 = vmatmul.msk.bf16.gmra.mxu2 %vm397_vm1, %v4944_v61  ;;  %v12127_v45 = vadd.f32 %v5635_v3, %v5324_v51  ;;  %v5575_v3 = vrot.slane %v5573_v10, 1  ;;  %v5471_v51 = vunpack.c.l.b16 %v5395_v0  ;;  %v4646_v14 = vshrl.u32 %v4537_v42, 16 }
 0x321   : > { %9897 = vmatmul.msk.bf16.gmra.mxu3 %vm397_vm1, %v10645_v31  ;;  %9958 = vmatmul.msk.bf16.gmra.mxu0 %vm397_vm1, %v5568_v49  ;;  %v4649_v5 = vshll.u32 %v4537_v42, 16  ;;  %v10327_v49 = vld [vmem:[%s12962_s1 + $0x2e] sm:$0x3] }
 0x322   : > { %v5576_v48 = vsel %vm645_vm2, %v5571_v53, %v5575_v3  ;;  %v5484_v34 = vpack.c.b16 %v5471_v51, %v5471_v51  ;;  %v4648_v60 = vrot.slane %v4646_v14, 1  ;;  %v10205_v53 = vld [vmem:[%s12962_s1 + $0x2a] sm:$0x3]  ;;  %v10647_v14 = vld [vmem:[%s11167_s13 + $0x70] sm:$0xff] }
 0x323   : > { %v5002_v32 = vpop.f32.mrf.mxu2  ;;  %v7234_v0 = vsel %vm434_vm0, %v10205_v53, 0 }
 0x324   : > { %v5059_v18 = vadd.f32 %v5002_v32, %v4764_v28  ;;  %v5268_v63 = vpop.f32.mrf.mxu3  ;;  %v7915_v32 = vsel %vm434_vm0, %v10327_v49, 0  ;;  %v5581_v4 = vshll.u32 %v5484_v34, 16  ;;  %7243 = vmatpush.bf16.msra.mxu1 %v7234_v0 }
 0x325   : > { %v4709_v52 = vpop.f32.mrf.mxu1  ;;  %7924 = vmatpush.bf16.msra.mxu3 %v7915_v32 }
 0x326   : > { %v5325_v43 = vadd.f32 %v5268_v63, %v5059_v18  ;;  %v4765_v22 = vadd.f32 %v4709_v52, %v11916_v59  ;;  %v5640_v58 = vpop.f32.mrf.mxu0 }
 0x328   : > { %v12140_v30 = vadd.f32 %v5638_v17, %v5325_v43  ;;  %v4910_v17 = vunpack.c.l.b16 %v4834_v29  ;;  %v4651_v43 = vrot.slane %v4649_v5, 2  ;;  %v10673_v5 = vld [vmem:[%s11167_s13 + $0x20] sm:$0xff] }
 0x329   : > { %v6162_v32 = vshll.u32 %v10673_v5, 16 }
 0x32a   : > { %v4652_v57 = vor.u32 %v4651_v43, %v4648_v60 }
 0x32b   : > { %v5004_v27 = vpop.f32.mrf.mxu2 }
 0x32c   : > { %v5060_v33 = vadd.f32 %v5004_v27, %v4765_v22  ;;  %v5270_v59 = vpop.f32.mrf.mxu3  ;;  %v4923_v22 = vpack.c.b16 %v4910_v17, %v4910_v17  ;;  %v10388_v27 = vld [vmem:[%s12962_s1 + $0x30] sm:$0x3]  ;;  %v4653_v51 = vsel %vm1312_vm4, %v12142_v11, %v4652_v57 }
 0x32d   : > { %v4712_v20 = vpop.f32.mrf.mxu1 }
 0x32e   : > { %v5326_v36 = vadd.f32 %v5270_v59, %v5060_v33  ;;  %v4766_v61 = vadd.f32 %v4712_v20, %v11938_v39  ;;  %v5643_v31 = vpop.f32.mrf.mxu0  ;;  %v10266_v39 = vld [vmem:[%s12962_s1 + $0x2c] sm:$0x3]  ;;  %v8210_v33 = vsel %vm434_vm0, %v10388_v27, 0  ;;  %v4947_v59 = vrot.slane %v4923_v22, 2  ;;  %v10025_v20 = vld [vmem:[%s11167_s13 + $0x18] sm:$0xe] }
 0x32f   : > { %v7529_v1 = vsel %vm434_vm0, %v10266_v39, 0  ;;  %8219 = vmatpush.bf16.msra.mxu0 %v8210_v33  ;;  %v10685_v33 = vld [vmem:[%s11167_s13 + $0x20] sm:$0xff] }
 0x330   : > { %9776 = vmatmul.msk.bf16.gmra.mxu1 %vm397_vm1, %v4644_v38  ;;  %9837 = vmatmul.msk.bf16.gmra.mxu2 %vm397_vm1, %v4946_v25  ;;  %v12157_v28 = vadd.f32 %v5640_v58, %v5326_v36  ;;  %v10672_v38 = vld [vmem:[%s11167_s13 + $0x18] sm:$0xf0]  ;;  %v5579_v25 = vor.u32 %v5577_v6, %v5575_v3 }
 0x331   : > { %9898 = vmatmul.msk.bf16.gmra.mxu3 %vm397_vm1, %v10646_v7  ;;  %9959 = vmatmul.msk.bf16.gmra.mxu0 %vm397_vm1, %v5576_v48  ;;  %v5583_v7 = vrot.slane %v5581_v4, 1  ;;  %v10026_v48 = vor.u32 %v10672_v38, %v10025_v20  ;;  %v6164_v4 = vrot.slane %v6162_v32, 2 }
 0x332   : > { %7538 = vmatpush.bf16.msra.mxu2 %v7529_v1  ;;  %v10660_v1 = vld [vmem:[%s11167_s13 + $0x18] sm:$0xf0] }
 0x333   : > { %v5007_v18 = vpop.f32.mrf.mxu2  ;;  %v5584_v49 = vsel %vm645_vm2, %v5579_v25, %v5583_v7  ;;  %v6151_v11 = vshrl.u32 %v10026_v48, 16  ;;  %v6154_v26 = vshll.u32 %v10026_v48, 16 }
 0x334   : > { %v5061_v63 = vadd.f32 %v5007_v18, %v4766_v61  ;;  %v5273_v52 = vpop.f32.mrf.mxu3 }
 0x335   : > { %v4714_v8 = vpop.f32.mrf.mxu1 }
 0x336   : > { %v5327_v58 = vadd.f32 %v5273_v52, %v5061_v63  ;;  %v4767_v21 = vadd.f32 %v4714_v8, %v11955_v13  ;;  %v5645_v10 = vpop.f32.mrf.mxu0  ;;  %v10086_v63 = vld [vmem:[%s11167_s13 + $0x18] sm:$0xc]  ;;  %v10684_v52 = vld [vmem:[%s11167_s13 + $0x18] sm:$0xf0] }
 0x337   : > { %v10087_v57 = vor.u32 %v10684_v52, %v10086_v63 }
 0x338   : > { %v12179_v13 = vadd.f32 %v5643_v31, %v5327_v58  ;;  %v4948_v31 = vsel %vm1699_vm5, %v4945_v12, %v4947_v59  ;;  %v9964_v12 = vld [vmem:[%s11167_s13 + $0x18] sm:$0xe]  ;;  %v10661_v58 = vld [vmem:[%s11167_s13 + $0x20] sm:$0xff] }
 0x339   : > { %v9965_v43 = vor.u32 %v10660_v1, %v9964_v12  ;;  %v5856_v38 = vrot.slane %v10661_v58, 1 }
 0x33b   : > { %v5009_v42 = vpop.f32.mrf.mxu2  ;;  %v5855_v20 = vrot.slane %v9965_v43, 1 }
 0x33c   : > { %v5062_v36 = vadd.f32 %v5009_v42, %v4767_v21  ;;  %v5275_v61 = vpop.f32.mrf.mxu3  ;;  %v6153_v21 = vrot.slane %v6151_v11, 1  ;;  %v6536_v42 = vrot.slane %v10087_v57, 2 }
 0x33d   : > { %v4717_v29 = vpop.f32.mrf.mxu1 }
 0x33e   : > { %v5328_v17 = vadd.f32 %v5275_v61, %v5062_v36  ;;  %v4768_v3 = vadd.f32 %v4717_v29, %v11964_v40  ;;  %v5648_v39 = vpop.f32.mrf.mxu0  ;;  %v6159_v40 = vshrl.u32 %v10673_v5, 16  ;;  %v6537_v36 = vrot.slane %v10685_v33, 2  ;;  %v10674_v5 = vld [vmem:[%s11167_s13 + $0x28] sm:$0xff] }
 0x33f   : > { %v6171_v12 = vshll.u32 %v10674_v5, 16 }
 0x340   : > { %9777 = vmatmul.msk.bf16.gmra.mxu1 %vm397_vm1, %v4653_v51  ;;  %9838 = vmatmul.msk.bf16.gmra.mxu2 %vm397_vm1, %v4948_v31  ;;  %v12194_v34 = vadd.f32 %v5645_v10, %v5328_v17  ;;  %v6156_v10 = vrot.slane %v6154_v26, 2  ;;  %v6161_v6 = vrot.slane %v6159_v40, 1  ;;  %v5857_v31 = vsel %vm1016_vm3, %v5855_v20, %v5856_v38  ;;  %v10697_v20 = vld [vmem:[%s11167_s13 + $0x28] sm:$0xff] }
 0x341   : > { %9899 = vmatmul.msk.bf16.gmra.mxu3 %vm397_vm1, %v10647_v14  ;;  %9960 = vmatmul.msk.bf16.gmra.mxu0 %vm397_vm1, %v5584_v49  ;;  %v10696_v14 = vld [vmem:[%s11167_s13 + $0x20] sm:$0xff]  ;;  %v6538_v49 = vsel %vm1699_vm5, %v6536_v42, %v6537_v36  ;;  %v6168_v26 = vshrl.u32 %v10674_v5, 16  ;;  %v6173_v52 = vrot.slane %v6171_v12, 2 }
 0x342   : > { %v6157_v25 = vor.u32 %v6156_v10, %v6153_v21  ;;  %v6165_v7 = vor.u32 %v6164_v4, %v6161_v6 }
 0x343   : > { %v5012_v18 = vpop.f32.mrf.mxu2  ;;  %v6170_v63 = vrot.slane %v6168_v26, 1 }
 0x344   : > { %v5063_v8 = vadd.f32 %v5012_v18, %v4768_v3  ;;  %v5278_v60 = vpop.f32.mrf.mxu3  ;;  %v10662_v18 = vld [vmem:[%s11167_s13 + $0x28] sm:$0xff] }
 0x345   : > { %v4719_v22 = vpop.f32.mrf.mxu1  ;;  %v5858_v21 = vrot.slane %v10662_v18, 1  ;;  %v6174_v10 = vor.u32 %v6173_v52, %v6170_v63 }
 0x346   : > { %v5329_v53 = vadd.f32 %v5278_v60, %v5063_v8  ;;  %v4769_v27 = vadd.f32 %v4719_v22, %v11974_v2  ;;  %v5650_v0 = vpop.f32.mrf.mxu0  ;;  %v6166_v2 = vsel %vm1312_vm4, %v6157_v25, %v6165_v7  ;;  %v10686_v22 = vld [vmem:[%s11167_s13 + $0x28] sm:$0xff]  ;;  %v10675_v25 = vld [vmem:[%s11167_s13 + $0x30] sm:$0xff] }
 0x347   : > { %v6539_v6 = vrot.slane %v10686_v22, 2  ;;  %v5859_v33 = vsel %vm1016_vm3, %v5856_v38, %v5858_v21  ;;  %v6175_v57 = vsel %vm1312_vm4, %v6165_v7, %v6174_v10  ;;  %v6177_v38 = vshrl.u32 %v10675_v25, 16 }
 0x348   : > { %v12205_v59 = vadd.f32 %v5648_v39, %v5329_v53  ;;  %v6180_v7 = vshll.u32 %v10675_v25, 16 }
 0x349   : > { %v6179_v5 = vrot.slane %v6177_v38, 1 }
 0x34b   : > { %v5014_v61 = vpop.f32.mrf.mxu2 }
 0x34c   : > { %v5064_v48 = vadd.f32 %v5014_v61, %v4769_v27  ;;  %v5280_v29 = vpop.f32.mrf.mxu3 }
 0x34d   : > { %v4722_v51 = vpop.f32.mrf.mxu1 }
 0x34e   : > { %v5330_v17 = vadd.f32 %v5280_v29, %v5064_v48  ;;  %v4770_v3 = vadd.f32 %v4722_v51, %v11981_v24  ;;  %v5653_v39 = vpop.f32.mrf.mxu0  ;;  %v6540_v48 = vsel %vm1699_vm5, %v6537_v36, %v6539_v6  ;;  %v6182_v36 = vrot.slane %v6180_v7, 2 }
 0x350   : > { %10010 = vmatmul.msk.bf16.vlgmr.msrb.gmra.mxu1 %vm397_vm1, %v5857_v31  ;;  %10071 = vmatmul.msk.bf16.vlgmr.msrb.gmra.mxu2 %vm397_vm1, %v6166_v2  ;;  %v12215_v11 = vadd.f32 %v5650_v0, %v5330_v17 }
 0x351   : > { %10132 = vmatmul.msk.bf16.vlgmr.msrb.gmra.mxu3 %vm397_vm1, %v6538_v49  ;;  %10193 = vmatmul.msk.bf16.vlgmr.msrb.gmra.mxu0 %vm397_vm1, %v10696_v14  ;;  %v10663_v14 = vld [vmem:[%s11167_s13 + $0x30] sm:$0xff] }
 0x352   : > { %v10687_v49 = vld [vmem:[%s11167_s13 + $0x30] sm:$0xff]  ;;  %v5860_v12 = vrot.slane %v10663_v14, 1 }
 0x353   : > { %v5017_v1 = vpop.f32.mrf.mxu2 }
 0x354   : > { %v5065_v40 = vadd.f32 %v5017_v1, %v4770_v3  ;;  %v5283_v32 = vpop.f32.mrf.mxu3  ;;  %v6183_v1 = vor.u32 %v6182_v36, %v6179_v5  ;;  %v5861_v52 = vsel %vm1016_vm3, %v5858_v21, %v5860_v12 }
 0x355   : > { %v4724_v24 = vpop.f32.mrf.mxu1 }
 0x356   : > { %v5331_v8 = vadd.f32 %v5283_v32, %v5065_v40  ;;  %v4771_v60 = vadd.f32 %v4724_v24, %v11991_v50  ;;  %v5655_v43 = vpop.f32.mrf.mxu0  ;;  %v6541_v40 = vrot.slane %v10687_v49, 2 }
 0x358   : > { %v12222_v58 = vadd.f32 %v5653_v39, %v5331_v8  ;;  %v6184_v8 = vsel %vm1312_vm4, %v6174_v10, %v6183_v1 }
 0x35b   : > { %v5019_v4 = vpop.f32.mrf.mxu2 }
 0x35c   : > { %v5066_v53 = vadd.f32 %v5019_v4, %v4771_v60  ;;  %v5285_v27 = vpop.f32.mrf.mxu3  ;;  %v10698_v60 = vld [vmem:[%s11167_s13 + $0x30] sm:$0xff] }
 0x35d   : > { %v4727_v0 = vpop.f32.mrf.mxu1 }
 0x35e   : > { %v5332_v42 = vadd.f32 %v5285_v27, %v5066_v53  ;;  %v4772_v50 = vadd.f32 %v4727_v0, %v11998_v41  ;;  %v5658_v61 = vpop.f32.mrf.mxu0  ;;  %v6542_v53 = vsel %vm1699_vm5, %v6539_v6, %v6541_v40 }
 0x360   : > { %10011 = vmatmul.msk.bf16.gmra.mxu1 %vm397_vm1, %v5859_v33  ;;  %10072 = vmatmul.msk.bf16.gmra.mxu2 %vm397_vm1, %v6175_v57  ;;  %v12232_v29 = vadd.f32 %v5655_v43, %v5332_v42  ;;  %v10676_v43 = vld [vmem:[%s11167_s13 + $0x38] sm:$0xff] }
 0x361   : > { %10133 = vmatmul.msk.bf16.gmra.mxu3 %vm397_vm1, %v6540_v48  ;;  %10194 = vmatmul.msk.bf16.gmra.mxu0 %vm397_vm1, %v10697_v20  ;;  %v6186_v21 = vshrl.u32 %v10676_v43, 16  ;;  %v6189_v10 = vshll.u32 %v10676_v43, 16  ;;  %v10664_v20 = vld [vmem:[%s11167_s13 + $0x38] sm:$0xff] }
 0x362   : > { %v10688_v48 = vld [vmem:[%s11167_s13 + $0x38] sm:$0xff]  ;;  %v5862_v7 = vrot.slane %v10664_v20, 1 }
 0x363   : > { %v5022_v51 = vpop.f32.mrf.mxu2  ;;  %v6188_v25 = vrot.slane %v6186_v21, 1  ;;  %v6191_v6 = vrot.slane %v6189_v10, 2 }
 0x364   : > { %v5067_v31 = vadd.f32 %v5022_v51, %v4772_v50  ;;  %v5288_v2 = vpop.f32.mrf.mxu3  ;;  %v5863_v36 = vsel %vm1016_vm3, %v5860_v12, %v5862_v7 }
 0x365   : > { %v4729_v41 = vpop.f32.mrf.mxu1  ;;  %v6192_v51 = vor.u32 %v6191_v6, %v6188_v25 }
 0x366   : > { %v5333_v17 = vadd.f32 %v5288_v2, %v5067_v31  ;;  %v4773_v3 = vadd.f32 %v4729_v41, %v12008_v46  ;;  %v5660_v39 = vpop.f32.mrf.mxu0  ;;  %v6543_v31 = vrot.slane %v10688_v48, 2 }
 0x368   : > { %v12239_v26 = vadd.f32 %v5658_v61, %v5333_v17  ;;  %v6193_v17 = vsel %vm1312_vm4, %v6183_v1, %v6192_v51 }
 0x36b   : > { %v5024_v32 = vpop.f32.mrf.mxu2 }
 0x36c   : > { %v5068_v24 = vadd.f32 %v5024_v32, %v4773_v3  ;;  %v5290_v18 = vpop.f32.mrf.mxu3  ;;  %v10699_v3 = vld [vmem:[%s11167_s13 + $0x38] sm:$0xff] }
 0x36d   : > { %v4732_v63 = vpop.f32.mrf.mxu1 }
 0x36e   : > { %v5334_v22 = vadd.f32 %v5290_v18, %v5068_v24  ;;  %v4774_v46 = vadd.f32 %v4732_v63, %v12015_v56  ;;  %v5663_v4 = vpop.f32.mrf.mxu0  ;;  %v6544_v24 = vsel %vm1699_vm5, %v6541_v40, %v6543_v31 }
 0x370   : > { %10012 = vmatmul.msk.bf16.gmra.mxu1 %vm397_vm1, %v5861_v52  ;;  %10073 = vmatmul.msk.bf16.gmra.mxu2 %vm397_vm1, %v6184_v8  ;;  %v12249_v27 = vadd.f32 %v5660_v39, %v5334_v22  ;;  %v10677_v39 = vld [vmem:[%s11167_s13 + $0x40] sm:$0xff] }
 0x371   : > { %10134 = vmatmul.msk.bf16.gmra.mxu3 %vm397_vm1, %v6542_v53  ;;  %10195 = vmatmul.msk.bf16.gmra.mxu0 %vm397_vm1, %v10698_v60  ;;  %v6195_v12 = vshrl.u32 %v10677_v39, 16  ;;  %v6198_v1 = vshll.u32 %v10677_v39, 16  ;;  %v10665_v60 = vld [vmem:[%s11167_s13 + $0x40] sm:$0xff] }
 0x372   : > { %v10689_v53 = vld [vmem:[%s11167_s13 + $0x40] sm:$0xff]  ;;  %v5864_v10 = vrot.slane %v10665_v60, 1 }
 0x373   : > { %v5027_v0 = vpop.f32.mrf.mxu2  ;;  %v6197_v43 = vrot.slane %v6195_v12, 1  ;;  %v6200_v40 = vrot.slane %v6198_v1, 2 }
 0x374   : > { %v5069_v33 = vadd.f32 %v5027_v0, %v4774_v46  ;;  %v5293_v57 = vpop.f32.mrf.mxu3  ;;  %v5865_v6 = vsel %vm1016_vm3, %v5862_v7, %v5864_v10 }
 0x375   : > { %v4734_v56 = vpop.f32.mrf.mxu1  ;;  %v6201_v0 = vor.u32 %v6200_v40, %v6197_v43 }
 0x376   : > { %v5335_v42 = vadd.f32 %v5293_v57, %v5069_v33  ;;  %v4775_v50 = vadd.f32 %v4734_v56, %v12025_v23  ;;  %v5665_v61 = vpop.f32.mrf.mxu0  ;;  %v6545_v33 = vrot.slane %v10689_v53, 2 }
 0x378   : > { %v12256_v38 = vadd.f32 %v5663_v4, %v5335_v42  ;;  %v6202_v42 = vsel %vm1312_vm4, %v6192_v51, %v6201_v0 }
 0x37b   : > { %v5029_v2 = vpop.f32.mrf.mxu2 }
 0x37c   : > { %v5070_v41 = vadd.f32 %v5029_v2, %v4775_v50  ;;  %v5295_v14 = vpop.f32.mrf.mxu3  ;;  %v10700_v50 = vld [vmem:[%s11167_s13 + $0x40] sm:$0xff] }
 0x37d   : > { %v4737_v5 = vpop.f32.mrf.mxu1 }
 0x37e   : > { %v5336_v49 = vadd.f32 %v5295_v14, %v5070_v41  ;;  %v4776_v23 = vadd.f32 %v4737_v5, %v12032_v54  ;;  %v5668_v32 = vpop.f32.mrf.mxu0  ;;  %v6546_v41 = vsel %vm1699_vm5, %v6543_v31, %v6545_v33 }
 0x380   : > { %10013 = vmatmul.msk.bf16.gmra.mxu1 %vm397_vm1, %v5863_v36  ;;  %10074 = vmatmul.msk.bf16.gmra.mxu2 %vm397_vm1, %v6193_v17  ;;  %v12266_v18 = vadd.f32 %v5665_v61, %v5336_v49  ;;  %v10678_v61 = vld [vmem:[%s11167_s13 + $0x48] sm:$0xff] }
 0x381   : > { %10135 = vmatmul.msk.bf16.gmra.mxu3 %vm397_vm1, %v6544_v24  ;;  %10196 = vmatmul.msk.bf16.gmra.mxu0 %vm397_vm1, %v10699_v3  ;;  %v6204_v7 = vshrl.u32 %v10678_v61, 16  ;;  %v6207_v51 = vshll.u32 %v10678_v61, 16  ;;  %v10666_v3 = vld [vmem:[%s11167_s13 + $0x48] sm:$0xff] }
 0x382   : > { %v10690_v24 = vld [vmem:[%s11167_s13 + $0x48] sm:$0xff]  ;;  %v5866_v1 = vrot.slane %v10666_v3, 1 }
 0x383   : > { %v5032_v63 = vpop.f32.mrf.mxu2  ;;  %v6206_v39 = vrot.slane %v6204_v7, 1  ;;  %v6209_v31 = vrot.slane %v6207_v51, 2 }
 0x384   : > { %v5071_v52 = vadd.f32 %v5032_v63, %v4776_v23  ;;  %v5298_v8 = vpop.f32.mrf.mxu3  ;;  %v5867_v40 = vsel %vm1016_vm3, %v5864_v10, %v5866_v1 }
 0x385   : > { %v4739_v54 = vpop.f32.mrf.mxu1  ;;  %v6210_v63 = vor.u32 %v6209_v31, %v6206_v39 }
 0x386   : > { %v5337_v22 = vadd.f32 %v5298_v8, %v5071_v52  ;;  %v4777_v46 = vadd.f32 %v4739_v54, %v12042_v47  ;;  %v5670_v4 = vpop.f32.mrf.mxu0  ;;  %v6547_v52 = vrot.slane %v10690_v24, 2 }
 0x388   : > { %v12273_v21 = vadd.f32 %v5668_v32, %v5337_v22  ;;  %v6211_v22 = vsel %vm1312_vm4, %v6201_v0, %v6210_v63 }
 0x38b   : > { %v5034_v57 = vpop.f32.mrf.mxu2 }
 0x38c   : > { %v5072_v56 = vadd.f32 %v5034_v57, %v4777_v46  ;;  %v5300_v20 = vpop.f32.mrf.mxu3  ;;  %v10701_v46 = vld [vmem:[%s11167_s13 + $0x48] sm:$0xff] }
 0x38d   : > { %v4742_v25 = vpop.f32.mrf.mxu1 }
 0x38e   : > { %v5338_v48 = vadd.f32 %v5300_v20, %v5072_v56  ;;  %v4778_v47 = vadd.f32 %v4742_v25, %v12049_v19  ;;  %v5673_v2 = vpop.f32.mrf.mxu0  ;;  %v6548_v56 = vsel %vm1699_vm5, %v6545_v33, %v6547_v52 }
 0x390   : > { %10014 = vmatmul.msk.bf16.gmra.mxu1 %vm397_vm1, %v5865_v6  ;;  %10075 = vmatmul.msk.bf16.gmra.mxu2 %vm397_vm1, %v6202_v42  ;;  %v12283_v14 = vadd.f32 %v5670_v4, %v5338_v48  ;;  %v10679_v4 = vld [vmem:[%s11167_s13 + $0x50] sm:$0xff] }
 0x391   : > { %10136 = vmatmul.msk.bf16.gmra.mxu3 %vm397_vm1, %v6546_v41  ;;  %10197 = vmatmul.msk.bf16.gmra.mxu0 %vm397_vm1, %v10700_v50  ;;  %v6213_v10 = vshrl.u32 %v10679_v4, 16  ;;  %v6216_v0 = vshll.u32 %v10679_v4, 16  ;;  %v10667_v50 = vld [vmem:[%s11167_s13 + $0x50] sm:$0xff] }
 0x392   : > { %v10691_v41 = vld [vmem:[%s11167_s13 + $0x50] sm:$0xff]  ;;  %v5868_v51 = vrot.slane %v10667_v50, 1 }
 0x393   : > { %v5037_v5 = vpop.f32.mrf.mxu2  ;;  %v6215_v61 = vrot.slane %v6213_v10, 1  ;;  %v6218_v33 = vrot.slane %v6216_v0, 2 }
 0x394   : > { %v5073_v36 = vadd.f32 %v5037_v5, %v4778_v47  ;;  %v5303_v17 = vpop.f32.mrf.mxu3  ;;  %v5869_v31 = vsel %vm1016_vm3, %v5866_v1, %v5868_v51 }
 0x395   : > { %v4744_v19 = vpop.f32.mrf.mxu1  ;;  %v6219_v5 = vor.u32 %v6218_v33, %v6215_v61 }
 0x396   : > { %v5339_v49 = vadd.f32 %v5303_v17, %v5073_v36  ;;  %v4779_v23 = vadd.f32 %v4744_v19, %v12059_v55  ;;  %v5675_v32 = vpop.f32.mrf.mxu0  ;;  %v6549_v36 = vrot.slane %v10691_v41, 2 }
 0x398   : > { %v12290_v12 = vadd.f32 %v5673_v2, %v5339_v49  ;;  %v6220_v49 = vsel %vm1312_vm4, %v6210_v63, %v6219_v5 }
 0x39b   : > { %v5039_v8 = vpop.f32.mrf.mxu2 }
 0x39c   : > { %v5074_v54 = vadd.f32 %v5039_v8, %v4779_v23  ;;  %v5305_v60 = vpop.f32.mrf.mxu3  ;;  %v10702_v23 = vld [vmem:[%s11167_s13 + $0x50] sm:$0xff] }
 0x39d   : > { %v4747_v43 = vpop.f32.mrf.mxu1 }
 0x39e   : > { %v5340_v53 = vadd.f32 %v5305_v60, %v5074_v54  ;;  %v4780_v55 = vadd.f32 %v4747_v43, %v12066_v35  ;;  %v5678_v57 = vpop.f32.mrf.mxu0  ;;  %v6550_v54 = vsel %vm1699_vm5, %v6547_v52, %v6549_v36 }
 0x3a0   : > { %10015 = vmatmul.msk.bf16.gmra.mxu1 %vm397_vm1, %v5867_v40  ;;  %10076 = vmatmul.msk.bf16.gmra.mxu2 %vm397_vm1, %v6211_v22  ;;  %v12300_v20 = vadd.f32 %v5675_v32, %v5340_v53  ;;  %v10680_v32 = vld [vmem:[%s11167_s13 + $0x58] sm:$0xff] }
 0x3a1   : > { %10137 = vmatmul.msk.bf16.gmra.mxu3 %vm397_vm1, %v6548_v56  ;;  %10198 = vmatmul.msk.bf16.gmra.mxu0 %vm397_vm1, %v10701_v46  ;;  %v6222_v1 = vshrl.u32 %v10680_v32, 16  ;;  %v6225_v63 = vshll.u32 %v10680_v32, 16  ;;  %v10668_v46 = vld [vmem:[%s11167_s13 + $0x58] sm:$0xff] }
 0x3a2   : > { %v10692_v56 = vld [vmem:[%s11167_s13 + $0x58] sm:$0xff]  ;;  %v5870_v0 = vrot.slane %v10668_v46, 1 }
 0x3a3   : > { %v5042_v25 = vpop.f32.mrf.mxu2  ;;  %v6224_v4 = vrot.slane %v6222_v1, 1  ;;  %v6227_v52 = vrot.slane %v6225_v63, 2 }
 0x3a4   : > { %v5075_v6 = vadd.f32 %v5042_v25, %v4780_v55  ;;  %v5308_v42 = vpop.f32.mrf.mxu3  ;;  %v5871_v33 = vsel %vm1016_vm3, %v5868_v51, %v5870_v0 }
 0x3a5   : > { %v4749_v35 = vpop.f32.mrf.mxu1  ;;  %v6228_v25 = vor.u32 %v6227_v52, %v6224_v4 }
 0x3a6   : > { %v5341_v48 = vadd.f32 %v5308_v42, %v5075_v6  ;;  %v4781_v47 = vadd.f32 %v4749_v35, %v12076_v37  ;;  %v5680_v2 = vpop.f32.mrf.mxu0  ;;  %v6551_v6 = vrot.slane %v10692_v56, 2 }
 0x3a8   : > { %v12307_v7 = vadd.f32 %v5678_v57, %v5341_v48  ;;  %v6229_v48 = vsel %vm1312_vm4, %v6219_v5, %v6228_v25 }
 0x3ab   : > { %v5044_v17 = vpop.f32.mrf.mxu2 }
 0x3ac   : > { %v5076_v19 = vadd.f32 %v5044_v17, %v4781_v47  ;;  %v5310_v3 = vpop.f32.mrf.mxu3  ;;  %v10703_v47 = vld [vmem:[%s11167_s13 + $0x58] sm:$0xff] }
 0x3ad   : > { %v4752_v39 = vpop.f32.mrf.mxu1 }
 0x3ae   : > { %v5342_v24 = vadd.f32 %v5310_v3, %v5076_v19  ;;  %v4782_v37 = vadd.f32 %v4752_v39, %v12083_v44  ;;  %v5683_v8 = vpop.f32.mrf.mxu0  ;;  %v6552_v19 = vsel %vm1699_vm5, %v6549_v36, %v6551_v6 }
 0x3b0   : > { %10016 = vmatmul.msk.bf16.gmra.mxu1 %vm397_vm1, %v5869_v31  ;;  %10077 = vmatmul.msk.bf16.gmra.mxu2 %vm397_vm1, %v6220_v49  ;;  %v12317_v60 = vadd.f32 %v5680_v2, %v5342_v24  ;;  %v10681_v2 = vld [vmem:[%s11167_s13 + $0x60] sm:$0xff] }
 0x3b1   : > { %10138 = vmatmul.msk.bf16.gmra.mxu3 %vm397_vm1, %v6550_v54  ;;  %10199 = vmatmul.msk.bf16.gmra.mxu0 %vm397_vm1, %v10702_v23  ;;  %v6231_v51 = vshrl.u32 %v10681_v2, 16  ;;  %v6234_v5 = vshll.u32 %v10681_v2, 16  ;;  %v10669_v23 = vld [vmem:[%s11167_s13 + $0x60] sm:$0xff] }
 0x3b2   : > { %v10693_v54 = vld [vmem:[%s11167_s13 + $0x60] sm:$0xff]  ;;  %v5872_v63 = vrot.slane %v10669_v23, 1 }
 0x3b3   : > { %v5047_v43 = vpop.f32.mrf.mxu2  ;;  %v6233_v32 = vrot.slane %v6231_v51, 1  ;;  %v6236_v36 = vrot.slane %v6234_v5, 2 }
 0x3b4   : > { %v5077_v40 = vadd.f32 %v5047_v43, %v4782_v37  ;;  %v5313_v22 = vpop.f32.mrf.mxu3  ;;  %v5873_v52 = vsel %vm1016_vm3, %v5870_v0, %v5872_v63 }
 0x3b5   : > { %v4754_v44 = vpop.f32.mrf.mxu1  ;;  %v6237_v43 = vor.u32 %v6236_v36, %v6233_v32 }
 0x3b6   : > { %v5343_v53 = vadd.f32 %v5313_v22, %v5077_v40  ;;  %v4783_v55 = vadd.f32 %v4754_v44, %v12093_v15  ;;  %v5685_v57 = vpop.f32.mrf.mxu0  ;;  %v6553_v40 = vrot.slane %v10693_v54, 2 }
 0x3b8   : > { %v12324_v10 = vadd.f32 %v5683_v8, %v5343_v53  ;;  %v6238_v53 = vsel %vm1312_vm4, %v6228_v25, %v6237_v43 }
 0x3bb   : > { %v5049_v42 = vpop.f32.mrf.mxu2 }
 0x3bc   : > { %v5078_v35 = vadd.f32 %v5049_v42, %v4783_v55  ;;  %v5315_v50 = vpop.f32.mrf.mxu3  ;;  %v10704_v55 = vld [vmem:[%s11167_s13 + $0x60] sm:$0xff] }
 0x3bd   : > { %v4757_v61 = vpop.f32.mrf.mxu1 }
 0x3be   : > { %v5344_v41 = vadd.f32 %v5315_v50, %v5078_v35  ;;  %v4784_v15 = vadd.f32 %v4757_v61, %v12100_v62  ;;  %v5688_v17 = vpop.f32.mrf.mxu0  ;;  %v6554_v35 = vsel %vm1699_vm5, %v6551_v6, %v6553_v40 }
 0x3c0   : > { %10017 = vmatmul.msk.bf16.gmra.mxu1 %vm397_vm1, %v5871_v33  ;;  %10078 = vmatmul.msk.bf16.gmra.mxu2 %vm397_vm1, %v6229_v48  ;;  %v12334_v3 = vadd.f32 %v5685_v57, %v5344_v41  ;;  %v10682_v57 = vld [vmem:[%s11167_s13 + $0x68] sm:$0xff] }
 0x3c1   : > { %10139 = vmatmul.msk.bf16.gmra.mxu3 %vm397_vm1, %v6552_v19  ;;  %10200 = vmatmul.msk.bf16.gmra.mxu0 %vm397_vm1, %v10703_v47  ;;  %v6240_v0 = vshrl.u32 %v10682_v57, 16  ;;  %v6243_v25 = vshll.u32 %v10682_v57, 16  ;;  %v10670_v47 = vld [vmem:[%s11167_s13 + $0x68] sm:$0xff] }
 0x3c2   : > { %v10694_v19 = vld [vmem:[%s11167_s13 + $0x68] sm:$0xff]  ;;  %v5874_v5 = vrot.slane %v10670_v47, 1 }
 0x3c3   : > { %v5052_v39 = vpop.f32.mrf.mxu2  ;;  %v6242_v2 = vrot.slane %v6240_v0, 1  ;;  %v6245_v6 = vrot.slane %v6243_v25, 2  ;;  %v6060_v0 = vld [vmem:[%s11167_s13 + $0x78] sm:$0x3] }
 0x3c4   : > { %v5079_v31 = vadd.f32 %v5052_v39, %v4784_v15  ;;  %v5318_v49 = vpop.f32.mrf.mxu3  ;;  %v5875_v36 = vsel %vm1016_vm3, %v5872_v63, %v5874_v5 }
 0x3c5   : > { %v4759_v62 = vpop.f32.mrf.mxu1  ;;  %v6246_v39 = vor.u32 %v6245_v6, %v6242_v2 }
 0x3c6   : > { %v5345_v24 = vadd.f32 %v5318_v49, %v5079_v31  ;;  %v4785_v37 = vadd.f32 %v4759_v62, %v12110_v9  ;;  %v5690_v8 = vpop.f32.mrf.mxu0  ;;  %v6555_v31 = vrot.slane %v10694_v19, 2 }
 0x3c8   : > { %v12341_v1 = vadd.f32 %v5688_v17, %v5345_v24  ;;  %v6247_v24 = vsel %vm1312_vm4, %v6237_v43, %v6246_v39 }
 0x3cb   : > { %v5054_v22 = vpop.f32.mrf.mxu2 }
 0x3cc   : > { %v5080_v44 = vadd.f32 %v5054_v22, %v4785_v37  ;;  %v5320_v46 = vpop.f32.mrf.mxu3  ;;  %v10705_v37 = vld [vmem:[%s11167_s13 + $0x68] sm:$0xff] }
 0x3cd   : > { %v5928_v4 = vpop.f32.mrf.mxu1 }
 0x3ce   : > { %v5346_v56 = vadd.f32 %v5320_v46, %v5080_v44  ;;  %v5988_v9 = vadd.f32 %v5928_v4, %v12117_v16  ;;  %v6875_v42 = vpop.f32.mrf.mxu0  ;;  %v6556_v44 = vsel %vm1699_vm5, %v6553_v40, %v6555_v31 }
 0x3d0   : > { %10018 = vmatmul.msk.bf16.gmra.mxu1 %vm397_vm1, %v5873_v52  ;;  %10079 = vmatmul.msk.bf16.gmra.mxu2 %vm397_vm1, %v6238_v53  ;;  %v12351_v50 = vadd.f32 %v5690_v8, %v5346_v56  ;;  %v10683_v8 = vld [vmem:[%s11167_s13 + $0x70] sm:$0xff] }
 0x3d1   : > { %10140 = vmatmul.msk.bf16.gmra.mxu3 %vm397_vm1, %v6554_v35  ;;  %10201 = vmatmul.msk.bf16.gmra.mxu0 %vm397_vm1, %v10704_v55  ;;  %v6249_v63 = vshrl.u32 %v10683_v8, 16  ;;  %v6252_v43 = vshll.u32 %v10683_v8, 16  ;;  %v10671_v55 = vld [vmem:[%s11167_s13 + $0x70] sm:$0xff] }
 0x3d2   : > { %v10695_v35 = vld [vmem:[%s11167_s13 + $0x70] sm:$0xff] }
 0x3d3   : > { %v6314_v61 = vpop.f32.mrf.mxu2  ;;  %v6251_v40 = vrot.slane %v6249_v63, 1  ;;  %v6254_v57 = vrot.slane %v6252_v43, 2 }
 0x3d4   : > { %v6374_v33 = vadd.f32 %v6314_v61, %v5988_v9  ;;  %v6609_v48 = vpop.f32.mrf.mxu3  ;;  %v5876_v61 = vrot.slane %v10671_v55, 1 }
 0x3d5   : > { %v5930_v16 = vpop.f32.mrf.mxu1 }
 0x3d6   : > { %v6669_v41 = vadd.f32 %v6609_v48, %v6374_v33  ;;  %v5989_v15 = vadd.f32 %v5930_v16, %v12127_v45  ;;  %v6877_v17 = vpop.f32.mrf.mxu0  ;;  %v6255_v33 = vor.u32 %v6254_v57, %v6251_v40  ;;  %v6136_v48 = vunpack.c.l.b16 %v6060_v0 }
 0x3d7   : > { %v6557_v16 = vrot.slane %v10695_v35, 2 }
 0x3d8   : > { %v12358_v51 = vadd.f32 %v6875_v42, %v6669_v41  ;;  %v6149_v19 = vpack.c.b16 %v6136_v48, %v6136_v48 }
 0x3da   : > { %v6261_v8 = vshll.u32 %v6149_v19, 16 }
 0x3db   : > { %v6316_v49 = vpop.f32.mrf.mxu2 }
 0x3dc   : > { %v6375_v62 = vadd.f32 %v6316_v49, %v5989_v15  ;;  %v6611_v23 = vpop.f32.mrf.mxu3  ;;  %v5877_v15 = vsel %vm1016_vm3, %v5874_v5, %v5876_v61  ;;  %v6263_v43 = vrot.slane %v6261_v8, 2 }
 0x3dd   : > { %v5933_v32 = vpop.f32.mrf.mxu1 }
 0x3de   : > { %v6670_v54 = vadd.f32 %v6611_v23, %v6375_v62  ;;  %v5990_v45 = vadd.f32 %v5933_v32, %v12140_v30  ;;  %v6880_v22 = vpop.f32.mrf.mxu0  ;;  %v6558_v32 = vsel %vm1699_vm5, %v6555_v31, %v6557_v16 }
 0x3e0   : > { %10019 = vmatmul.msk.bf16.gmra.mxu1 %vm397_vm1, %v5875_v36  ;;  %10080 = vmatmul.msk.bf16.gmra.mxu2 %vm397_vm1, %v6247_v24  ;;  %v12368_v46 = vadd.f32 %v6877_v17, %v6670_v54  ;;  %v6256_v17 = vsel %vm1312_vm4, %v6246_v39, %v6255_v33  ;;  %v5765_v36 = vld [vmem:[%s11167_s13 + $0x78] sm:$0x1]  ;;  %v6258_v39 = vshrl.u32 %v6149_v19, 16 }
 0x3e1   : > { %10141 = vmatmul.msk.bf16.gmra.mxu3 %vm397_vm1, %v6556_v44  ;;  %10202 = vmatmul.msk.bf16.gmra.mxu0 %vm397_vm1, %v10705_v37  ;;  %v6446_v24 = vld [vmem:[%s11167_s13 + $0x78] sm:$0x3]  ;;  %v5841_v5 = vunpack.c.l.b16 %v5765_v36 }
 0x3e2   : > { %v6260_v63 = vrot.slane %v6258_v39, 1 }
 0x3e3   : > { %v6319_v4 = vpop.f32.mrf.mxu2  ;;  %v5854_v44 = vpack.c.b16 %v5841_v5, %v5841_v5 }
 0x3e4   : > { %v6376_v52 = vadd.f32 %v6319_v4, %v5990_v45  ;;  %v6614_v30 = vpop.f32.mrf.mxu3  ;;  %v6264_v57 = vor.u32 %v6263_v43, %v6260_v63 }
 0x3e5   : > { %v5935_v53 = vpop.f32.mrf.mxu1  ;;  %v5878_v40 = vrot.slane %v5854_v44, 1 }
 0x3e6   : > { %v6671_v56 = vadd.f32 %v6614_v30, %v6376_v52  ;;  %v5991_v9 = vadd.f32 %v5935_v53, %v12157_v28  ;;  %v6882_v42 = vpop.f32.mrf.mxu0  ;;  %v10706_v28 = vld [vmem:[%s11167_s13 + $0x70] sm:$0xff] }
 0x3e8   : > { %v12376_v25 = vadd.f32 %v6880_v22, %v6671_v56  ;;  %v10330_v56 = vld [vmem:[%s11167_s13 + $0x20] sm:$0xe] }
 0x3eb   : > { %v6321_v47 = vpop.f32.mrf.mxu2 }
 0x3ec   : > { %v6377_v2 = vadd.f32 %v6321_v47, %v5991_v9  ;;  %v6616_v6 = vpop.f32.mrf.mxu3  ;;  %v10732_v9 = vld [vmem:[%s11167_s13 + $0x20] sm:$0xf0] }
 0x3ed   : > { %v5938_v41 = vpop.f32.mrf.mxu1  ;;  %v10708_v47 = vld [vmem:[%s11167_s13 + $0x20] sm:$0xff] }
 0x3ee   : > { %v6672_v49 = vadd.f32 %v6616_v6, %v6377_v2  ;;  %v5992_v62 = vadd.f32 %v5938_v41, %v12179_v13  ;;  %v6885_v23 = vpop.f32.mrf.mxu0  ;;  %v6522_v13 = vunpack.c.l.b16 %v6446_v24  ;;  %v10331_v2 = vor.u32 %v10732_v9, %v10330_v56 }
 0x3ef   : > { %v6265_v41 = vsel %vm1312_vm4, %v6255_v33, %v6264_v57  ;;  %v7098_v8 = vshrl.u32 %v10708_v47, 16 }
 0x3f0   : > { %10020 = vmatmul.msk.bf16.gmra.mxu1 %vm397_vm1, %v5877_v15  ;;  %10081 = vmatmul.msk.bf16.gmra.mxu2 %vm397_vm1, %v6256_v17  ;;  %v12387_v37 = vadd.f32 %v6882_v42, %v6672_v49  ;;  %v6535_v53 = vpack.c.b16 %v6522_v13, %v6522_v13  ;;  %v10707_v15 = vld [vmem:[%s11167_s13 + $0x78] sm:$0xff]  ;;  %v10733_v17 = vld [vmem:[%s11167_s13 + $0x28] sm:$0xff]  ;;  %v7763_v33 = vshrl.u32 %v10331_v2, 16  ;;  %v10391_v13 = vld [vmem:[%s11167_s13 + $0x20] sm:$0xc] }
 0x3f1   : > { %10142 = vmatmul.msk.bf16.gmra.mxu3 %vm397_vm1, %v6558_v32  ;;  %10203 = vmatmul.msk.bf16.gmra.mxu0 %vm397_vm1, %v10706_v28  ;;  %v7766_v32 = vshll.u32 %v10331_v2, 16  ;;  %v7771_v24 = vshrl.u32 %v10733_v17, 16  ;;  %v7774_v5 = vshll.u32 %v10733_v17, 16 }
 0x3f2   : > { %v6559_v42 = vrot.slane %v6535_v53, 2 }
 0x3f3   : > { %v6324_v54 = vpop.f32.mrf.mxu2  ;;  %v7773_v53 = vrot.slane %v7771_v24, 1 }
 0x3f4   : > { %v6378_v31 = vadd.f32 %v6324_v54, %v5992_v62  ;;  %v6619_v45 = vpop.f32.mrf.mxu3  ;;  %v6560_v62 = vsel %vm1699_vm5, %v6557_v16, %v6559_v42  ;;  %v10720_v16 = vld [vmem:[%s11167_s13 + $0x20] sm:$0xf0]  ;;  %v12422_v42 = vld [vmem:[%s11167_s13 + $0x28] sm:$0xff] }
 0x3f5   : > { %v5940_v22 = vpop.f32.mrf.mxu1  ;;  %v10744_v54 = vld [vmem:[%s11167_s13 + $0x20] sm:$0xf0] }
 0x3f6   : > { %v6673_v4 = vadd.f32 %v6619_v45, %v6378_v31  ;;  %v5993_v52 = vadd.f32 %v5940_v22, %v12194_v34  ;;  %v6887_v30 = vpop.f32.mrf.mxu0  ;;  %v5879_v34 = vsel %vm1016_vm3, %v5876_v61, %v5878_v40  ;;  %v7100_v61 = vshll.u32 %v10708_v47, 16 }
 0x3f7   : > { %v7776_v40 = vrot.slane %v7774_v5, 2 }
 0x3f8   : > { %v12392_v55 = vadd.f32 %v6885_v23, %v6673_v4  ;;  %v12406_v23 = vld [vmem:[%s11167_s13 + $0x28] sm:$0xff]  ;;  %v7102_v22 = vrot.slane %v7100_v61, 1 }
 0x3f9   : > { %v7105_v44 = vshll.u32 %v12406_v23, 16  ;;  %v12418_v4 = vld [vmem:[%s11167_s13 + $0x28] sm:$0xff] }
 0x3fa   : > { %v7103_v2 = vor.u32 %v7102_v22, %v7098_v8  ;;  %v10734_v8 = vld [vmem:[%s11167_s13 + $0x30] sm:$0xff] }
 0x3fb   : > { %v6326_v35 = vpop.f32.mrf.mxu2 }
 0x3fc   : > { %v6379_v0 = vadd.f32 %v6326_v35, %v5993_v52  ;;  %v6621_v48 = vpop.f32.mrf.mxu3  ;;  %v7765_v52 = vrot.slane %v7763_v33, 1  ;;  %v10392_v35 = vor.u32 %v10744_v54, %v10391_v13  ;;  %v12444_v54 = vld [vmem:[%s11167_s13 + $0x30] sm:$0xff] }
 0x3fd   : > { %v5943_v6 = vpop.f32.mrf.mxu1 }
 0x3fe   : > { %v6674_v28 = vadd.f32 %v6621_v48, %v6379_v0  ;;  %v5994_v19 = vadd.f32 %v5943_v6, %v12205_v59  ;;  %v6890_v49 = vpop.f32.mrf.mxu0  ;;  %v10269_v59 = vld [vmem:[%s11167_s13 + $0x20] sm:$0xe]  ;;  %v11045_v48 = vmov 0   ;;  %v7107_v6 = vrot.slane %v7105_v44, 1 }
 0x3ff   : > { %v10270_v63 = vor.u32 %v10720_v16, %v10269_v59  ;;  %v8453_v0 = vld [vmem:[%s12964_s3] sm:$0xff]  ;;  %10901 = vset.pattern.permute.xlu0 %v11045_v48  ;;  %10902 = vset.pattern.permute.xlu1 %v11045_v48  ;;  %v8148_v17 = vrot.slane %v10392_v35, 2  ;;  %v8455_v35 = vld [vmem:[%s12964_s3 + $0x10] sm:$0xff] }
 0x400   : > { %10021 = vmatmul.msk.bf16.gmra.mxu1 %vm397_vm1, %v5879_v34  ;;  %10082 = vmatmul.msk.bf16.gmra.mxu2 %vm397_vm1, %v6265_v41  ;;  %v12408_v36 = vadd.f32 %v6887_v30, %v6674_v28  ;;  %v7768_v30 = vrot.slane %v7766_v32, 2  ;;  %v8149_v28 = vrot.slane %v12422_v42, 2  ;;  %v7108_v32 = vsel %vm645_vm2, %v7103_v2, %v7107_v6  ;;  %v10746_v42 = vld [vmem:[%s11167_s13 + $0x30] sm:$0xff] }
 0x401   : > { %10143 = vmatmul.msk.bf16.gmra.mxu3 %vm397_vm1, %v6560_v62  ;;  %10204 = vmatmul.msk.bf16.gmra.mxu0 %vm397_vm1, %v10707_v15  ;;  %v7467_v34 = vrot.slane %v10270_v63, 1  ;;  %v7777_v15 = vor.u32 %v7776_v40, %v7773_v53 }
 0x402   : > { %8479 = vperm.xlu0 %10901, %v8453_v0   ;;  %10903 = vset.pattern.permute.xlu2 %v11045_v48  ;;  %v7769_v41 = vor.u32 %v7768_v30, %v7765_v52  ;;  %v7113_v52 = vshll.u32 %v12444_v54, 16  ;;  %v12452_v30 = vld [vmem:[%s11167_s13 + $0x30] sm:$0xff] }
 0x403   : > { %v6329_v39 = vpop.f32.mrf.mxu2  ;;  %8489 = vperm.xlu1 %10902, %v8455_v35   ;;  %v7470_v2 = vrot.slane %v12452_v30, 1 }
 0x404   : > { %v6380_v31 = vadd.f32 %v6329_v39, %v5994_v19  ;;  %v6624_v45 = vpop.f32.mrf.mxu3  ;;  %v7778_v5 = vsel %vm1312_vm4, %v7769_v41, %v7777_v15  ;;  %v8150_v39 = vsel %vm1699_vm5, %v8148_v17, %v8149_v28  ;;  %v8151_v41 = vrot.slane %v10746_v42, 2 }
 0x405   : > { %v5945_v43 = vpop.f32.mrf.mxu1 }
 0x406   : > { %v6675_v57 = vadd.f32 %v6624_v45, %v6380_v31  ;;  %v5995_v56 = vadd.f32 %v5945_v43, %v12215_v11  ;;  %v6892_v9 = vpop.f32.mrf.mxu0  ;;  %v7468_v11 = vrot.slane %v12418_v4, 1  ;;  %v7780_v31 = vshrl.u32 %v10734_v8, 16 }
 0x407   : > { %v7783_v45 = vshll.u32 %v10734_v8, 16  ;;  %v7109_v4 = vshrl.u32 %v12406_v23, 16  ;;  %v7115_v23 = vrot.slane %v7113_v52, 1 }
 0x408   : > { %v12427_v47 = vadd.f32 %v6890_v49, %v6675_v57  ;;  %v7469_v49 = vsel %vm1016_vm3, %v7467_v34, %v7468_v11 }
 0x409   : > { %v7111_v48 = vor.u32 %v7109_v4, %v7107_v6 }
 0x40b   : > { %v6331_v19 = vpop.f32.mrf.mxu2 }
 0x40c   : > { %v6381_v62 = vadd.f32 %v6331_v19, %v5995_v56  ;;  %v6626_v61 = vpop.f32.mrf.mxu3  ;;  %v7782_v56 = vrot.slane %v7780_v31, 1 }
 0x40d   : > { %v5948_v33 = vpop.f32.mrf.mxu1 }
 0x40e   : > { %v6676_v59 = vadd.f32 %v6626_v61, %v6381_v62  ;;  %v5996_v16 = vadd.f32 %v5948_v33, %v12222_v58  ;;  %v6895_v24 = vpop.f32.mrf.mxu0  ;;  %v8454_v58 = vld [vmem:[%s12964_s3 + $0x8] sm:$0xff]  ;;  %v7116_v61 = vsel %vm645_vm2, %v7111_v48, %v7115_v23  ;;  %v7471_v33 = vsel %vm1016_vm3, %v7468_v11, %v7470_v2  ;;  %v10711_v11 = vld [vmem:[%s11167_s13 + $0x38] sm:$0xff] }
 0x40f   : > { %8484 = vperm.xlu0 %10901, %v8454_v58  }
 0x410   : > { %10254 = vmatmul.msk.bf16.vlgmr.msra.gmra.mxu1 %vm397_vm1, %v7108_v32  ;;  %10315 = vmatmul.msk.bf16.vlgmr.msra.gmra.mxu2 %vm397_vm1, %v7469_v49  ;;  %v12439_v13 = vadd.f32 %v6892_v9, %v6676_v59  ;;  %v7785_v9 = vrot.slane %v7783_v45, 2  ;;  %v7117_v45 = vshrl.u32 %v12444_v54, 16 }
 0x411   : > { %10376 = vmatmul.msk.bf16.vlgmr.msra.gmra.mxu3 %vm397_vm1, %v7778_v5  ;;  %10437 = vmatmul.msk.bf16.vlgmr.msra.gmra.mxu0 %vm397_vm1, %v8150_v39 }
 0x412   : > { %v7786_v34 = vor.u32 %v7785_v9, %v7782_v56 }
 0x413   : > { %v6334_v22 = vpop.f32.mrf.mxu2 }
 0x414   : > { %v6382_v44 = vadd.f32 %v6334_v22, %v5996_v16  ;;  %v6629_v63 = vpop.f32.mrf.mxu3  ;;  %v7787_v6 = vsel %vm1312_vm4, %v7777_v15, %v7786_v34  ;;  %v8152_v16 = vsel %vm1699_vm5, %v8149_v28, %v8151_v41  ;;  %v7121_v22 = vshll.u32 %v10711_v11, 16 }
 0x415   : > { %v5950_v43 = vpop.f32.mrf.mxu1 }
 0x416   : > { %v6677_v53 = vadd.f32 %v6629_v63, %v6382_v44  ;;  %v5997_v40 = vadd.f32 %v5950_v43, %v12232_v29  ;;  %v6897_v57 = vpop.f32.mrf.mxu0  ;;  %v10723_v44 = vld [vmem:[%s11167_s13 + $0x38] sm:$0xff]  ;;  %v7123_v56 = vrot.slane %v7121_v22, 1  ;;  %v12505_v22 = vld [vmem:[%s11167_s13 + $0x40] sm:$0xff] }
 0x417   : > { %v7472_v9 = vrot.slane %v10723_v44, 1  ;;  %v8459_v44 = vld [vmem:[%s12964_s3 + $0x30] sm:$0xff] }
 0x418   : > { %v12459_v0 = vadd.f32 %v6895_v24, %v6677_v53  ;;  %v10735_v24 = vld [vmem:[%s11167_s13 + $0x38] sm:$0xff]  ;;  %8509 = vperm.xlu0 %10901, %v8459_v44  }
 0x419   : > { %v7789_v15 = vshrl.u32 %v10735_v24, 16  ;;  %v7792_v28 = vshll.u32 %v10735_v24, 16  ;;  %v10747_v53 = vld [vmem:[%s11167_s13 + $0x38] sm:$0xff] }
 0x41a   : > { %v8153_v35 = vrot.slane %v10747_v53, 2 }
 0x41b   : > { %v6336_v17 = vpop.f32.mrf.mxu2  ;;  %v7791_v52 = vrot.slane %v7789_v15, 1  ;;  %v7794_v30 = vrot.slane %v7792_v28, 2  ;;  %v12501_v28 = vld [vmem:[%s11167_s13 + $0x40] sm:$0xff] }
 0x41c   : > { %v6383_v29 = vadd.f32 %v6336_v17, %v5997_v40  ;;  %v6631_v19 = vpop.f32.mrf.mxu3 }
 0x41d   : > { %v5953_v62 = vpop.f32.mrf.mxu1  ;;  %v7795_v42 = vor.u32 %v7794_v30, %v7791_v52 }
 0x41e   : > { %v6678_v32 = vadd.f32 %v6631_v19, %v6383_v29  ;;  %v5998_v49 = vadd.f32 %v5953_v62, %v12239_v26  ;;  %v6900_v59 = vpop.f32.mrf.mxu0  ;;  %v8456_v26 = vld [vmem:[%s12964_s3 + $0x18] sm:$0xff] }
 0x41f   : > { %8494 = vperm.xlu1 %10902, %v8456_v26   ;;  %v7125_v26 = vshrl.u32 %v10711_v11, 16 }
 0x420   : > { %10255 = vmatmul.msk.bf16.gmra.mxu1 %vm397_vm1, %v7116_v61  ;;  %10316 = vmatmul.msk.bf16.gmra.mxu2 %vm397_vm1, %v7471_v33  ;;  %v12470_v5 = vadd.f32 %v6897_v57, %v6678_v32  ;;  %v7119_v57 = vor.u32 %v7117_v45, %v7115_v23  ;;  %v7796_v23 = vsel %vm1312_vm4, %v7786_v34, %v7795_v42 }
 0x421   : > { %10377 = vmatmul.msk.bf16.gmra.mxu3 %vm397_vm1, %v7787_v6  ;;  %10438 = vmatmul.msk.bf16.gmra.mxu0 %vm397_vm1, %v8152_v16  ;;  %v8154_v32 = vsel %vm1699_vm5, %v8151_v41, %v8153_v35  ;;  %v7127_v11 = vor.u32 %v7125_v26, %v7123_v56 }
 0x422   : > { %v7124_v19 = vsel %vm645_vm2, %v7119_v57, %v7123_v56 }
 0x423   : > { %v6339_v39 = vpop.f32.mrf.mxu2 }
 0x424   : > { %v6384_v8 = vadd.f32 %v6339_v39, %v5998_v49  ;;  %v6634_v58 = vpop.f32.mrf.mxu3  ;;  %v10736_v49 = vld [vmem:[%s11167_s13 + $0x40] sm:$0xff] }
 0x425   : > { %v5955_v31 = vpop.f32.mrf.mxu1  ;;  %v7801_v6 = vshll.u32 %v10736_v49, 16 }
 0x426   : > { %v6679_v63 = vadd.f32 %v6634_v58, %v6384_v8  ;;  %v5999_v43 = vadd.f32 %v5955_v31, %v12249_v27  ;;  %v6902_v4 = vpop.f32.mrf.mxu0  ;;  %v7473_v27 = vsel %vm1016_vm3, %v7470_v2, %v7472_v9  ;;  %v12497_v2 = vld [vmem:[%s11167_s13 + $0x40] sm:$0xff] }
 0x427   : > { %v7129_v15 = vshll.u32 %v12497_v2, 16  ;;  %v7803_v45 = vrot.slane %v7801_v6, 2 }
 0x428   : > { %v12482_v40 = vadd.f32 %v6900_v59, %v6679_v63 }
 0x42b   : > { %v6341_v48 = vpop.f32.mrf.mxu2 }
 0x42c   : > { %v6385_v17 = vadd.f32 %v6341_v48, %v5999_v43  ;;  %v6636_v54 = vpop.f32.mrf.mxu3  ;;  %v7131_v43 = vrot.slane %v7129_v15, 1 }
 0x42d   : > { %v5958_v29 = vpop.f32.mrf.mxu1 }
 0x42e   : > { %v6680_v62 = vadd.f32 %v6636_v54, %v6385_v17  ;;  %v6000_v61 = vadd.f32 %v5958_v29, %v12256_v38  ;;  %v6905_v33 = vpop.f32.mrf.mxu0  ;;  %v7798_v38 = vshrl.u32 %v10736_v49, 16  ;;  %v7132_v17 = vsel %vm645_vm2, %v7127_v11, %v7131_v43 }
 0x430   : > { %10256 = vmatmul.msk.bf16.gmra.mxu1 %vm397_vm1, %v7124_v19  ;;  %10317 = vmatmul.msk.bf16.gmra.mxu2 %vm397_vm1, %v7473_v27  ;;  %v12492_v59 = vadd.f32 %v6902_v4, %v6680_v62  ;;  %v7800_v31 = vrot.slane %v7798_v38, 1  ;;  %v7474_v4 = vrot.slane %v12501_v28, 1 }
 0x431   : > { %10378 = vmatmul.msk.bf16.gmra.mxu3 %vm397_vm1, %v7796_v23  ;;  %10439 = vmatmul.msk.bf16.gmra.mxu0 %vm397_vm1, %v8154_v32 }
 0x432   : > { %v7804_v52 = vor.u32 %v7803_v45, %v7800_v31  ;;  %v7475_v54 = vsel %vm1016_vm3, %v7472_v9, %v7474_v4  ;;  %v12527_v9 = vld [vmem:[%s11167_s13 + $0x48] sm:$0xff] }
 0x433   : > { %v6344_v34 = vpop.f32.mrf.mxu2 }
 0x434   : > { %v6386_v16 = vadd.f32 %v6344_v34, %v6000_v61  ;;  %v6639_v41 = vpop.f32.mrf.mxu3  ;;  %v7805_v27 = vsel %vm1312_vm4, %v7795_v42, %v7804_v52  ;;  %v10737_v61 = vld [vmem:[%s11167_s13 + $0x48] sm:$0xff]  ;;  %v8460_v42 = vld [vmem:[%s12964_s3 + $0x38] sm:$0xff]  ;;  %v7133_v34 = vshrl.u32 %v12497_v2, 16 }
 0x435   : > { %v5960_v24 = vpop.f32.mrf.mxu1  ;;  %v7810_v23 = vshll.u32 %v10737_v61, 16  ;;  %8514 = vperm.xlu1 %10902, %v8460_v42  }
 0x436   : > { %v6681_v39 = vadd.f32 %v6639_v41, %v6386_v16  ;;  %v6001_v8 = vadd.f32 %v5960_v24, %v12266_v18  ;;  %v6907_v58 = vpop.f32.mrf.mxu0  ;;  %v8155_v18 = vrot.slane %v12505_v22, 2  ;;  %v7137_v16 = vshll.u32 %v12527_v9, 16  ;;  %v12538_v41 = vld [vmem:[%s11167_s13 + $0x48] sm:$0xff] }
 0x437   : > { %v7135_v45 = vor.u32 %v7133_v34, %v7131_v43  ;;  %v7476_v22 = vrot.slane %v12538_v41, 1 }
 0x438   : > { %v12510_v63 = vadd.f32 %v6905_v33, %v6681_v39  ;;  %v8156_v62 = vsel %vm1699_vm5, %v8153_v35, %v8155_v18  ;;  %v7807_v35 = vshrl.u32 %v10737_v61, 16  ;;  %v7812_v39 = vrot.slane %v7810_v23, 2 }
 0x439   : > { %v7139_v2 = vrot.slane %v7137_v16, 1  ;;  %v7141_v23 = vshrl.u32 %v12527_v9, 16 }
 0x43a   : > { %v7809_v28 = vrot.slane %v7807_v35, 1 }
 0x43b   : > { %v6346_v30 = vpop.f32.mrf.mxu2  ;;  %v7143_v9 = vor.u32 %v7141_v23, %v7139_v2 }
 0x43c   : > { %v6387_v53 = vadd.f32 %v6346_v30, %v6001_v8  ;;  %v6641_v57 = vpop.f32.mrf.mxu3  ;;  %v12542_v8 = vld [vmem:[%s11167_s13 + $0x48] sm:$0xff]  ;;  %v7813_v44 = vor.u32 %v7812_v39, %v7809_v28 }
 0x43d   : > { %v5963_v48 = vpop.f32.mrf.mxu1  ;;  %v8157_v11 = vrot.slane %v12542_v8, 2 }
 0x43e   : > { %v6682_v29 = vadd.f32 %v6641_v57, %v6387_v53  ;;  %v6002_v19 = vadd.f32 %v5963_v48, %v12273_v21  ;;  %v6910_v56 = vpop.f32.mrf.mxu0  ;;  %v8457_v21 = vld [vmem:[%s12964_s3 + $0x20] sm:$0xff]  ;;  %v7140_v48 = vsel %vm645_vm2, %v7135_v45, %v7139_v2 }
 0x43f   : > { %8499 = vperm.xlu2 %10903, %v8457_v21  }
 0x440   : > { %10257 = vmatmul.msk.bf16.gmra.mxu1 %vm397_vm1, %v7132_v17  ;;  %10318 = vmatmul.msk.bf16.gmra.mxu2 %vm397_vm1, %v7475_v54  ;;  %v12522_v33 = vadd.f32 %v6907_v58, %v6682_v29  ;;  %v8458_v58 = vld [vmem:[%s12964_s3 + $0x28] sm:$0xff]  ;;  %v7477_v17 = vsel %vm1016_vm3, %v7474_v4, %v7476_v22  ;;  %v12564_v4 = vld [vmem:[%s11167_s13 + $0x50] sm:$0xff] }
 0x441   : > { %10379 = vmatmul.msk.bf16.gmra.mxu3 %vm397_vm1, %v7805_v27  ;;  %10440 = vmatmul.msk.bf16.gmra.mxu0 %vm397_vm1, %v8156_v62  ;;  %v10738_v27 = vld [vmem:[%s11167_s13 + $0x50] sm:$0xff] }
 0x443   : > { %v6349_v32 = vpop.f32.mrf.mxu2 }
 0x444   : > { %v6388_v49 = vadd.f32 %v6349_v32, %v6002_v19  ;;  %v6644_v38 = vpop.f32.mrf.mxu3  ;;  %v7814_v19 = vsel %vm1312_vm4, %v7804_v52, %v7813_v44  ;;  %v7816_v52 = vshrl.u32 %v10738_v27, 16  ;;  %v7145_v32 = vshll.u32 %v12564_v4, 16 }
 0x445   : > { %v5965_v6 = vpop.f32.mrf.mxu1 }
 0x446   : > { %v6683_v24 = vadd.f32 %v6644_v38, %v6388_v49  ;;  %v6003_v26 = vadd.f32 %v5965_v6, %v12283_v14  ;;  %v6912_v15 = vpop.f32.mrf.mxu0  ;;  %v12572_v49 = vld [vmem:[%s11167_s13 + $0x50] sm:$0xff]  ;;  %v7818_v16 = vrot.slane %v7816_v52, 1  ;;  %v7147_v28 = vrot.slane %v7145_v32, 1 }
 0x447   : > { %8504 = vperm.xlu2 %10903, %v8458_v58   ;;  %v7478_v39 = vrot.slane %v12572_v49, 1 }
 0x448   : > { %v12547_v31 = vadd.f32 %v6910_v56, %v6683_v24  ;;  %v8158_v56 = vsel %vm1699_vm5, %v8155_v18, %v8157_v11  ;;  %v7819_v18 = vshll.u32 %v10738_v27, 16  ;;  %v12576_v24 = vld [vmem:[%s11167_s13 + $0x50] sm:$0xff] }
 0x44a   : > { %v7821_v41 = vrot.slane %v7819_v18, 2  ;;  %v7149_v18 = vshrl.u32 %v12564_v4, 16 }
 0x44b   : > { %v6351_v14 = vpop.f32.mrf.mxu2 }
 0x44c   : > { %v6389_v30 = vadd.f32 %v6351_v14, %v6003_v26  ;;  %v6646_v53 = vpop.f32.mrf.mxu3  ;;  %v8463_v26 = vld [vmem:[%s12964_s3 + $0x50] sm:$0xff]  ;;  %v7822_v8 = vor.u32 %v7821_v41, %v7818_v16  ;;  %v7151_v4 = vor.u32 %v7149_v18, %v7147_v28 }
 0x44d   : > { %v5968_v57 = vpop.f32.mrf.mxu1  ;;  %8529 = vperm.xlu1 %10902, %v8463_v26  }
 0x44e   : > { %v6684_v54 = vadd.f32 %v6646_v53, %v6389_v30  ;;  %v6004_v43 = vadd.f32 %v5968_v57, %v12290_v12  ;;  %v6915_v29 = vpop.f32.mrf.mxu0  ;;  %v8462_v12 = vld [vmem:[%s12964_s3 + $0x48] sm:$0xff]  ;;  %v7148_v53 = vsel %vm645_vm2, %v7143_v9, %v7147_v28  ;;  %v7479_v57 = vsel %vm1016_vm3, %v7476_v22, %v7478_v39  ;;  %v12598_v22 = vld [vmem:[%s11167_s13 + $0x58] sm:$0xff] }
 0x44f   : > { %8524 = vperm.xlu0 %10901, %v8462_v12  }
 0x450   : > { %10258 = vmatmul.msk.bf16.gmra.mxu1 %vm397_vm1, %v7140_v48  ;;  %10319 = vmatmul.msk.bf16.gmra.mxu2 %vm397_vm1, %v7477_v17  ;;  %v12559_v62 = vadd.f32 %v6912_v15, %v6684_v54  ;;  %v7823_v54 = vsel %vm1312_vm4, %v7813_v44, %v7822_v8 }
 0x451   : > { %10380 = vmatmul.msk.bf16.gmra.mxu3 %vm397_vm1, %v7814_v19  ;;  %10441 = vmatmul.msk.bf16.gmra.mxu0 %vm397_vm1, %v8158_v56 }
 0x453   : > { %v6354_v61 = vpop.f32.mrf.mxu2 }
 0x454   : > { %v6390_v21 = vadd.f32 %v6354_v61, %v6004_v43  ;;  %v6649_v42 = vpop.f32.mrf.mxu3  ;;  %v7153_v61 = vshll.u32 %v12598_v22, 16 }
 0x455   : > { %v5970_v35 = vpop.f32.mrf.mxu1 }
 0x456   : > { %v6685_v38 = vadd.f32 %v6649_v42, %v6390_v21  ;;  %v6005_v6 = vadd.f32 %v5970_v35, %v12300_v20  ;;  %v6917_v34 = vpop.f32.mrf.mxu0  ;;  %v8159_v20 = vrot.slane %v12576_v24, 2  ;;  %v12606_v21 = vld [vmem:[%s11167_s13 + $0x58] sm:$0xff]  ;;  %v7155_v16 = vrot.slane %v7153_v61, 1 }
 0x457   : > { %v7480_v41 = vrot.slane %v12606_v21, 1 }
 0x458   : > { %v12581_v15 = vadd.f32 %v6915_v29, %v6685_v38  ;;  %v8160_v43 = vsel %vm1699_vm5, %v8157_v11, %v8159_v20  ;;  %v10739_v29 = vld [vmem:[%s11167_s13 + $0x58] sm:$0xff] }
 0x459   : > { %v7825_v44 = vshrl.u32 %v10739_v29, 16  ;;  %v7828_v11 = vshll.u32 %v10739_v29, 16  ;;  %v12610_v38 = vld [vmem:[%s11167_s13 + $0x58] sm:$0xff] }
 0x45b   : > { %v6356_v58 = vpop.f32.mrf.mxu2  ;;  %v7827_v32 = vrot.slane %v7825_v44, 1  ;;  %v7830_v49 = vrot.slane %v7828_v11, 2  ;;  %v7157_v11 = vshrl.u32 %v12598_v22, 16 }
 0x45c   : > { %v6391_v45 = vadd.f32 %v6356_v58, %v6005_v6  ;;  %v6651_v14 = vpop.f32.mrf.mxu3  ;;  %v8465_v6 = vld [vmem:[%s12964_s3 + $0x60] sm:$0xff] }
 0x45d   : > { %v5973_v30 = vpop.f32.mrf.mxu1  ;;  %8539 = vperm.xlu0 %10901, %v8465_v6   ;;  %v7831_v24 = vor.u32 %v7830_v49, %v7827_v32  ;;  %v7159_v22 = vor.u32 %v7157_v11, %v7155_v16  ;;  %v12688_v11 = vld [vmem:[%s11167_s13 + $0x68] sm:$0xff] }
 0x45e   : > { %v6686_v48 = vadd.f32 %v6651_v14, %v6391_v45  ;;  %v6006_v17 = vadd.f32 %v5973_v30, %v12307_v7  ;;  %v6920_v2 = vpop.f32.mrf.mxu0  ;;  %v8461_v7 = vld [vmem:[%s12964_s3 + $0x40] sm:$0xff]  ;;  %v7156_v14 = vsel %vm645_vm2, %v7151_v4, %v7155_v16  ;;  %v7481_v30 = vsel %vm1016_vm3, %v7478_v39, %v7480_v41  ;;  %v8464_v4 = vld [vmem:[%s12964_s3 + $0x58] sm:$0xff] }
 0x45f   : > { %8519 = vperm.xlu2 %10903, %v8461_v7   ;;  %v12632_v39 = vld [vmem:[%s11167_s13 + $0x60] sm:$0xff] }
 0x460   : > { %10259 = vmatmul.msk.bf16.gmra.mxu1 %vm397_vm1, %v7148_v53  ;;  %10320 = vmatmul.msk.bf16.gmra.mxu2 %vm397_vm1, %v7479_v57  ;;  %v12593_v19 = vadd.f32 %v6917_v34, %v6686_v48  ;;  %v7832_v48 = vsel %vm1312_vm4, %v7822_v8, %v7831_v24 }
 0x461   : > { %10381 = vmatmul.msk.bf16.gmra.mxu3 %vm397_vm1, %v7823_v54  ;;  %10442 = vmatmul.msk.bf16.gmra.mxu0 %vm397_vm1, %v8160_v43 }
 0x463   : > { %v6359_v56 = vpop.f32.mrf.mxu2 }
 0x464   : > { %v6392_v27 = vadd.f32 %v6359_v56, %v6006_v17  ;;  %v6654_v12 = vpop.f32.mrf.mxu3  ;;  %v7161_v56 = vshll.u32 %v12632_v39, 16 }
 0x465   : > { %v5975_v52 = vpop.f32.mrf.mxu1 }
 0x466   : > { %v6687_v42 = vadd.f32 %v6654_v12, %v6392_v27  ;;  %v6007_v35 = vadd.f32 %v5975_v52, %v12317_v60  ;;  %v6922_v23 = vpop.f32.mrf.mxu0  ;;  %v8161_v60 = vrot.slane %v12610_v38, 2  ;;  %v12640_v27 = vld [vmem:[%s11167_s13 + $0x60] sm:$0xff]  ;;  %v7163_v32 = vrot.slane %v7161_v56, 1 }
 0x467   : > { %v7482_v49 = vrot.slane %v12640_v27, 1  ;;  %8534 = vperm.xlu2 %10903, %v8464_v4   ;;  %v8475_v4 = vld [vmem:[%s12964_s3 + $0xb0] sm:$0xff] }
 0x468   : > { %v12615_v34 = vadd.f32 %v6920_v2, %v6687_v42  ;;  %v8162_v17 = vsel %vm1699_vm5, %v8159_v20, %v8161_v60  ;;  %v10740_v2 = vld [vmem:[%s11167_s13 + $0x60] sm:$0xff] }
 0x469   : > { %v7834_v8 = vshrl.u32 %v10740_v2, 16  ;;  %v7837_v20 = vshll.u32 %v10740_v2, 16  ;;  %v12644_v42 = vld [vmem:[%s11167_s13 + $0x60] sm:$0xff]  ;;  %v8471_v2 = vld [vmem:[%s12964_s3 + $0x90] sm:$0xff] }
 0x46a   : > { %v8163_v6 = vrot.slane %v12644_v42, 2 }
 0x46b   : > { %v6361_v26 = vpop.f32.mrf.mxu2  ;;  %v7836_v61 = vrot.slane %v7834_v8, 1  ;;  %v7839_v21 = vrot.slane %v7837_v20, 2 }
 0x46c   : > { %v6393_v9 = vadd.f32 %v6361_v26, %v6007_v35  ;;  %v6656_v58 = vpop.f32.mrf.mxu3  ;;  %v8468_v35 = vld [vmem:[%s12964_s3 + $0x78] sm:$0xff] }
 0x46d   : > { %v5978_v45 = vpop.f32.mrf.mxu1  ;;  %8554 = vperm.xlu0 %10901, %v8468_v35   ;;  %v12655_v38 = vor.u32 %v7839_v21, %v7836_v61  ;;  %v12692_v61 = vld [vmem:[%s11167_s13 + $0x68] sm:$0xff] }
 0x46e   : > { %v6688_v53 = vadd.f32 %v6656_v58, %v6393_v9  ;;  %v6008_v57 = vadd.f32 %v5978_v45, %v12324_v10  ;;  %v6925_v28 = vpop.f32.mrf.mxu0  ;;  %v8466_v10 = vld [vmem:[%s12964_s3 + $0x68] sm:$0xff]  ;;  %v7164_v45 = vsel %vm645_vm2, %v7159_v22, %v7163_v32 }
 0x46f   : > { %8544 = vperm.xlu1 %10902, %v8466_v10   ;;  %v8474_v21 = vld [vmem:[%s12964_s3 + $0xa8] sm:$0xff] }
 0x470   : > { %10260 = vmatmul.msk.bf16.gmra.mxu1 %vm397_vm1, %v7156_v14  ;;  %10321 = vmatmul.msk.bf16.gmra.mxu2 %vm397_vm1, %v7481_v30  ;;  %v12627_v54 = vadd.f32 %v6922_v23, %v6688_v53  ;;  %v7483_v14 = vsel %vm1016_vm3, %v7480_v41, %v7482_v49 }
 0x471   : > { %10382 = vmatmul.msk.bf16.gmra.mxu3 %vm397_vm1, %v7832_v48  ;;  %10443 = vmatmul.msk.bf16.gmra.mxu0 %vm397_vm1, %v8162_v17  ;;  %v8164_v48 = vsel %vm1699_vm5, %v8161_v60, %v8163_v6  ;;  %v10741_v17 = vld [vmem:[%s11167_s13 + $0x68] sm:$0xff] }
 0x472   : > { %v7843_v60 = vshrl.u32 %v10741_v17, 16  ;;  %v7846_v10 = vshll.u32 %v10741_v17, 16  ;;  %v10742_v17 = vld [vmem:[%s11167_s13 + $0x70] sm:$0xff] }
 0x473   : > { %v6364_v43 = vpop.f32.mrf.mxu2  ;;  %v7852_v42 = vshrl.u32 %v10742_v17, 16 }
 0x474   : > { %v6394_v29 = vadd.f32 %v6364_v43, %v6008_v57  ;;  %v6659_v7 = vpop.f32.mrf.mxu3 }
 0x475   : > { %v5980_v44 = vpop.f32.mrf.mxu1  ;;  %8569 = vperm.xlu0 %10901, %v8471_v2  }
 0x476   : > { %v6689_v12 = vadd.f32 %v6659_v7, %v6394_v29  ;;  %v6009_v52 = vadd.f32 %v5980_v44, %v12334_v3  ;;  %v6927_v18 = vpop.f32.mrf.mxu0  ;;  %v8469_v3 = vld [vmem:[%s12964_s3 + $0x80] sm:$0xff]  ;;  %v7165_v7 = vshrl.u32 %v12632_v39, 16 }
 0x477   : > { %8559 = vperm.xlu1 %10902, %v8469_v3   ;;  %v7484_v3 = vrot.slane %v12688_v11, 1  ;;  %v7854_v11 = vrot.slane %v7852_v42, 1 }
 0x478   : > { %v12649_v23 = vadd.f32 %v6925_v28, %v6689_v12  ;;  %v7841_v28 = vsel %vm1312_vm4, %v7831_v24, %v12655_v38  ;;  %v8472_v24 = vld [vmem:[%s12964_s3 + $0x98] sm:$0xff]  ;;  %v7167_v22 = vor.u32 %v7165_v7, %v7163_v32  ;;  %v12731_v7 = vld [vmem:[%s11167_s13 + $0x70] sm:$0xff] }
 0x47b   : > { %v6366_v26 = vpop.f32.mrf.mxu2 }
 0x47c   : > { %v6395_v16 = vadd.f32 %v6366_v26, %v6009_v52  ;;  %v6661_v9 = vpop.f32.mrf.mxu3  ;;  %v7845_v52 = vrot.slane %v7843_v60, 1  ;;  %v8165_v26 = vrot.slane %v12692_v61, 2 }
 0x47d   : > { %v5983_v58 = vpop.f32.mrf.mxu1  ;;  %8584 = vperm.xlu0 %10901, %v8474_v21   ;;  %v7486_v21 = vrot.slane %v12731_v7, 1 }
 0x47e   : > { %v6690_v30 = vadd.f32 %v6661_v9, %v6395_v16  ;;  %v6010_v53 = vadd.f32 %v5983_v58, %v12341_v1  ;;  %v6930_v57 = vpop.f32.mrf.mxu0  ;;  %v12680_v1 = vld [vmem:[%s11167_s13 + $0x68] sm:$0xff]  ;;  %v8467_v16 = vld [vmem:[%s12964_s3 + $0x70] sm:$0xff] }
 0x47f   : > { %8574 = vperm.xlu1 %10902, %v8472_v24   ;;  %v7169_v44 = vshll.u32 %v12680_v1, 16  ;;  %8549 = vperm.xlu2 %10903, %v8467_v16   ;;  %v7855_v24 = vshll.u32 %v10742_v17, 16 }
 0x480   : > { %10261 = vmatmul.msk.bf16.gmra.mxu1 %vm397_vm1, %v7164_v45  ;;  %10322 = vmatmul.msk.bf16.gmra.mxu2 %vm397_vm1, %v7483_v14  ;;  %v12675_v41 = vadd.f32 %v6927_v18, %v6690_v30  ;;  %v7848_v18 = vrot.slane %v7846_v10, 2  ;;  %v7485_v30 = vsel %vm1016_vm3, %v7482_v49, %v7484_v3  ;;  %v12722_v49 = vld [vmem:[%s11167_s13 + $0x70] sm:$0xff] }
 0x481   : > { %10383 = vmatmul.msk.bf16.gmra.mxu3 %vm397_vm1, %v7841_v28  ;;  %10444 = vmatmul.msk.bf16.gmra.mxu0 %vm397_vm1, %v8164_v48  ;;  %v7171_v39 = vrot.slane %v7169_v44, 1  ;;  %v8166_v48 = vsel %vm1699_vm5, %v8163_v6, %v8165_v26  ;;  %v8470_v6 = vld [vmem:[%s12964_s3 + $0x88] sm:$0xff] }
 0x483   : > { %v6369_v8 = vpop.f32.mrf.mxu2  ;;  %v7172_v14 = vsel %vm645_vm2, %v7167_v22, %v7171_v39 }
 0x484   : > { %v6396_v20 = vadd.f32 %v6369_v8, %v6010_v53  ;;  %v6664_v43 = vpop.f32.mrf.mxu3 }
 0x485   : > { %v5985_v29 = vpop.f32.mrf.mxu1 }
 0x486   : > { %v6691_v56 = vadd.f32 %v6664_v43, %v6396_v20  ;;  %v6011_v27 = vadd.f32 %v5985_v29, %v12351_v50  ;;  %v6932_v12 = vpop.f32.mrf.mxu0  ;;  %v7849_v50 = vor.u32 %v7848_v18, %v7845_v52  ;;  %v7173_v43 = vshrl.u32 %v12680_v1, 16  ;;  %v12739_v52 = vld [vmem:[%s12963_s2] ss:$0 sm:$0xff]  ;;  %v8480_v18 = vpop.permute.xlu0 %8479 }
 0x487   : > { %8589 = vperm.xlu1 %10902, %v8475_v4   ;;  %8564 = vperm.xlu2 %10903, %v8470_v6   ;;  %v7177_v29 = vshll.u32 %v12722_v49, 16 }
 0x488   : > { %v12697_v35 = vadd.f32 %v6930_v57, %v6691_v56  ;;  %v7850_v28 = vsel %vm1312_vm4, %v12655_v38, %v7849_v50  ;;  %v7857_v56 = vrot.slane %v7855_v24, 2  ;;  %v7175_v61 = vor.u32 %v7173_v43, %v7171_v39 }
 0x489   : > { %v7179_v1 = vrot.slane %v7177_v29, 1 }
 0x48a   : > { %v12743_v4 = vor.u32 %v7857_v56, %v7854_v11 }
 0x48b   : > { %v6371_v9 = vpop.f32.mrf.mxu2 }
 0x48c   : > { %v6397_v32 = vadd.f32 %v6371_v9, %v6011_v27  ;;  %v6666_v58 = vpop.f32.mrf.mxu3  ;;  %v12734_v27 = vld [vmem:[%s11167_s13 + $0x70] sm:$0xff]  ;;  %v8473_v9 = vld [vmem:[%s12964_s3 + $0xa0] sm:$0xff] }
 0x48d   : > { %v7245_v45 = vpop.f32.mrf.mxu1  ;;  %v8167_v16 = vrot.slane %v12734_v27, 2 }
 0x48e   : > { %v6692_v53 = vadd.f32 %v6666_v58, %v6397_v32  ;;  %v8221_v57 = vpop.f32.mrf.mxu0  ;;  %v7305_v38 = vadd.f32 %v7245_v45, %v12358_v51 }
 0x48f   : > { %8579 = vperm.xlu2 %10903, %v8473_v9   ;;  %v8168_v17 = vsel %vm1699_vm5, %v8165_v26, %v8167_v16 }
 0x490   : > { %10262 = vmatmul.msk.bf16.gmra.mxu1 %vm397_vm1, %v7172_v14  ;;  %10323 = vmatmul.msk.bf16.gmra.mxu2 %vm397_vm1, %v7485_v30  ;;  %v12717_v2 = vadd.f32 %v6932_v12, %v6692_v53  ;;  %v7180_v30 = vsel %vm645_vm2, %v7175_v61, %v7179_v1  ;;  %v10743_v53 = vld [vmem:[%s11167_s13 + $0x78] sm:$0xff] }
 0x491   : > { %10384 = vmatmul.msk.bf16.gmra.mxu3 %vm397_vm1, %v7850_v28  ;;  %10445 = vmatmul.msk.bf16.gmra.mxu0 %vm397_vm1, %v8166_v48  ;;  %v7859_v48 = vsel %vm1312_vm4, %v7849_v50, %v12743_v4  ;;  %v7861_v50 = vshrl.u32 %v10743_v53, 16  ;;  %v7864_v24 = vshll.u32 %v10743_v53, 16  ;;  %v8490_v53 = vpop.permute.xlu1 %8489 }
 0x493   : > { %v7540_v60 = vpop.f32.mrf.mxu2  ;;  %v7866_v61 = vrot.slane %v7864_v24, 2 }
 0x494   : > { %v7600_v10 = vadd.f32 %v7540_v60, %v7305_v38  ;;  %v7926_v8 = vpop.f32.mrf.mxu3  ;;  %v8476_v60 = vld [vmem:[%s12964_s3 + $0xb8] sm:$0xff] }
 0x495   : > { %v7247_v20 = vpop.f32.mrf.mxu1 }
 0x496   : > { %v7986_v44 = vadd.f32 %v7926_v8, %v7600_v10  ;;  %v8223_v51 = vpop.f32.mrf.mxu0  ;;  %v7306_v22 = vadd.f32 %v7247_v20, %v12368_v46  ;;  %v7487_v46 = vsel %vm1016_vm3, %v7484_v3, %v7486_v21  ;;  %v12768_v3 = vld [vmem:[%s11167_s13 + $0x78] sm:$0xff]  ;;  %v8485_v8 = vpop.permute.xlu0 %8484  ;;  %v7181_v20 = vshrl.u32 %v12722_v49, 16  ;;  %v7672_v49 = vld [vmem:[%s11167_s13 + $0x80] sm:$0x3] }
 0x497   : > { %8594 = vperm.xlu2 %10903, %v8476_v60   ;;  %v7185_v56 = vshll.u32 %v12768_v3, 16 }
 0x498   : > { %v8281_v12 = vadd.f32 %v8221_v57, %v7986_v44 }
 0x49a   : > { %v8357_v58 = vadd.f32 %v12739_v52, %v8281_v12  ;;  %v12779_v12 = vld [vmem:[%s11167_s13 + $0x78] sm:$0xff] }
 0x49b   : > { %v7542_v32 = vpop.f32.mrf.mxu2 }
 0x49c   : > { %v7601_v45 = vadd.f32 %v7542_v32, %v7306_v22  ;;  %v7928_v39 = vpop.f32.mrf.mxu3  ;;  %v8381_v42 = vmax.f32 %v8357_v58, 0.0 }
 0x49d   : > { %v7250_v14 = vpop.f32.mrf.mxu1 }
 0x49e   : > { %v7987_v57 = vadd.f32 %v7928_v39, %v7601_v45  ;;  %v8226_v28 = vpop.f32.mrf.mxu0  ;;  %v7307_v6 = vadd.f32 %v7250_v14, %v12376_v25  ;;  %v8597_v43 = vmul.f32 %v8480_v18, %v8381_v42  ;;  %v7863_v25 = vrot.slane %v7861_v50, 1  ;;  %v12782_v45 = vld [vmem:[%s11167_s13 + $0x78] sm:$0xff] }
 0x49f   : > { %v7183_v39 = vor.u32 %v7181_v20, %v7179_v1 }
 0x4a0   : > { %v8282_v38 = vadd.f32 %v8223_v51, %v7987_v57  ;;  %10263 = vmatmul.msk.bf16.gmra.mxu1 %vm397_vm1, %v7180_v30  ;;  %10324 = vmatmul.msk.bf16.gmra.mxu2 %vm397_vm1, %v7487_v46  ;;  %v8650_v18 = vmul.f32 %v8597_v43, %v8381_v42  ;;  %v7187_v57 = vrot.slane %v7185_v56, 1 }
 0x4a1   : > { %10385 = vmatmul.msk.bf16.gmra.mxu3 %vm397_vm1, %v7859_v48  ;;  %10446 = vmatmul.msk.bf16.gmra.mxu0 %vm397_vm1, %v8168_v17  ;;  %v7488_v48 = vrot.slane %v12779_v12, 1  ;;  %v12789_v17 = vor.u32 %v7866_v61, %v7863_v25  ;;  %v7377_v61 = vld [vmem:[%s11167_s13 + $0x80] sm:$0x1] }
 0x4a2   : > { %v8358_v26 = vadd.f32 %v12739_v52, %v8282_v38  ;;  %v7748_v38 = vunpack.c.l.b16 %v7672_v49  ;;  %v7188_v20 = vsel %vm645_vm2, %v7183_v39, %v7187_v57 }
 0x4a3   : > { %v7545_v10 = vpop.f32.mrf.mxu2  ;;  %v7868_v56 = vsel %vm1312_vm4, %v12743_v4, %v12789_v17 }
 0x4a4   : > { %v7602_v29 = vadd.f32 %v7545_v10, %v7307_v6  ;;  %v7931_v44 = vpop.f32.mrf.mxu3  ;;  %v8382_v51 = vmax.f32 %v8358_v26, 0.0 }
 0x4a5   : > { %v7252_v11 = vpop.f32.mrf.mxu1 }
 0x4a6   : > { %v7988_v22 = vadd.f32 %v7931_v44, %v7602_v29  ;;  %v10759_v9 = vpack.c.bf16 %v8382_v51, %v8381_v42  ;;  %v8598_v32 = vmul.f32 %v8485_v8, %v8382_v51  ;;  %v8228_v58 = vpop.f32.mrf.mxu0  ;;  %v7308_v1 = vadd.f32 %v7252_v11, %v12387_v37  ;;  %v7007_v42 = vld [vmem:[%s11167_s13 + $0x80] sm:$0x1] }
 0x4a7   : > { %v7083_v29 = vunpack.c.l.b16 %v7007_v42  ;;  %v7761_v37 = vpack.c.b16 %v7748_v38, %v7748_v38 }
 0x4a8   : > { %v8283_v14 = vadd.f32 %v8226_v28, %v7988_v22  ;;  %v8621_v30 = vadd.f32 %v8598_v32, %v8597_v43  ;;  %v8651_v46 = vmul.f32 %v8598_v32, %v8382_v51  ;;  %10760 = vst [vmem:[%s12785_s18] sm:$0xff] %v10759_v9   ;;  %v8169_v28 = vrot.slane %v12782_v45, 2  ;;  %v8058_v22 = vld [vmem:[%s11167_s13 + $0x80] sm:$0x3]  ;;  %s10832_s13 = smul.u32 96, %s11035_s24 }
 0x4a9   : > { %v7489_v43 = vsel %vm1016_vm3, %v7486_v21, %v7488_v48  ;;  %v7096_v4 = vpack.c.b16 %v7083_v29, %v7083_v29  ;;  %v7453_v32 = vunpack.c.l.b16 %v7377_v61  ;;  %v7870_v49 = vshrl.u32 %v7761_v37, 16 }
 0x4aa   : > { %v8359_v50 = vadd.f32 %v12739_v52, %v8283_v14  ;;  %v8674_v24 = vadd.f32 %v8651_v46, %v8650_v18  ;;  %v8170_v25 = vsel %vm1699_vm5, %v8167_v16, %v8169_v28  ;;  %v7873_v39 = vshll.u32 %v7761_v37, 16  ;;  %s8729_s30 = scalar_lea.hbm %s12965_s4, %s10832_s13 }
 0x4ab   : > { %v7547_v26 = vpop.f32.mrf.mxu2  ;;  %v7193_v42 = vshll.u32 %v7096_v4, 16  ;;  %s8732_s11 = sshll.u32 %s8729_s30, 4  ;;  %s8733_s11 = int_to_ptr.hbm [resolvable:$true] %s8732_s11 }
 0x4ac   : > { %v7603_v6 = vadd.f32 %v7547_v26, %v7308_v1  ;;  %v7933_v60 = vpop.f32.mrf.mxu3  ;;  %v8383_v10 = vmax.f32 %v8359_v50, 0.0  ;;  %v7189_v50 = vshrl.u32 %v12768_v3, 16  ;;  %v7466_v26 = vpack.c.b16 %v7453_v32, %v7453_v32  ;;  %s10919_s15 = sshra.s32 %s8733_s11, 4  ;;  %s10920_s15 = int_to_ptr.hbm [resolvable:$true] %s10919_s15 }
 0x4ad   : > { %v7255_v8 = vpop.f32.mrf.mxu1  ;;  %s10921_s16 = scalar_lea.hbm %s10920_s15, 96  ;;  %p10926_p1 = scmp.lt.s32.totalorder %s10920_s15, %s12965_s4 }
 0x4ae   : > { %v7989_v44 = vadd.f32 %v7933_v60, %v7603_v6  ;;  %v8599_v51 = vmul.f32 %v8490_v53, %v8383_v10  ;;  %v8231_v11 = vpop.f32.mrf.mxu0  ;;  %v7309_v18 = vadd.f32 %v7255_v8, %v12392_v55  ;;  %v7872_v6 = vrot.slane %v7870_v49, 1  ;;  %p10922_p12 = scmp.ne.s32.totalorder %s10920_s15, %s10921_s16  ;;  %p10927_p2 = scmp.lt.s32.totalorder %s10925_s19, %s10921_s16 }
 0x4af   : > { %v7875_v60 = vrot.slane %v7873_v39, 2  ;;  %v7490_v61 = vrot.slane %v7466_v26, 1 }
 0x4b0   : > { %v8284_v7 = vadd.f32 %v8228_v58, %v7989_v44  ;;  %v8622_v9 = vadd.f32 %v8621_v30, %v8599_v51  ;;  %v8652_v21 = vmul.f32 %v8599_v51, %v8383_v10  ;;  %10264 = vmatmul.msk.bf16.gmra.mxu1 %vm397_vm1, %v7188_v20  ;;  %10325 = vmatmul.msk.bf16.gmra.mxu2 %vm397_vm1, %v7489_v43  ;;  %v8134_v58 = vunpack.c.l.b16 %v8058_v22  ;;  %v8495_v30 = vpop.permute.xlu1 %8494  ;;  %v8500_v51 = vpop.permute.xlu2 %8499  ;;  %p10923_p13 = pnand %p10922_p12, %p11125_p4  ;;  %p10928_p3 = por %p10927_p2, %p10926_p1 }
 0x4b1   : > { %10386 = vmatmul.msk.bf16.gmra.mxu3 %vm397_vm1, %v7868_v56  ;;  %10447 = vmatmul.msk.bf16.gmra.mxu0 %vm397_vm1, %v8170_v25  ;;  %v7191_v56 = vor.u32 %v7189_v50, %v7187_v57  ;;  %v7195_v25 = vrot.slane %v7193_v42, 1  ;;  %v7876_v22 = vor.u32 %v7875_v60, %v7872_v6  ;;  %v7491_v57 = vsel %vm1016_vm3, %v7488_v48, %v7490_v61 }
 0x4b2   : > { %v8360_v27 = vadd.f32 %v12739_v52, %v8284_v7  ;;  %v8675_v16 = vadd.f32 %v8674_v24, %v8652_v21  ;;  %v8147_v37 = vpack.c.b16 %v8134_v58, %v8134_v58  ;;  %p10924_p0 = pneg %p10923_p13 }
 0x4b3   : > { %v7550_v14 = vpop.f32.mrf.mxu2 }
 0x4b4   : > { %v7604_v46 = vadd.f32 %v7550_v14, %v7309_v18  ;;  %v7936_v53 = vpop.f32.mrf.mxu3  ;;  %v8384_v38 = vmax.f32 %v8360_v27, 0.0  ;;  %v8171_v4 = vrot.slane %v8147_v37, 2  ;;  %p10929_p5 = pnand %p10928_p3, %p10924_p0 }
 0x4b5   : > { %v7257_v1 = vpop.f32.mrf.mxu1 }
 0x4b6   : > { %v7990_v20 = vadd.f32 %v7936_v53, %v7604_v46  ;;  %v10764_v43 = vpack.c.bf16 %v8384_v38, %v8383_v10  ;;  %v8600_v29 = vmul.f32 %v8495_v30, %v8384_v38  ;;  %v8233_v24 = vpop.f32.mrf.mxu0  ;;  %v7310_v21 = vadd.f32 %v7257_v1, %v12408_v36 }
 0x4b7   : > { %v8172_v36 = vsel %vm1699_vm5, %v8169_v28, %v8171_v4 }
 0x4b8   : > { %v8285_v55 = vadd.f32 %v8231_v11, %v7990_v20  ;;  %v8623_v8 = vadd.f32 %v8622_v9, %v8600_v29  ;;  %v8653_v44 = vmul.f32 %v8600_v29, %v8384_v38  ;;  %10816 = vst [vmem:[%s12785_s18 + $0x8] sm:$0xff] %v10764_v43   ;;  %v7196_v11 = vsel %vm645_vm2, %v7191_v56, %v7195_v25  ;;  %v8505_v53 = vpop.permute.xlu2 %8504 }
 0x4ba   : > { %v8361_v3 = vadd.f32 %v12739_v52, %v8285_v55  ;;  %v8676_v7 = vadd.f32 %v8675_v16, %v8653_v44  ;;  %v7877_v16 = vsel %vm1312_vm4, %v12789_v17, %v7876_v22 }
 0x4bb   : > { %v7552_v32 = vpop.f32.mrf.mxu2 }
 0x4bc   : > { %v7605_v10 = vadd.f32 %v7552_v32, %v7310_v21  ;;  %v7938_v49 = vpop.f32.mrf.mxu3  ;;  %v8385_v39 = vmax.f32 %v8361_v3, 0.0 }
 0x4bd   : > { %v7260_v27 = vpop.f32.mrf.mxu1 }
 0x4be   : > { %v7991_v9 = vadd.f32 %v7938_v49, %v7605_v10  ;;  %v8601_v18 = vmul.f32 %v8500_v51, %v8385_v39  ;;  %v8236_v58 = vpop.f32.mrf.mxu0  ;;  %v7311_v17 = vadd.f32 %v7260_v27, %v12427_v47 }
 0x4c0   : > { %v8286_v14 = vadd.f32 %v8233_v24, %v7991_v9  ;;  %v8624_v30 = vadd.f32 %v8623_v8, %v8601_v18  ;;  %v8654_v46 = vmul.f32 %v8601_v18, %v8385_v39  ;;  %10265 = vmatmul.msk.bf16.gmra.mxu1 %vm397_vm1, %v7196_v11  ;;  %10326 = vmatmul.msk.bf16.gmra.mxu2 %vm397_vm1, %v7491_v57  ;;  %v8510_v8 = vpop.permute.xlu0 %8509 }
 0x4c1   : > { %10387 = vmatmul.msk.bf16.gmra.mxu3 %vm397_vm1, %v7877_v16  ;;  %10448 = vmatmul.msk.bf16.gmra.mxu0 %vm397_vm1, %v8172_v36 }
 0x4c2   : > { %v8362_v12 = vadd.f32 %v12739_v52, %v8286_v14  ;;  %v8677_v48 = vadd.f32 %v8676_v7, %v8654_v46 }
 0x4c3   : > { %v7555_v45 = vpop.f32.mrf.mxu2 }
 0x4c4   : > { %v7606_v28 = vadd.f32 %v7555_v45, %v7311_v17  ;;  %v7941_v38 = vpop.f32.mrf.mxu3  ;;  %v8386_v50 = vmax.f32 %v8362_v12, 0.0  ;;  %v8520_v45 = vpop.permute.xlu2 %8519 }
 0x4c5   : > { %v7262_v1 = vpop.f32.mrf.mxu1 }
 0x4c6   : > { %v7992_v42 = vadd.f32 %v7941_v38, %v7606_v28  ;;  %v10769_v26 = vpack.c.bf16 %v8386_v50, %v8385_v39  ;;  %v8602_v6 = vmul.f32 %v8505_v53, %v8386_v50  ;;  %v8238_v60 = vpop.f32.mrf.mxu0  ;;  %v7312_v55 = vadd.f32 %v7262_v1, %v12439_v13  ;;  %v8515_v13 = vpop.permute.xlu1 %8514 }
 0x4c8   : > { %v8287_v20 = vadd.f32 %v8236_v58, %v7992_v42  ;;  %v8625_v43 = vadd.f32 %v8624_v30, %v8602_v6  ;;  %v8655_v29 = vmul.f32 %v8602_v6, %v8386_v50  ;;  %10817 = vst [vmem:[%s12785_s18 + $0x10] sm:$0xff] %v10769_v26  }
 0x4ca   : > { %v8363_v24 = vadd.f32 %v12739_v52, %v8287_v20  ;;  %v8678_v37 = vadd.f32 %v8677_v48, %v8655_v29 }
 0x4cb   : > { %v7557_v47 = vpop.f32.mrf.mxu2 }
 0x4cc   : > { %v7607_v44 = vadd.f32 %v7557_v47, %v7312_v55  ;;  %v7943_v51 = vpop.f32.mrf.mxu3  ;;  %v8387_v56 = vmax.f32 %v8363_v24, 0.0 }
 0x4cd   : > { %v7265_v25 = vpop.f32.mrf.mxu1 }
 0x4ce   : > { %v7993_v61 = vadd.f32 %v7943_v51, %v7607_v44  ;;  %v8603_v22 = vmul.f32 %v8510_v8, %v8387_v56  ;;  %v8241_v3 = vpop.f32.mrf.mxu0  ;;  %v7313_v49 = vadd.f32 %v7265_v25, %v12459_v0 }
 0x4d0   : > { %v8288_v7 = vadd.f32 %v8238_v60, %v7993_v61  ;;  %v8626_v21 = vadd.f32 %v8625_v43, %v8603_v22  ;;  %v8656_v4 = vmul.f32 %v8603_v22, %v8387_v56 }
 0x4d2   : > { %v8364_v32 = vadd.f32 %v12739_v52, %v8288_v7  ;;  %v8679_v10 = vadd.f32 %v8678_v37, %v8656_v4 }
 0x4d3   : > { %v7560_v39 = vpop.f32.mrf.mxu2 }
 0x4d4   : > { %v7608_v27 = vadd.f32 %v7560_v39, %v7313_v49  ;;  %v7946_v11 = vpop.f32.mrf.mxu3  ;;  %v8388_v57 = vmax.f32 %v8364_v32, 0.0 }
 0x4d5   : > { %v7267_v9 = vpop.f32.mrf.mxu1 }
 0x4d6   : > { %v7994_v18 = vadd.f32 %v7946_v11, %v7608_v27  ;;  %v10774_v58 = vpack.c.bf16 %v8388_v57, %v8387_v56  ;;  %v8604_v16 = vmul.f32 %v8515_v13, %v8388_v57  ;;  %v8243_v36 = vpop.f32.mrf.mxu0  ;;  %v7314_v17 = vadd.f32 %v7267_v9, %v12470_v5  ;;  %v8525_v5 = vpop.permute.xlu0 %8524 }
 0x4d8   : > { %v8289_v14 = vadd.f32 %v8241_v3, %v7994_v18  ;;  %v8627_v30 = vadd.f32 %v8626_v21, %v8604_v16  ;;  %v8657_v46 = vmul.f32 %v8604_v16, %v8388_v57  ;;  %10818 = vst [vmem:[%s12785_s18 + $0x18] sm:$0xff] %v10774_v58  }
 0x4da   : > { %v8365_v12 = vadd.f32 %v12739_v52, %v8289_v14  ;;  %v8680_v48 = vadd.f32 %v8679_v10, %v8657_v46  ;;  %v8530_v10 = vpop.permute.xlu1 %8529 }
 0x4db   : > { %v7562_v0 = vpop.f32.mrf.mxu2 }
 0x4dc   : > { %v7609_v53 = vadd.f32 %v7562_v0, %v7314_v17  ;;  %v7948_v28 = vpop.f32.mrf.mxu3  ;;  %v8389_v38 = vmax.f32 %v8365_v12, 0.0 }
 0x4dd   : > { %v7270_v50 = vpop.f32.mrf.mxu1 }
 0x4de   : > { %v7995_v1 = vadd.f32 %v7948_v28, %v7609_v53  ;;  %v8605_v42 = vmul.f32 %v8520_v45, %v8389_v38  ;;  %v8246_v26 = vpop.f32.mrf.mxu0  ;;  %v7315_v24 = vadd.f32 %v7270_v50, %v12482_v40 }
 0x4e0   : > { %v8290_v6 = vadd.f32 %v8243_v36, %v7995_v1  ;;  %v8628_v60 = vadd.f32 %v8627_v30, %v8605_v42  ;;  %v8658_v20 = vmul.f32 %v8605_v42, %v8389_v38 }
 0x4e2   : > { %v8366_v43 = vadd.f32 %v12739_v52, %v8290_v6  ;;  %v8681_v29 = vadd.f32 %v8680_v48, %v8658_v20  ;;  %v8540_v20 = vpop.permute.xlu0 %8539 }
 0x4e3   : > { %v7565_v37 = vpop.f32.mrf.mxu2 }
 0x4e4   : > { %v7610_v55 = vadd.f32 %v7565_v37, %v7315_v24  ;;  %v7951_v47 = vpop.f32.mrf.mxu3  ;;  %v8390_v8 = vmax.f32 %v8366_v43, 0.0 }
 0x4e5   : > { %v7272_v44 = vpop.f32.mrf.mxu1 }
 0x4e6   : > { %v7996_v51 = vadd.f32 %v7951_v47, %v7610_v55  ;;  %v10779_v56 = vpack.c.bf16 %v8390_v8, %v8389_v38  ;;  %v8606_v25 = vmul.f32 %v8525_v5, %v8390_v8  ;;  %v8248_v61 = vpop.f32.mrf.mxu0  ;;  %v7316_v32 = vadd.f32 %v7272_v44, %v12492_v59  ;;  %v8535_v59 = vpop.permute.xlu2 %8534 }
 0x4e8   : > { %v8291_v22 = vadd.f32 %v8246_v26, %v7996_v51  ;;  %v8629_v3 = vadd.f32 %v8628_v60, %v8606_v25  ;;  %v8659_v7 = vmul.f32 %v8606_v25, %v8390_v8  ;;  %10819 = vst [vmem:[%s12785_s18 + $0x20] sm:$0xff] %v10779_v56  }
 0x4ea   : > { %v8367_v21 = vadd.f32 %v12739_v52, %v8291_v22  ;;  %v8682_v4 = vadd.f32 %v8681_v29, %v8659_v7 }
 0x4eb   : > { %v7567_v40 = vpop.f32.mrf.mxu2 }
 0x4ec   : > { %v7611_v49 = vadd.f32 %v7567_v40, %v7316_v32  ;;  %v7953_v39 = vpop.f32.mrf.mxu3  ;;  %v8391_v13 = vmax.f32 %v8367_v21, 0.0  ;;  %v8545_v21 = vpop.permute.xlu1 %8544 }
 0x4ed   : > { %v7275_v27 = vpop.f32.mrf.mxu1 }
 0x4ee   : > { %v7997_v11 = vadd.f32 %v7953_v39, %v7611_v49  ;;  %v8607_v57 = vmul.f32 %v8530_v10, %v8391_v13  ;;  %v8251_v9 = vpop.f32.mrf.mxu0  ;;  %v7317_v30 = vadd.f32 %v7275_v27, %v12510_v63 }
 0x4f0   : > { %v8292_v18 = vadd.f32 %v8248_v61, %v7997_v11  ;;  %v8630_v58 = vadd.f32 %v8629_v3, %v8607_v57  ;;  %v8660_v16 = vmul.f32 %v8607_v57, %v8391_v13 }
 0x4f2   : > { %v8368_v36 = vadd.f32 %v12739_v52, %v8292_v18  ;;  %v8683_v14 = vadd.f32 %v8682_v4, %v8660_v16 }
 0x4f3   : > { %v7570_v46 = vpop.f32.mrf.mxu2 }
 0x4f4   : > { %v7612_v12 = vadd.f32 %v7570_v46, %v7317_v30  ;;  %v7956_v48 = vpop.f32.mrf.mxu3  ;;  %v8392_v17 = vmax.f32 %v8368_v36, 0.0  ;;  %v8550_v36 = vpop.permute.xlu2 %8549 }
 0x4f5   : > { %v7277_v0 = vpop.f32.mrf.mxu1 }
 0x4f6   : > { %v7998_v45 = vadd.f32 %v7956_v48, %v7612_v12  ;;  %v10784_v53 = vpack.c.bf16 %v8392_v17, %v8391_v13  ;;  %v8608_v28 = vmul.f32 %v8535_v59, %v8392_v17  ;;  %v8253_v38 = vpop.f32.mrf.mxu0  ;;  %v7318_v60 = vadd.f32 %v7277_v0, %v12522_v33 }
 0x4f8   : > { %v8293_v50 = vadd.f32 %v8251_v9, %v7998_v45  ;;  %v8631_v1 = vadd.f32 %v8630_v58, %v8608_v28  ;;  %v8661_v42 = vmul.f32 %v8608_v28, %v8392_v17  ;;  %10820 = vst [vmem:[%s12785_s18 + $0x28] sm:$0xff] %v10784_v53  }
 0x4fa   : > { %v8369_v26 = vadd.f32 %v12739_v52, %v8293_v50  ;;  %v8684_v6 = vadd.f32 %v8683_v14, %v8661_v42 }
 0x4fb   : > { %v7572_v63 = vpop.f32.mrf.mxu2 }
 0x4fc   : > { %v7613_v43 = vadd.f32 %v7572_v63, %v7318_v60  ;;  %v7958_v29 = vpop.f32.mrf.mxu3  ;;  %v8393_v24 = vmax.f32 %v8369_v26, 0.0 }
 0x4fd   : > { %v7280_v37 = vpop.f32.mrf.mxu1 }
 0x4fe   : > { %v7999_v5 = vadd.f32 %v7958_v29, %v7613_v43  ;;  %v8609_v55 = vmul.f32 %v8540_v20, %v8393_v24  ;;  %v8256_v47 = vpop.f32.mrf.mxu0  ;;  %v7319_v61 = vadd.f32 %v7280_v37, %v12547_v31 }
 0x500   : > { %v8294_v8 = vadd.f32 %v8253_v38, %v7999_v5  ;;  %v8632_v44 = vadd.f32 %v8631_v1, %v8609_v55  ;;  %v8662_v51 = vmul.f32 %v8609_v55, %v8393_v24  ;;  %v8555_v1 = vpop.permute.xlu0 %8554 }
 0x502   : > { %v8370_v56 = vadd.f32 %v12739_v52, %v8294_v8  ;;  %v8685_v25 = vadd.f32 %v8684_v6, %v8662_v51 }
 0x503   : > { %v7575_v22 = vpop.f32.mrf.mxu2 }
 0x504   : > { %v8394_v33 = vmax.f32 %v8370_v56, 0.0  ;;  %v7614_v3 = vadd.f32 %v7575_v22, %v7319_v61  ;;  %v7961_v7 = vpop.f32.mrf.mxu3 }
 0x505   : > { %v7282_v4 = vpop.f32.mrf.mxu1 }
 0x506   : > { %v10789_v32 = vpack.c.bf16 %v8394_v33, %v8393_v24  ;;  %v8610_v40 = vmul.f32 %v8545_v21, %v8394_v33  ;;  %v8000_v10 = vadd.f32 %v7961_v7, %v7614_v3  ;;  %v8258_v49 = vpop.f32.mrf.mxu0  ;;  %v7320_v9 = vadd.f32 %v7282_v4, %v12559_v62 }
 0x508   : > { %v8633_v39 = vadd.f32 %v8632_v44, %v8610_v40  ;;  %v8663_v13 = vmul.f32 %v8610_v40, %v8394_v33  ;;  %v8295_v27 = vadd.f32 %v8256_v47, %v8000_v10  ;;  %10821 = vst [vmem:[%s12785_s18 + $0x30] sm:$0xff] %v10789_v32   ;;  %v8560_v44 = vpop.permute.xlu1 %8559 }
 0x50a   : > { %v8686_v11 = vadd.f32 %v8685_v25, %v8663_v13  ;;  %v8371_v57 = vadd.f32 %v12739_v52, %v8295_v27 }
 0x50b   : > { %v7577_v31 = vpop.f32.mrf.mxu2 }
 0x50c   : > { %v8395_v18 = vmax.f32 %v8371_v57, 0.0  ;;  %v7615_v58 = vadd.f32 %v7577_v31, %v7320_v9  ;;  %v7963_v16 = vpop.f32.mrf.mxu3 }
 0x50d   : > { %v7285_v14 = vpop.f32.mrf.mxu1 }
 0x50e   : > { %v8611_v30 = vmul.f32 %v8550_v36, %v8395_v18  ;;  %v8001_v46 = vadd.f32 %v7963_v16, %v7615_v58  ;;  %v8261_v59 = vpop.f32.mrf.mxu0  ;;  %v7321_v53 = vadd.f32 %v7285_v14, %v12581_v15 }
 0x510   : > { %v8634_v12 = vadd.f32 %v8633_v39, %v8611_v30  ;;  %v8664_v48 = vmul.f32 %v8611_v30, %v8395_v18  ;;  %v8296_v17 = vadd.f32 %v8258_v49, %v8001_v46  ;;  %v8565_v49 = vpop.permute.xlu2 %8564 }
 0x512   : > { %v8687_v0 = vadd.f32 %v8686_v11, %v8664_v48  ;;  %v8372_v45 = vadd.f32 %v12739_v52, %v8296_v17 }
 0x513   : > { %v7580_v28 = vpop.f32.mrf.mxu2 }
 0x514   : > { %v8396_v62 = vmax.f32 %v8372_v45, 0.0  ;;  %v7616_v38 = vadd.f32 %v7580_v28, %v7321_v53  ;;  %v7966_v50 = vpop.f32.mrf.mxu3 }
 0x515   : > { %v7287_v42 = vpop.f32.mrf.mxu1 }
 0x516   : > { %v10794_v26 = vpack.c.bf16 %v8396_v62, %v8395_v18  ;;  %v8612_v6 = vmul.f32 %v8555_v1, %v8396_v62  ;;  %v8002_v60 = vadd.f32 %v7966_v50, %v7616_v38  ;;  %v8263_v63 = vpop.f32.mrf.mxu0  ;;  %v7322_v5 = vadd.f32 %v7287_v42, %v12593_v19 }
 0x518   : > { %v8635_v20 = vadd.f32 %v8634_v12, %v8612_v6  ;;  %v8665_v43 = vmul.f32 %v8612_v6, %v8396_v62  ;;  %v8297_v29 = vadd.f32 %v8261_v59, %v8002_v60  ;;  %10822 = vst [vmem:[%s12785_s18 + $0x38] sm:$0xff] %v10794_v26   ;;  %v8570_v59 = vpop.permute.xlu0 %8569  ;;  %v8575_v6 = vpop.permute.xlu1 %8574 }
 0x51a   : > { %v8688_v24 = vadd.f32 %v8687_v0, %v8665_v43  ;;  %v8373_v37 = vadd.f32 %v12739_v52, %v8297_v29 }
 0x51b   : > { %v7582_v15 = vpop.f32.mrf.mxu2 }
 0x51c   : > { %v8397_v55 = vmax.f32 %v8373_v37, 0.0  ;;  %v7617_v47 = vadd.f32 %v7582_v15, %v7322_v5  ;;  %v7968_v8 = vpop.f32.mrf.mxu3 }
 0x51d   : > { %v7290_v51 = vpop.f32.mrf.mxu1 }
 0x51e   : > { %v8613_v56 = vmul.f32 %v8560_v44, %v8397_v55  ;;  %v8003_v25 = vadd.f32 %v7968_v8, %v7617_v47  ;;  %v8266_v61 = vpop.f32.mrf.mxu0  ;;  %v7323_v4 = vadd.f32 %v7290_v51, %v12615_v34 }
 0x520   : > { %v8636_v22 = vadd.f32 %v8635_v20, %v8613_v56  ;;  %v8666_v33 = vmul.f32 %v8613_v56, %v8397_v55  ;;  %v8298_v3 = vadd.f32 %v8263_v63, %v8003_v25  ;;  %v8580_v56 = vpop.permute.xlu2 %8579 }
 0x522   : > { %v8689_v7 = vadd.f32 %v8688_v24, %v8666_v33  ;;  %v8374_v21 = vadd.f32 %v12739_v52, %v8298_v3 }
 0x523   : > { %v7585_v32 = vpop.f32.mrf.mxu2 }
 0x524   : > { %v8398_v19 = vmax.f32 %v8374_v21, 0.0  ;;  %v7618_v40 = vadd.f32 %v7585_v32, %v7323_v4  ;;  %v7971_v10 = vpop.f32.mrf.mxu3 }
 0x525   : > { %v7292_v39 = vpop.f32.mrf.mxu1 }
 0x526   : > { %v10799_v13 = vpack.c.bf16 %v8398_v19, %v8397_v55  ;;  %v8614_v27 = vmul.f32 %v8565_v49, %v8398_v19  ;;  %v8004_v11 = vadd.f32 %v7971_v10, %v7618_v40  ;;  %v8268_v57 = vpop.f32.mrf.mxu0  ;;  %v7324_v36 = vadd.f32 %v7292_v39, %v12627_v54  ;;  %v8585_v49 = vpop.permute.xlu0 %8584 }
 0x528   : > { %v8637_v9 = vadd.f32 %v8636_v22, %v8614_v27  ;;  %v8667_v31 = vmul.f32 %v8614_v27, %v8398_v19  ;;  %v8299_v18 = vadd.f32 %v8266_v61, %v8004_v11  ;;  %10823 = vst [vmem:[%s12785_s18 + $0x40] sm:$0xff] %v10799_v13  }
 0x52a   : > { %v8690_v58 = vadd.f32 %v8689_v7, %v8667_v31  ;;  %v8375_v16 = vadd.f32 %v12739_v52, %v8299_v18 }
 0x52b   : > { %v7587_v34 = vpop.f32.mrf.mxu2 }
 0x52c   : > { %v8399_v14 = vmax.f32 %v8375_v16, 0.0  ;;  %v7619_v30 = vadd.f32 %v7587_v34, %v7324_v36  ;;  %v7973_v46 = vpop.f32.mrf.mxu3 }
 0x52d   : > { %v7295_v12 = vpop.f32.mrf.mxu1 }
 0x52e   : > { %v8615_v48 = vmul.f32 %v8570_v59, %v8399_v14  ;;  %v8005_v17 = vadd.f32 %v7973_v46, %v7619_v30  ;;  %v8271_v28 = vpop.f32.mrf.mxu0  ;;  %v7325_v50 = vadd.f32 %v7295_v12, %v12649_v23  ;;  %v8590_v30 = vpop.permute.xlu1 %8589 }
 0x530   : > { %v8638_v0 = vadd.f32 %v8637_v9, %v8615_v48  ;;  %v8668_v45 = vmul.f32 %v8615_v48, %v8399_v14  ;;  %v8300_v53 = vadd.f32 %v8268_v57, %v8005_v17 }
 0x532   : > { %v8691_v62 = vadd.f32 %v8690_v58, %v8668_v45  ;;  %v8376_v38 = vadd.f32 %v12739_v52, %v8300_v53 }
 0x533   : > { %v7590_v1 = vpop.f32.mrf.mxu2 }
 0x534   : > { %v8400_v54 = vmax.f32 %v8376_v38, 0.0  ;;  %v7620_v42 = vadd.f32 %v7590_v1, %v7325_v50  ;;  %v7976_v26 = vpop.f32.mrf.mxu3 }
 0x535   : > { %v7297_v60 = vpop.f32.mrf.mxu1 }
 0x536   : > { %v10804_v63 = vpack.c.bf16 %v8400_v54, %v8399_v14  ;;  %v8616_v20 = vmul.f32 %v8575_v6, %v8400_v54  ;;  %v8006_v43 = vadd.f32 %v7976_v26, %v7620_v42  ;;  %v7326_v55 = vadd.f32 %v7297_v60, %v12675_v41  ;;  %v8273_v47 = vpop.f32.mrf.mxu0 }
 0x538   : > { %v8639_v29 = vadd.f32 %v8638_v0, %v8616_v20  ;;  %v8669_v24 = vmul.f32 %v8616_v20, %v8400_v54  ;;  %v8301_v37 = vadd.f32 %v8271_v28, %v8006_v43  ;;  %10824 = vst [vmem:[%s12785_s18 + $0x48] sm:$0xff] %v10804_v63  }
 0x53a   : > { %v8692_v5 = vadd.f32 %v8691_v62, %v8669_v24  ;;  %v8377_v15 = vadd.f32 %v12739_v52, %v8301_v37  ;;  %v8595_v62 = vpop.permute.xlu2 %8594 }
 0x53b   : > { %v7592_v23 = vpop.f32.mrf.mxu2 }
 0x53c   : > { %v8401_v8 = vmax.f32 %v8377_v15, 0.0  ;;  %v7621_v44 = vadd.f32 %v7592_v23, %v7326_v55  ;;  %v7978_v51 = vpop.f32.mrf.mxu3 }
 0x53d   : > { %v7300_v25 = vpop.f32.mrf.mxu1 }
 0x53e   : > { %v8617_v61 = vmul.f32 %v8580_v56, %v8401_v8  ;;  %v8007_v22 = vadd.f32 %v7978_v51, %v7621_v44  ;;  %v7327_v32 = vadd.f32 %v7300_v25, %v12697_v35  ;;  %v8276_v39 = vpop.f32.mrf.mxu0 }
 0x540   : > { %v8640_v33 = vadd.f32 %v8639_v29, %v8617_v61  ;;  %v8670_v3 = vmul.f32 %v8617_v61, %v8401_v8  ;;  %v8302_v7 = vadd.f32 %v8273_v47, %v8007_v22 }
 0x542   : > { %v8693_v21 = vadd.f32 %v8692_v5, %v8670_v3  ;;  %v8378_v4 = vadd.f32 %v12739_v52, %v8302_v7 }
 0x543   : > { %v7595_v19 = vpop.f32.mrf.mxu2 }
 0x544   : > { %v8402_v41 = vmax.f32 %v8378_v4, 0.0  ;;  %v7622_v40 = vadd.f32 %v7595_v19, %v7327_v32  ;;  %v7981_v10 = vpop.f32.mrf.mxu3 }
 0x545   : > { %v7302_v57 = vpop.f32.mrf.mxu1 }
 0x546   : > { %v10809_v13 = vpack.c.bf16 %v8402_v41, %v8401_v8  ;;  %v8618_v27 = vmul.f32 %v8585_v49, %v8402_v41  ;;  %v8008_v11 = vadd.f32 %v7981_v10, %v7622_v40  ;;  %v7328_v35 = vadd.f32 %v7302_v57, %v12717_v2  ;;  %v8278_v48 = vpop.f32.mrf.mxu0 }
 0x548   : > { %v8641_v9 = vadd.f32 %v8640_v33, %v8618_v27  ;;  %v8671_v31 = vmul.f32 %v8618_v27, %v8402_v41  ;;  %v8303_v18 = vadd.f32 %v8276_v39, %v8008_v11  ;;  %10825 = vst [vmem:[%s12785_s18 + $0x50] sm:$0xff] %v10809_v13  }
 0x54a   : > { %v8694_v58 = vadd.f32 %v8693_v21, %v8671_v31  ;;  %v8379_v16 = vadd.f32 %v12739_v52, %v8303_v18 }
 0x54b   : > { %v7597_v36 = vpop.f32.mrf.mxu2 }
 0x54c   : > { %v8403_v34 = vmax.f32 %v8379_v16, 0.0  ;;  %v7623_v14 = vadd.f32 %v7597_v36, %v7328_v35  ;;  %v7983_v46 = vpop.f32.mrf.mxu3 }
 0x54e   : > { %v8619_v59 = vmul.f32 %v8590_v30, %v8403_v34  ;;  %v8009_v12 = vadd.f32 %v7983_v46, %v7623_v14 }
 0x550   : > { %v8642_v17 = vadd.f32 %v8641_v9, %v8619_v59  ;;  %v8672_v0 = vmul.f32 %v8619_v59, %v8403_v34  ;;  %v8304_v45 = vadd.f32 %v8278_v48, %v8009_v12 }
 0x552   : > { %v8695_v2 = vadd.f32 %v8694_v58, %v8672_v0  ;;  %v8380_v53 = vadd.f32 %v12739_v52, %v8304_v45 }
 0x554   : > { %v8404_v28 = vmax.f32 %v8380_v53, 0.0 }
 0x556   : > { %v10814_v38 = vpack.c.bf16 %v8404_v28, %v8403_v34  ;;  %v8620_v50 = vmul.f32 %v8595_v62, %v8404_v28 }
 0x558   : > { %v8673_v1 = vmul.f32 %v8620_v50, %v8404_v28  ;;  %10826 = vst [vmem:[%s12785_s18 + $0x58] sm:$0xff] %v10814_v38   ;;  %v8643_v54 = vadd.f32 %v8642_v17, %v8620_v50 }
 0x559   : > { %10932 = shalt.err (!%p10929_p5)
}
 0x55a   : > { %s11046_s18 = smov 64   ;;  %s11047_s28 = smov 4   ;;  %v8696_v52 = vadd.f32 %v8695_v2, %v8673_v1  ;;  %v8644_v42 = vrot.slane %v8643_v54, 4 }
 0x55b   : > { %10833 = dma.vmem_to_hbm [thread:$0]  (%p11125_p4), %s8731_s8, 1536, %s8733_s11, %s8706_s12, %s11046_s18, %s11046_s18, %s11047_s28  }
 0x55c   : > { %s8922_s17 = sshll.u32 %s12761_s14, 3  ;;  %s10452_s13 = sshll.u32 %s11035_s24, 3  ;;  %v8697_v26 = vrot.slane %v8696_v52, 4  ;;  %v8645_v6 = vadd.f32 %v8644_v42, %v8643_v54 }
 0x55d   : > { %s8746_s19 = scalar_lea.hbm %s12966_s5, %s10452_s13  ;;  %s12904_s20 = sand.u32 1, %s8916_s27  }
 0x55e   : > { %v8646_v60 = vrot.slane %v8645_v6, 2  ;;  %v8698_v63 = vadd.f32 %v8697_v26, %v8696_v52  ;;  %s8761_s28 = scalar_lea.hbm %s12967_s6, %s10452_s13  ;;  %s289_s8 = scalar_lea.vmem [#allocation5], %s8922_s17 }
 0x55f   : > { %s8748_s24 = sshll.u32 %s289_s8, 4  ;;  %s8750_s14 = sshll.u32 %s8746_s19, 4  ;;  %s8749_s24 = int_to_ptr.vmem [resolvable:$true] %s8748_s24  ;;  %s8751_s14 = int_to_ptr.hbm [resolvable:$true] %s8750_s14 }
 0x560   : > { %v8647_v20 = vadd.f32 %v8646_v60, %v8645_v6  ;;  %v8699_v43 = vrot.slane %v8698_v63, 2  ;;  %s296_s11 = scalar_lea.vmem [#allocation7], %s8922_s17  ;;  %s8765_s18 = sshll.u32 %s8761_s28, 4  ;;  %s12911_s18 = int_to_ptr.hbm [resolvable:$true] %s8765_s18 }
 0x561   : > { %s8763_s12 = sshll.u32 %s296_s11, 4  ;;  %s8711_s0 = scalar_lea.sflag [#allocation6], %s12904_s20  ;;  %s12909_s12 = int_to_ptr.vmem [resolvable:$true] %s8763_s12 }
 0x562   : > { %v8648_v29 = vrot.slane %v8647_v20, 1  ;;  %v8700_v24 = vadd.f32 %v8699_v43, %v8698_v63  ;;  %s10947_s27 = sshra.s32 %s8751_s14, 4  ;;  %s10953_s16 = scalar_lea.hbm %s12966_s5, 16  ;;  %s10948_s27 = int_to_ptr.hbm [resolvable:$true] %s10947_s27 }
 0x563   : > { %s10949_s13 = scalar_lea.hbm %s10948_s27, 8  ;;  %p10954_p10 = scmp.lt.s32.totalorder %s10948_s27, %s12966_s5 }
 0x564   : > { %v8649_v37 = vadd.f32 %v8648_v29, %v8647_v20  ;;  %v8701_v5 = vrot.slane %v8700_v24, 1  ;;  %p10950_p6 = scmp.ne.s32.totalorder %s10948_s27, %s10949_s13  ;;  %p10955_p11 = scmp.lt.s32.totalorder %s10953_s16, %s10949_s13 }
 0x566   : > { %8703 = vst [vmem:[%s289_s8] sm:$0xff] %v8649_v37  ;;  %v8702_v15 = vadd.f32 %v8701_v5, %v8700_v24  ;;  %p10951_p7 = pnand %p10950_p6, %p11125_p4  ;;  %p10956_p12 = por %p10955_p11, %p10954_p10 }
 0x568   : > { %p10952_p9 = pneg %p10951_p7 }
 0x56a   : > { %p10957_p13 = pnand %p10956_p12, %p10952_p9 }
 0x56c   : > { %10960 = shalt.err (!%p10957_p13)
}
 0x56d   : > { %10834 = dma.vmem_to_hbm [thread:$0]  (%p11125_p4), %s8749_s24, 128, %s8751_s14, %s8711_s0   ;;  %8704 = vst [vmem:[%s296_s11] sm:$0xff] %v8702_v15 }
 0x56e   : > { %s10975_s20 = sshra.s32 %s12911_s18, 4  ;;  %s10981_s27 = scalar_lea.hbm %s12967_s6, 16  ;;  %s10976_s20 = int_to_ptr.hbm [resolvable:$true] %s10975_s20 }
 0x56f   : > { %s10977_s28 = scalar_lea.hbm %s10976_s20, 8  ;;  %p10982_p3 = scmp.lt.s32.totalorder %s10976_s20, %s12967_s6 }
 0x570   : > { %p10978_p0 = scmp.ne.s32.totalorder %s10976_s20, %s10977_s28  ;;  %p10983_p5 = scmp.lt.s32.totalorder %s10981_s27, %s10977_s28 }
 0x572   : > { %p10979_p1 = pnand %p10978_p0, %p11125_p4  ;;  %p10984_p6 = por %p10983_p5, %p10982_p3 }
 0x574   : > { %p10980_p2 = pneg %p10979_p1 }
 0x576   : > { %p10985_p7 = pnand %p10984_p6, %p10980_p2 }
 0x578   : > { %10988 = shalt.err (!%p10985_p7)
}
 0x579   : > { %10835 = dma.vmem_to_hbm [thread:$0]  (%p11125_p4), %s12909_s12, 128, %s12911_s18, %s8711_s0  }
 0x57a PF: > { %p10849_p9 = scmp.ge.s32.totalorder %s11043_s26, 2  ;;  %s8777_s24 = sand.u32 1, %s11023_s21  }
 0x57b   : > { %s8778_s14 = scalar_lea.sflag [#allocation4], %s8777_s24 }
 0x57c   : > { %p10840_p10 = pnand %p10849_p9, %p11134_p8 }
 0x57e   : > { %p10841_p11 = pneg %p10840_p10 }
 0x580   : > { %11014 = dma.done.wait (%p10841_p11), %s8778_s14, 1536  }
 0x581   : > { %11016 = vsyncadd (%p10841_p11), %s8778_s14, 4294965760  ;;  %s12973_s11 = sadd.s32 4294967294, %s11043_s26  }
 0x582   : > { %s8787_s16 = sand.u32 1, %s12973_s11  }
 0x583   : > { %s8788_s19 = scalar_lea.sflag [#allocation6], %s8787_s16 }
 0x584   : > { %11018 = dma.done.wait (%p10841_p11), %s8788_s19, 256  }
 0x585   : > { %11020 = vsyncadd (%p10841_p11), %s8788_s19, 4294967040  ;;  %s23_s26 = sadd.s32 1, %s11043_s26   ;;  %s12974_s21 = smov %s11027_s22 }
 0x586   : > { %p20_p4 = scmp.ge.s32.totalorder %s23_s26, 4   ;;  %s12975_s22 = smov %s11031_s23 }
 0x587   : > { %s12976_s23 = smov %s11140_s10  ;;  %s12977_s24 = smov %s11039_s25 }
 0x588   : > { %s12978_s25 = smov %s12980_s29  ;;  %22 = sbr.rel (!%p20_p4) target bundleno = 8 (0x8), region = 130 }
 0x58d   :  { %8804 = vsyncpa [#allocation4], 1 }
 0x58e   :  { %8806 = vsyncpa [#allocation4 + $0x1], 1 }
 0x58f   :  { %8807 = vsyncpa [#allocation6], 1 }
 0x590   :  { %8809 = vsyncpa [#allocation6 + $0x1], 1 }

</bundles_post_ra>
